<compile_context>
chip_gen: v5e
topology: v5e:2x2
jax: 0.10.0
libtpu: 0.0.40
codegen_flags: <defaults>
</compile_context>

<pallas_src>
from functools import partial

import jax
import jax.numpy as jnp
from jax import lax
from jax.experimental import pallas as pl
from jax.experimental.pallas import tpu as pltpu


# ------------------------------ small helpers ------------------------------ #

def _is_pow2(n):
    return n > 0 and (n & (n - 1)) == 0


def _imod(v, m):
    """v % m on int32 lane vectors; bitwise AND for power-of-two m."""
    if _is_pow2(m):
        return jnp.bitwise_and(v, m - 1)
    # TODO(synk): confirm vector integer remainder lowering for non-pow2 dims.
    return jnp.remainder(v, m)


def _idiv(v, m):
    """v // m on int32 lane vectors; shift for power-of-two m."""
    if _is_pow2(m):
        return jnp.right_shift(v, int(m).bit_length() - 1)
    return v // m


# ----------------------------- Pallas kernel ------------------------------- #

def _basic_block_kernel(x_ref, w1_ref, w2_ref, s1_ref, b1_ref, s2_ref, b2_ref,
                        out_ref, patch_ref, *, D, H, W):
    """Fused BasicBlock; whole (lane-folded) batch per invocation.

    x_ref    : [C,  L]      bf16   L = N*D*H*W (batch folded into lanes)
    w*_ref   : [Cout, 27*C] f32    columns ordered (kd,kh,kw)-major, cin-minor
    s*/b*_ref: [Cout, 1]    f32    folded BatchNorm scale / bias
    out_ref  : [Cout, L]    bf16
    patch_ref: [27*C, L]    f32    VMEM scratch, reused by both convs
    """
    C = x_ref.shape[0]
    L = x_ref.shape[1]
    HW = H * W
    DHW = D * HW

    # ---- in-kernel boundary predicates (replaces the HBM [27, DHW] table) ----
    lane = lax.broadcasted_iota(jnp.int32, (1, L), 1)
    vox = _imod(lane, DHW)            # within-volume voxel id (period DHW)
    dd = _idiv(vox, HW)
    hw = _imod(vox, HW)
    hh = _idiv(hw, W)
    ww = _imod(hw, W)

    def pred(c):                       # bool (1,L) -> f32 0/1 (1,L)
        return jnp.where(c, 1.0, 0.0).astype(jnp.float32)

    d_ok = {0: pred(dd >= 1), 2: pred(dd <= D - 2)}
    h_ok = {0: pred(hh >= 1), 2: pred(hh <= H - 2)}
    w_ok = {0: pred(ww >= 1), 2: pred(ww <= W - 2)}

    # Precompute the 26 per-tap masks once; reused by both convs.
    tap_masks = {}
    for kd in range(3):
        for kh in range(3):
            for kw in range(3):
                if kd == kh == kw == 1:
                    continue
                m = None
                for k, tbl in ((kd, d_ok), (kh, h_ok), (kw, w_ok)):
                    if k != 1:
                        m = tbl[k] if m is None else m * tbl[k]
                tap_masks[(kd, kh, kw)] = m        # f32 (1, L)

    def conv_bn(act, w_ref, s_ref, b_ref):
        # act: [C, L] f32.  Build im2col patches [27*C, L] in the shared VMEM
        # scratch via 26 XLU lane rotations + boundary-mask multiplies (this
        # replaces zero padding), then ONE K=27*C MXU matmul with f32 accum.
        tap = 0
        for kd in range(3):
            for kh in range(3):
                for kw in range(3):
                    sft = (kd - 1) * HW + (kh - 1) * W + (kw - 1)
                    if sft == 0:
                        patch_ref[tap * C:(tap + 1) * C, :] = act  # center tap
                    else:
                        # want shifted[p] = act[p + sft]; pltpu.roll == np.roll:
                        # roll(x, r)[p] = x[(p - r) % L]  ->  r = (-sft) % L.
                        # In-bounds voxels never cross a batch boundary, and the
                        # wrap-around lanes are zeroed by the boundary mask.
                        shifted = pltpu.roll(act, (-sft) % L, axis=1)
                        patch_ref[tap * C:(tap + 1) * C, :] = (
                            shifted * tap_masks[(kd, kh, kw)])
                    tap += 1
        acc = jnp.dot(w_ref[...], patch_ref[...],
                      preferred_element_type=jnp.float32)   # [Cout, L] f32
        return acc * s_ref[...] + b_ref[...]                # folded BN

    # NOTE: the residual uses the bf16-quantized x (cast back to f32); this is
    # within test tolerance.  Feed f32 x if bit-closer parity is required.
    x = x_ref[...].astype(jnp.float32)                           # [C, L]
    h = jnp.maximum(conv_bn(x, w1_ref, s1_ref, b1_ref), 0.0)     # conv1+bn1+relu
    out = conv_bn(h, w2_ref, s2_ref, b2_ref) + x                 # conv2+bn2+res
    out_ref[...] = jnp.maximum(out, 0.0).astype(out_ref.dtype)   # final relu


# ----------------------------- Python wrapper ------------------------------- #

def _fold_bn(gamma, beta, mean, var, eps=1e-5):
    scale = gamma / jnp.sqrt(var + eps)
    bias = beta - mean * scale
    return scale.astype(jnp.float32), bias.astype(jnp.float32)


def _pack_weight(w_oidhw):
    """PyTorch [Cout, Cin, 3, 3, 3] -> [Cout, 27*Cin], tap-major / cin-minor."""
    cout, cin = w_oidhw.shape[:2]
    return jnp.transpose(w_oidhw, (0, 2, 3, 4, 1)).reshape(cout, 27 * cin)


@partial(jax.jit, static_argnames=("out_dtype",))
def basic_block_forward(x, params, *, out_dtype=jnp.bfloat16):
    """x: [N, C, D, H, W] (NCDHW).  stride=1, dilation=1, downsample=None."""
    N, C, D, H, W = x.shape
    cout = params["w1"].shape[0]
    assert cout == C == params["w2"].shape[0], "downsample=None needs inplanes==planes"
    DHW = D * H * W
    L = N * DHW                      # whole batch folded into the lane axis

    s1, b1 = _fold_bn(params["g1"], params["b1"], params["m1"], params["v1"])
    s2, b2 = _fold_bn(params["g2"], params["b2"], params["m2"], params["v2"])

    # Lane-dense bf16 activation feed: [C, N*DHW]; weights stay f32 (tiny).
    x_lanes = jnp.transpose(x, (1, 0, 2, 3, 4)).reshape(C, L).astype(jnp.bfloat16)
    w1 = _pack_weight(params["w1"]).astype(jnp.float32)
    w2 = _pack_weight(params["w2"]).astype(jnp.float32)

    res = lambda g: (0, 0)           # weights / BN params stay resident in VMEM

    out = pl.pallas_call(
        partial(_basic_block_kernel, D=D, H=H, W=W),
        out_shape=jax.ShapeDtypeStruct((cout, L), out_dtype),
        grid_spec=pltpu.PrefetchScalarGridSpec(
            num_scalar_prefetch=0,
            grid=(1,),               # one wide step; see TODO(synk) tiling note
            in_specs=[
                pl.BlockSpec((C, L), lambda g: (0, g)),        # x (lane-folded)
                pl.BlockSpec((cout, 27 * C), res),             # w1
                pl.BlockSpec((cout, 27 * cout), res),          # w2
                pl.BlockSpec((cout, 1), res),                  # scale1
                pl.BlockSpec((cout, 1), res),                  # bias1
                pl.BlockSpec((cout, 1), res),                  # scale2
                pl.BlockSpec((cout, 1), res),                  # bias2
            ],
            out_specs=pl.BlockSpec((cout, L), lambda g: (0, g)),
            scratch_shapes=[pltpu.VMEM((27 * C, L), jnp.float32)],  # im2col buf
        ),
        compiler_params=pltpu.CompilerParams(
            dimension_semantics=("parallel",),
            vmem_limit_bytes=32 * 1024 * 1024),
    )(x_lanes, w1, w2,
      s1.reshape(cout, 1), b1.reshape(cout, 1),
      s2.reshape(cout, 1), b2.reshape(cout, 1))

    out = jnp.transpose(out.reshape(cout, N, D, H, W), (1, 0, 2, 3, 4))
    return out                        # [N, C, D, H, W], out_dtype (bf16)


# ----------------------------- pure-JAX reference --------------------------- #

def basic_block_ref(x, params):
    def conv(y, w):
        return lax.conv_general_dilated(
            y, w, window_strides=(1, 1, 1),
            padding=((1, 1), (1, 1), (1, 1)),
            dimension_numbers=("NCDHW", "OIDHW", "NCDHW"))
    s1, b1 = _fold_bn(params["g1"], params["b1"], params["m1"], params["v1"])
    s2, b2 = _fold_bn(params["g2"], params["b2"], params["m2"], params["v2"])
    bshape = (1, -1, 1, 1, 1)
    out = conv(x, params["w1"]) * s1.reshape(bshape) + b1.reshape(bshape)
    out = jnp.maximum(out, 0.0)
    out = conv(out, params["w2"]) * s2.reshape(bshape) + b2.reshape(bshape)
    out = out + x
    return jnp.maximum(out, 0.0)


# ----------------------------------- main ----------------------------------- #

if __name__ == "__main__":
    key = jax.random.PRNGKey(0)
    keys = jax.random.split(key, 12)

    N, C, D, H, W = 2, 8, 8, 8, 8   # inplanes == planes (downsample=None)

    # PyTorch-native NCDHW input
    x = jax.random.normal(keys[0], (N, C, D, H, W), dtype=jnp.float32)

    params = {
        # conv weights, PyTorch layout [Cout, Cin, kd, kh, kw]
        "w1": 0.1 * jax.random.normal(keys[1], (C, C, 3, 3, 3), jnp.float32),
        "w2": 0.1 * jax.random.normal(keys[2], (C, C, 3, 3, 3), jnp.float32),
        # bn1 (inference-mode running stats)
        "g1": jax.random.uniform(keys[3], (C,), minval=0.8, maxval=1.2),
        "b1": 0.1 * jax.random.normal(keys[4], (C,)),
        "m1": 0.1 * jax.random.normal(keys[5], (C,)),
        "v1": jax.random.uniform(keys[6], (C,), minval=0.5, maxval=1.5),
        # bn2
        "g2": jax.random.uniform(keys[7], (C,), minval=0.8, maxval=1.2),
        "b2": 0.1 * jax.random.normal(keys[8], (C,)),
        "m2": 0.1 * jax.random.normal(keys[9], (C,)),
        "v2": jax.random.uniform(keys[10], (C,), minval=0.5, maxval=1.5),
    }

    out = jax.block_until_ready(basic_block_forward(x, params))
    ref = jax.block_until_ready(basic_block_ref(x, params))

    assert out.shape == ref.shape == (N, C, D, H, W)
    out_f32 = out.astype(jnp.float32)
    max_err = float(jnp.max(jnp.abs(out_f32 - ref)))
    # bf16 output + bf16 input quantization -> slightly looser atol than f32.
    assert jnp.allclose(out_f32, ref, rtol=5e-2, atol=1e-1), max_err
    print("KERNEL_OK")
</pallas_src>

<mosaic_0001>
module attributes {stable_mosaic.version = 11 : i64} {
  func.func @_basic_block_kernel(%arg0: i32, %arg1: memref<8x1024xbf16, #tpu.memory_space<vmem>>, %arg2: memref<8x216xf32, #tpu.memory_space<vmem>>, %arg3: memref<8x216xf32, #tpu.memory_space<vmem>>, %arg4: memref<8x1xf32, #tpu.memory_space<vmem>>, %arg5: memref<8x1xf32, #tpu.memory_space<vmem>>, %arg6: memref<8x1xf32, #tpu.memory_space<vmem>>, %arg7: memref<8x1xf32, #tpu.memory_space<vmem>>, %arg8: memref<8x1024xbf16, #tpu.memory_space<vmem>>, %arg9: memref<216x1024xf32, #tpu.memory_space<vmem>>) attributes {dimension_semantics = [#tpu.dimension_semantics<parallel>], iteration_bounds = array<i64: 1>, scalar_prefetch = 0 : i64, scratch_operands = 1 : i64, tpu.core_type = #tpu.core_type<tc>, window_params = [{transform_indices = @transform_0, window_bounds = array<i64: 8, 1024>}, {pipeline_mode = #tpu.pipeline_mode<synchronous>, transform_indices = @transform_1, window_bounds = array<i64: 8, 216>}, {pipeline_mode = #tpu.pipeline_mode<synchronous>, transform_indices = @transform_2, window_bounds = array<i64: 8, 216>}, {pipeline_mode = #tpu.pipeline_mode<synchronous>, transform_indices = @transform_3, window_bounds = array<i64: 8, 1>}, {pipeline_mode = #tpu.pipeline_mode<synchronous>, transform_indices = @transform_4, window_bounds = array<i64: 8, 1>}, {pipeline_mode = #tpu.pipeline_mode<synchronous>, transform_indices = @transform_5, window_bounds = array<i64: 8, 1>}, {pipeline_mode = #tpu.pipeline_mode<synchronous>, transform_indices = @transform_6, window_bounds = array<i64: 8, 1>}, {transform_indices = @transform_7, window_bounds = array<i64: 8, 1024>}]} {
    %0 = tpu.iota {dimensions = array<i32: 1>} : vector<1x1024xi32>
    %c511_i32 = arith.constant 511 : i32
    %1 = vector.broadcast %c511_i32 : i32 to vector<1x1024xi32>
    %2 = arith.andi %0, %1 : vector<1x1024xi32>
    %c6_i32 = arith.constant 6 : i32
    %3 = vector.broadcast %c6_i32 : i32 to vector<1x1024xi32>
    %4 = arith.shrsi %2, %3 : vector<1x1024xi32>
    %c63_i32 = arith.constant 63 : i32
    %5 = vector.broadcast %c63_i32 : i32 to vector<1x1024xi32>
    %6 = arith.andi %2, %5 : vector<1x1024xi32>
    %c3_i32 = arith.constant 3 : i32
    %7 = vector.broadcast %c3_i32 : i32 to vector<1x1024xi32>
    %8 = arith.shrsi %6, %7 : vector<1x1024xi32>
    %c7_i32 = arith.constant 7 : i32
    %9 = vector.broadcast %c7_i32 : i32 to vector<1x1024xi32>
    %10 = arith.andi %6, %9 : vector<1x1024xi32>
    %c1_i32 = arith.constant 1 : i32
    %11 = vector.broadcast %c1_i32 : i32 to vector<1x1024xi32>
    %12 = arith.cmpi sge, %4, %11 : vector<1x1024xi32>
    %cst = arith.constant 1.000000e+00 : f32
    %cst_0 = arith.constant 0.000000e+00 : f32
    %13 = vector.broadcast %cst : f32 to vector<1x1024xf32>
    %14 = vector.broadcast %cst_0 : f32 to vector<1x1024xf32>
    %15 = arith.select %12, %13, %14 : vector<1x1024xi1>, vector<1x1024xf32>
    %c6_i32_1 = arith.constant 6 : i32
    %16 = vector.broadcast %c6_i32_1 : i32 to vector<1x1024xi32>
    %17 = arith.cmpi sle, %4, %16 : vector<1x1024xi32>
    %cst_2 = arith.constant 1.000000e+00 : f32
    %cst_3 = arith.constant 0.000000e+00 : f32
    %18 = vector.broadcast %cst_2 : f32 to vector<1x1024xf32>
    %19 = vector.broadcast %cst_3 : f32 to vector<1x1024xf32>
    %20 = arith.select %17, %18, %19 : vector<1x1024xi1>, vector<1x1024xf32>
    %c1_i32_4 = arith.constant 1 : i32
    %21 = vector.broadcast %c1_i32_4 : i32 to vector<1x1024xi32>
    %22 = arith.cmpi sge, %8, %21 : vector<1x1024xi32>
    %cst_5 = arith.constant 1.000000e+00 : f32
    %cst_6 = arith.constant 0.000000e+00 : f32
    %23 = vector.broadcast %cst_5 : f32 to vector<1x1024xf32>
    %24 = vector.broadcast %cst_6 : f32 to vector<1x1024xf32>
    %25 = arith.select %22, %23, %24 : vector<1x1024xi1>, vector<1x1024xf32>
    %c6_i32_7 = arith.constant 6 : i32
    %26 = vector.broadcast %c6_i32_7 : i32 to vector<1x1024xi32>
    %27 = arith.cmpi sle, %8, %26 : vector<1x1024xi32>
    %cst_8 = arith.constant 1.000000e+00 : f32
    %cst_9 = arith.constant 0.000000e+00 : f32
    %28 = vector.broadcast %cst_8 : f32 to vector<1x1024xf32>
    %29 = vector.broadcast %cst_9 : f32 to vector<1x1024xf32>
    %30 = arith.select %27, %28, %29 : vector<1x1024xi1>, vector<1x1024xf32>
    %c1_i32_10 = arith.constant 1 : i32
    %31 = vector.broadcast %c1_i32_10 : i32 to vector<1x1024xi32>
    %32 = arith.cmpi sge, %10, %31 : vector<1x1024xi32>
    %cst_11 = arith.constant 1.000000e+00 : f32
    %cst_12 = arith.constant 0.000000e+00 : f32
    %33 = vector.broadcast %cst_11 : f32 to vector<1x1024xf32>
    %34 = vector.broadcast %cst_12 : f32 to vector<1x1024xf32>
    %35 = arith.select %32, %33, %34 : vector<1x1024xi1>, vector<1x1024xf32>
    %c6_i32_13 = arith.constant 6 : i32
    %36 = vector.broadcast %c6_i32_13 : i32 to vector<1x1024xi32>
    %37 = arith.cmpi sle, %10, %36 : vector<1x1024xi32>
    %cst_14 = arith.constant 1.000000e+00 : f32
    %cst_15 = arith.constant 0.000000e+00 : f32
    %38 = vector.broadcast %cst_14 : f32 to vector<1x1024xf32>
    %39 = vector.broadcast %cst_15 : f32 to vector<1x1024xf32>
    %40 = arith.select %37, %38, %39 : vector<1x1024xi1>, vector<1x1024xf32>
    %41 = arith.mulf %15, %25 : vector<1x1024xf32>
    %42 = arith.mulf %41, %35 : vector<1x1024xf32>
    %43 = arith.mulf %15, %25 : vector<1x1024xf32>
    %44 = arith.mulf %15, %25 : vector<1x1024xf32>
    %45 = arith.mulf %44, %40 : vector<1x1024xf32>
    %46 = arith.mulf %15, %35 : vector<1x1024xf32>
    %47 = arith.mulf %15, %40 : vector<1x1024xf32>
    %48 = arith.mulf %15, %30 : vector<1x1024xf32>
    %49 = arith.mulf %48, %35 : vector<1x1024xf32>
    %50 = arith.mulf %15, %30 : vector<1x1024xf32>
    %51 = arith.mulf %15, %30 : vector<1x1024xf32>
    %52 = arith.mulf %51, %40 : vector<1x1024xf32>
    %53 = arith.mulf %25, %35 : vector<1x1024xf32>
    %54 = arith.mulf %25, %40 : vector<1x1024xf32>
    %55 = arith.mulf %30, %35 : vector<1x1024xf32>
    %56 = arith.mulf %30, %40 : vector<1x1024xf32>
    %57 = arith.mulf %20, %25 : vector<1x1024xf32>
    %58 = arith.mulf %57, %35 : vector<1x1024xf32>
    %59 = arith.mulf %20, %25 : vector<1x1024xf32>
    %60 = arith.mulf %20, %25 : vector<1x1024xf32>
    %61 = arith.mulf %60, %40 : vector<1x1024xf32>
    %62 = arith.mulf %20, %35 : vector<1x1024xf32>
    %63 = arith.mulf %20, %40 : vector<1x1024xf32>
    %64 = arith.mulf %20, %30 : vector<1x1024xf32>
    %65 = arith.mulf %64, %35 : vector<1x1024xf32>
    %66 = arith.mulf %20, %30 : vector<1x1024xf32>
    %67 = arith.mulf %20, %30 : vector<1x1024xf32>
    %68 = arith.mulf %67, %40 : vector<1x1024xf32>
    %c0 = arith.constant 0 : index
    %c0_16 = arith.constant 0 : index
    %69 = vector.load %arg1[%c0, %c0_16] : memref<8x1024xbf16, #tpu.memory_space<vmem>>, vector<8x1024xbf16>
    %70 = arith.extf %69 : vector<8x1024xbf16> to vector<8x1024xf32>
    %c73_i32 = arith.constant 73 : i32
    %71 = tpu.dynamic_rotate %70 by %c73_i32 dim 1 : vector<8x1024xf32>, i32 -> vector<8x1024xf32>
    %72 = vector.broadcast %42 : vector<1x1024xf32> to vector<8x1024xf32>
    %73 = arith.mulf %71, %72 : vector<8x1024xf32>
    %c0_17 = arith.constant 0 : index
    %c0_18 = arith.constant 0 : index
    %74 = vector.load %arg9[%c0_17, %c0_18] : memref<216x1024xf32, #tpu.memory_space<vmem>>, vector<8x1024xf32>
    tpu.vector_store %arg9[%c0_17, %c0_18], %73 {strides = array<i32>} : memref<216x1024xf32, #tpu.memory_space<vmem>>, vector<8x1024xf32>,
    %c72_i32 = arith.constant 72 : i32
    %75 = tpu.dynamic_rotate %70 by %c72_i32 dim 1 : vector<8x1024xf32>, i32 -> vector<8x1024xf32>
    %76 = vector.broadcast %43 : vector<1x1024xf32> to vector<8x1024xf32>
    %77 = arith.mulf %75, %76 : vector<8x1024xf32>
    %c8 = arith.constant 8 : index
    %c0_19 = arith.constant 0 : index
    %78 = vector.load %arg9[%c8, %c0_19] : memref<216x1024xf32, #tpu.memory_space<vmem>>, vector<8x1024xf32>
    tpu.vector_store %arg9[%c8, %c0_19], %77 {strides = array<i32>} : memref<216x1024xf32, #tpu.memory_space<vmem>>, vector<8x1024xf32>,
    %c71_i32 = arith.constant 71 : i32
    %79 = tpu.dynamic_rotate %70 by %c71_i32 dim 1 : vector<8x1024xf32>, i32 -> vector<8x1024xf32>
    %80 = vector.broadcast %45 : vector<1x1024xf32> to vector<8x1024xf32>
    %81 = arith.mulf %79, %80 : vector<8x1024xf32>
    %c16 = arith.constant 16 : index
    %c0_20 = arith.constant 0 : index
    %82 = vector.load %arg9[%c16, %c0_20] : memref<216x1024xf32, #tpu.memory_space<vmem>>, vector<8x1024xf32>
    tpu.vector_store %arg9[%c16, %c0_20], %81 {strides = array<i32>} : memref<216x1024xf32, #tpu.memory_space<vmem>>, vector<8x1024xf32>,
    %c65_i32 = arith.constant 65 : i32
    %83 = tpu.dynamic_rotate %70 by %c65_i32 dim 1 : vector<8x1024xf32>, i32 -> vector<8x1024xf32>
    %84 = vector.broadcast %46 : vector<1x1024xf32> to vector<8x1024xf32>
    %85 = arith.mulf %83, %84 : vector<8x1024xf32>
    %c24 = arith.constant 24 : index
    %c0_21 = arith.constant 0 : index
    %86 = vector.load %arg9[%c24, %c0_21] : memref<216x1024xf32, #tpu.memory_space<vmem>>, vector<8x1024xf32>
    tpu.vector_store %arg9[%c24, %c0_21], %85 {strides = array<i32>} : memref<216x1024xf32, #tpu.memory_space<vmem>>, vector<8x1024xf32>,
    %c64_i32 = arith.constant 64 : i32
    %87 = tpu.dynamic_rotate %70 by %c64_i32 dim 1 : vector<8x1024xf32>, i32 -> vector<8x1024xf32>
    %88 = vector.broadcast %15 : vector<1x1024xf32> to vector<8x1024xf32>
    %89 = arith.mulf %87, %88 : vector<8x1024xf32>
    %c32 = arith.constant 32 : index
    %c0_22 = arith.constant 0 : index
    %90 = vector.load %arg9[%c32, %c0_22] : memref<216x1024xf32, #tpu.memory_space<vmem>>, vector<8x1024xf32>
    tpu.vector_store %arg9[%c32, %c0_22], %89 {strides = array<i32>} : memref<216x1024xf32, #tpu.memory_space<vmem>>, vector<8x1024xf32>,
    %c63_i32_23 = arith.constant 63 : i32
    %91 = tpu.dynamic_rotate %70 by %c63_i32_23 dim 1 : vector<8x1024xf32>, i32 -> vector<8x1024xf32>
    %92 = vector.broadcast %47 : vector<1x1024xf32> to vector<8x1024xf32>
    %93 = arith.mulf %91, %92 : vector<8x1024xf32>
    %c40 = arith.constant 40 : index
    %c0_24 = arith.constant 0 : index
    %94 = vector.load %arg9[%c40, %c0_24] : memref<216x1024xf32, #tpu.memory_space<vmem>>, vector<8x1024xf32>
    tpu.vector_store %arg9[%c40, %c0_24], %93 {strides = array<i32>} : memref<216x1024xf32, #tpu.memory_space<vmem>>, vector<8x1024xf32>,
    %c57_i32 = arith.constant 57 : i32
    %95 = tpu.dynamic_rotate %70 by %c57_i32 dim 1 : vector<8x1024xf32>, i32 -> vector<8x1024xf32>
    %96 = vector.broadcast %49 : vector<1x1024xf32> to vector<8x1024xf32>
    %97 = arith.mulf %95, %96 : vector<8x1024xf32>
    %c48 = arith.constant 48 : index
    %c0_25 = arith.constant 0 : index
    %98 = vector.load %arg9[%c48, %c0_25] : memref<216x1024xf32, #tpu.memory_space<vmem>>, vector<8x1024xf32>
    tpu.vector_store %arg9[%c48, %c0_25], %97 {strides = array<i32>} : memref<216x1024xf32, #tpu.memory_space<vmem>>, vector<8x1024xf32>,
    %c56_i32 = arith.constant 56 : i32
    %99 = tpu.dynamic_rotate %70 by %c56_i32 dim 1 : vector<8x1024xf32>, i32 -> vector<8x1024xf32>
    %100 = vector.broadcast %50 : vector<1x1024xf32> to vector<8x1024xf32>
    %101 = arith.mulf %99, %100 : vector<8x1024xf32>
    %c56 = arith.constant 56 : index
    %c0_26 = arith.constant 0 : index
    %102 = vector.load %arg9[%c56, %c0_26] : memref<216x1024xf32, #tpu.memory_space<vmem>>, vector<8x1024xf32>
    tpu.vector_store %arg9[%c56, %c0_26], %101 {strides = array<i32>} : memref<216x1024xf32, #tpu.memory_space<vmem>>, vector<8x1024xf32>,
    %c55_i32 = arith.constant 55 : i32
    %103 = tpu.dynamic_rotate %70 by %c55_i32 dim 1 : vector<8x1024xf32>, i32 -> vector<8x1024xf32>
    %104 = vector.broadcast %52 : vector<1x1024xf32> to vector<8x1024xf32>
    %105 = arith.mulf %103, %104 : vector<8x1024xf32>
    %c64 = arith.constant 64 : index
    %c0_27 = arith.constant 0 : index
    %106 = vector.load %arg9[%c64, %c0_27] : memref<216x1024xf32, #tpu.memory_space<vmem>>, vector<8x1024xf32>
    tpu.vector_store %arg9[%c64, %c0_27], %105 {strides = array<i32>} : memref<216x1024xf32, #tpu.memory_space<vmem>>, vector<8x1024xf32>,
    %c9_i32 = arith.constant 9 : i32
    %107 = tpu.dynamic_rotate %70 by %c9_i32 dim 1 : vector<8x1024xf32>, i32 -> vector<8x1024xf32>
    %108 = vector.broadcast %53 : vector<1x1024xf32> to vector<8x1024xf32>
    %109 = arith.mulf %107, %108 : vector<8x1024xf32>
    %c72 = arith.constant 72 : index
    %c0_28 = arith.constant 0 : index
    %110 = vector.load %arg9[%c72, %c0_28] : memref<216x1024xf32, #tpu.memory_space<vmem>>, vector<8x1024xf32>
    tpu.vector_store %arg9[%c72, %c0_28], %109 {strides = array<i32>} : memref<216x1024xf32, #tpu.memory_space<vmem>>, vector<8x1024xf32>,
    %c8_i32 = arith.constant 8 : i32
    %111 = tpu.dynamic_rotate %70 by %c8_i32 dim 1 : vector<8x1024xf32>, i32 -> vector<8x1024xf32>
    %112 = vector.broadcast %25 : vector<1x1024xf32> to vector<8x1024xf32>
    %113 = arith.mulf %111, %112 : vector<8x1024xf32>
    %c80 = arith.constant 80 : index
    %c0_29 = arith.constant 0 : index
    %114 = vector.load %arg9[%c80, %c0_29] : memref<216x1024xf32, #tpu.memory_space<vmem>>, vector<8x1024xf32>
    tpu.vector_store %arg9[%c80, %c0_29], %113 {strides = array<i32>} : memref<216x1024xf32, #tpu.memory_space<vmem>>, vector<8x1024xf32>,
    %c7_i32_30 = arith.constant 7 : i32
    %115 = tpu.dynamic_rotate %70 by %c7_i32_30 dim 1 : vector<8x1024xf32>, i32 -> vector<8x1024xf32>
    %116 = vector.broadcast %54 : vector<1x1024xf32> to vector<8x1024xf32>
    %117 = arith.mulf %115, %116 : vector<8x1024xf32>
    %c88 = arith.constant 88 : index
    %c0_31 = arith.constant 0 : index
    %118 = vector.load %arg9[%c88, %c0_31] : memref<216x1024xf32, #tpu.memory_space<vmem>>, vector<8x1024xf32>
    tpu.vector_store %arg9[%c88, %c0_31], %117 {strides = array<i32>} : memref<216x1024xf32, #tpu.memory_space<vmem>>, vector<8x1024xf32>,
    %c1_i32_32 = arith.constant 1 : i32
    %119 = tpu.dynamic_rotate %70 by %c1_i32_32 dim 1 : vector<8x1024xf32>, i32 -> vector<8x1024xf32>
    %120 = vector.broadcast %35 : vector<1x1024xf32> to vector<8x1024xf32>
    %121 = arith.mulf %119, %120 : vector<8x1024xf32>
    %c96 = arith.constant 96 : index
    %c0_33 = arith.constant 0 : index
    %122 = vector.load %arg9[%c96, %c0_33] : memref<216x1024xf32, #tpu.memory_space<vmem>>, vector<8x1024xf32>
    tpu.vector_store %arg9[%c96, %c0_33], %121 {strides = array<i32>} : memref<216x1024xf32, #tpu.memory_space<vmem>>, vector<8x1024xf32>,
    %c104 = arith.constant 104 : index
    %c0_34 = arith.constant 0 : index
    %123 = vector.load %arg9[%c104, %c0_34] : memref<216x1024xf32, #tpu.memory_space<vmem>>, vector<8x1024xf32>
    tpu.vector_store %arg9[%c104, %c0_34], %70 {strides = array<i32>} : memref<216x1024xf32, #tpu.memory_space<vmem>>, vector<8x1024xf32>,
    %c1023_i32 = arith.constant 1023 : i32
    %124 = tpu.dynamic_rotate %70 by %c1023_i32 dim 1 : vector<8x1024xf32>, i32 -> vector<8x1024xf32>
    %125 = vector.broadcast %40 : vector<1x1024xf32> to vector<8x1024xf32>
    %126 = arith.mulf %124, %125 : vector<8x1024xf32>
    %c112 = arith.constant 112 : index
    %c0_35 = arith.constant 0 : index
    %127 = vector.load %arg9[%c112, %c0_35] : memref<216x1024xf32, #tpu.memory_space<vmem>>, vector<8x1024xf32>
    tpu.vector_store %arg9[%c112, %c0_35], %126 {strides = array<i32>} : memref<216x1024xf32, #tpu.memory_space<vmem>>, vector<8x1024xf32>,
    %c1017_i32 = arith.constant 1017 : i32
    %128 = tpu.dynamic_rotate %70 by %c1017_i32 dim 1 : vector<8x1024xf32>, i32 -> vector<8x1024xf32>
    %129 = vector.broadcast %55 : vector<1x1024xf32> to vector<8x1024xf32>
    %130 = arith.mulf %128, %129 : vector<8x1024xf32>
    %c120 = arith.constant 120 : index
    %c0_36 = arith.constant 0 : index
    %131 = vector.load %arg9[%c120, %c0_36] : memref<216x1024xf32, #tpu.memory_space<vmem>>, vector<8x1024xf32>
    tpu.vector_store %arg9[%c120, %c0_36], %130 {strides = array<i32>} : memref<216x1024xf32, #tpu.memory_space<vmem>>, vector<8x1024xf32>,
    %c1016_i32 = arith.constant 1016 : i32
    %132 = tpu.dynamic_rotate %70 by %c1016_i32 dim 1 : vector<8x1024xf32>, i32 -> vector<8x1024xf32>
    %133 = vector.broadcast %30 : vector<1x1024xf32> to vector<8x1024xf32>
    %134 = arith.mulf %132, %133 : vector<8x1024xf32>
    %c128 = arith.constant 128 : index
    %c0_37 = arith.constant 0 : index
    %135 = vector.load %arg9[%c128, %c0_37] : memref<216x1024xf32, #tpu.memory_space<vmem>>, vector<8x1024xf32>
    tpu.vector_store %arg9[%c128, %c0_37], %134 {strides = array<i32>} : memref<216x1024xf32, #tpu.memory_space<vmem>>, vector<8x1024xf32>,
    %c1015_i32 = arith.constant 1015 : i32
    %136 = tpu.dynamic_rotate %70 by %c1015_i32 dim 1 : vector<8x1024xf32>, i32 -> vector<8x1024xf32>
    %137 = vector.broadcast %56 : vector<1x1024xf32> to vector<8x1024xf32>
    %138 = arith.mulf %136, %137 : vector<8x1024xf32>
    %c136 = arith.constant 136 : index
    %c0_38 = arith.constant 0 : index
    %139 = vector.load %arg9[%c136, %c0_38] : memref<216x1024xf32, #tpu.memory_space<vmem>>, vector<8x1024xf32>
    tpu.vector_store %arg9[%c136, %c0_38], %138 {strides = array<i32>} : memref<216x1024xf32, #tpu.memory_space<vmem>>, vector<8x1024xf32>,
    %c969_i32 = arith.constant 969 : i32
    %140 = tpu.dynamic_rotate %70 by %c969_i32 dim 1 : vector<8x1024xf32>, i32 -> vector<8x1024xf32>
    %141 = vector.broadcast %58 : vector<1x1024xf32> to vector<8x1024xf32>
    %142 = arith.mulf %140, %141 : vector<8x1024xf32>
    %c144 = arith.constant 144 : index
    %c0_39 = arith.constant 0 : index
    %143 = vector.load %arg9[%c144, %c0_39] : memref<216x1024xf32, #tpu.memory_space<vmem>>, vector<8x1024xf32>
    tpu.vector_store %arg9[%c144, %c0_39], %142 {strides = array<i32>} : memref<216x1024xf32, #tpu.memory_space<vmem>>, vector<8x1024xf32>,
    %c968_i32 = arith.constant 968 : i32
    %144 = tpu.dynamic_rotate %70 by %c968_i32 dim 1 : vector<8x1024xf32>, i32 -> vector<8x1024xf32>
    %145 = vector.broadcast %59 : vector<1x1024xf32> to vector<8x1024xf32>
    %146 = arith.mulf %144, %145 : vector<8x1024xf32>
    %c152 = arith.constant 152 : index
    %c0_40 = arith.constant 0 : index
    %147 = vector.load %arg9[%c152, %c0_40] : memref<216x1024xf32, #tpu.memory_space<vmem>>, vector<8x1024xf32>
    tpu.vector_store %arg9[%c152, %c0_40], %146 {strides = array<i32>} : memref<216x1024xf32, #tpu.memory_space<vmem>>, vector<8x1024xf32>,
    %c967_i32 = arith.constant 967 : i32
    %148 = tpu.dynamic_rotate %70 by %c967_i32 dim 1 : vector<8x1024xf32>, i32 -> vector<8x1024xf32>
    %149 = vector.broadcast %61 : vector<1x1024xf32> to vector<8x1024xf32>
    %150 = arith.mulf %148, %149 : vector<8x1024xf32>
    %c160 = arith.constant 160 : index
    %c0_41 = arith.constant 0 : index
    %151 = vector.load %arg9[%c160, %c0_41] : memref<216x1024xf32, #tpu.memory_space<vmem>>, vector<8x1024xf32>
    tpu.vector_store %arg9[%c160, %c0_41], %150 {strides = array<i32>} : memref<216x1024xf32, #tpu.memory_space<vmem>>, vector<8x1024xf32>,
    %c961_i32 = arith.constant 961 : i32
    %152 = tpu.dynamic_rotate %70 by %c961_i32 dim 1 : vector<8x1024xf32>, i32 -> vector<8x1024xf32>
    %153 = vector.broadcast %62 : vector<1x1024xf32> to vector<8x1024xf32>
    %154 = arith.mulf %152, %153 : vector<8x1024xf32>
    %c168 = arith.constant 168 : index
    %c0_42 = arith.constant 0 : index
    %155 = vector.load %arg9[%c168, %c0_42] : memref<216x1024xf32, #tpu.memory_space<vmem>>, vector<8x1024xf32>
    tpu.vector_store %arg9[%c168, %c0_42], %154 {strides = array<i32>} : memref<216x1024xf32, #tpu.memory_space<vmem>>, vector<8x1024xf32>,
    %c960_i32 = arith.constant 960 : i32
    %156 = tpu.dynamic_rotate %70 by %c960_i32 dim 1 : vector<8x1024xf32>, i32 -> vector<8x1024xf32>
    %157 = vector.broadcast %20 : vector<1x1024xf32> to vector<8x1024xf32>
    %158 = arith.mulf %156, %157 : vector<8x1024xf32>
    %c176 = arith.constant 176 : index
    %c0_43 = arith.constant 0 : index
    %159 = vector.load %arg9[%c176, %c0_43] : memref<216x1024xf32, #tpu.memory_space<vmem>>, vector<8x1024xf32>
    tpu.vector_store %arg9[%c176, %c0_43], %158 {strides = array<i32>} : memref<216x1024xf32, #tpu.memory_space<vmem>>, vector<8x1024xf32>,
    %c959_i32 = arith.constant 959 : i32
    %160 = tpu.dynamic_rotate %70 by %c959_i32 dim 1 : vector<8x1024xf32>, i32 -> vector<8x1024xf32>
    %161 = vector.broadcast %63 : vector<1x1024xf32> to vector<8x1024xf32>
    %162 = arith.mulf %160, %161 : vector<8x1024xf32>
    %c184 = arith.constant 184 : index
    %c0_44 = arith.constant 0 : index
    %163 = vector.load %arg9[%c184, %c0_44] : memref<216x1024xf32, #tpu.memory_space<vmem>>, vector<8x1024xf32>
    tpu.vector_store %arg9[%c184, %c0_44], %162 {strides = array<i32>} : memref<216x1024xf32, #tpu.memory_space<vmem>>, vector<8x1024xf32>,
    %c953_i32 = arith.constant 953 : i32
    %164 = tpu.dynamic_rotate %70 by %c953_i32 dim 1 : vector<8x1024xf32>, i32 -> vector<8x1024xf32>
    %165 = vector.broadcast %65 : vector<1x1024xf32> to vector<8x1024xf32>
    %166 = arith.mulf %164, %165 : vector<8x1024xf32>
    %c192 = arith.constant 192 : index
    %c0_45 = arith.constant 0 : index
    %167 = vector.load %arg9[%c192, %c0_45] : memref<216x1024xf32, #tpu.memory_space<vmem>>, vector<8x1024xf32>
    tpu.vector_store %arg9[%c192, %c0_45], %166 {strides = array<i32>} : memref<216x1024xf32, #tpu.memory_space<vmem>>, vector<8x1024xf32>,
    %c952_i32 = arith.constant 952 : i32
    %168 = tpu.dynamic_rotate %70 by %c952_i32 dim 1 : vector<8x1024xf32>, i32 -> vector<8x1024xf32>
    %169 = vector.broadcast %66 : vector<1x1024xf32> to vector<8x1024xf32>
    %170 = arith.mulf %168, %169 : vector<8x1024xf32>
    %c200 = arith.constant 200 : index
    %c0_46 = arith.constant 0 : index
    %171 = vector.load %arg9[%c200, %c0_46] : memref<216x1024xf32, #tpu.memory_space<vmem>>, vector<8x1024xf32>
    tpu.vector_store %arg9[%c200, %c0_46], %170 {strides = array<i32>} : memref<216x1024xf32, #tpu.memory_space<vmem>>, vector<8x1024xf32>,
    %c951_i32 = arith.constant 951 : i32
    %172 = tpu.dynamic_rotate %70 by %c951_i32 dim 1 : vector<8x1024xf32>, i32 -> vector<8x1024xf32>
    %173 = vector.broadcast %68 : vector<1x1024xf32> to vector<8x1024xf32>
    %174 = arith.mulf %172, %173 : vector<8x1024xf32>
    %c208 = arith.constant 208 : index
    %c0_47 = arith.constant 0 : index
    %175 = vector.load %arg9[%c208, %c0_47] : memref<216x1024xf32, #tpu.memory_space<vmem>>, vector<8x1024xf32>
    tpu.vector_store %arg9[%c208, %c0_47], %174 {strides = array<i32>} : memref<216x1024xf32, #tpu.memory_space<vmem>>, vector<8x1024xf32>,
    %c0_48 = arith.constant 0 : index
    %c0_49 = arith.constant 0 : index
    %176 = vector.load %arg2[%c0_48, %c0_49] : memref<8x216xf32, #tpu.memory_space<vmem>>, vector<8x216xf32>
    %c0_50 = arith.constant 0 : index
    %c0_51 = arith.constant 0 : index
    %177 = vector.load %arg9[%c0_50, %c0_51] : memref<216x1024xf32, #tpu.memory_space<vmem>>, vector<216x1024xf32>
    %cst_52 = arith.constant dense<0.000000e+00> : vector<8x1024xf32>
    %178 = tpu.matmul %176, %177, %cst_52 {dimension_numbers = #tpu.dot_dimension_numbers<[1], [0], [0], [1], [0, 0, 1, 1], [], []>} : vector<8x216xf32>, vector<216x1024xf32>, vector<8x1024xf32> -> vector<8x1024xf32>
    %c0_53 = arith.constant 0 : index
    %c0_54 = arith.constant 0 : index
    %179 = vector.load %arg4[%c0_53, %c0_54] : memref<8x1xf32, #tpu.memory_space<vmem>>, vector<8x1xf32>
    %180 = vector.broadcast %179 : vector<8x1xf32> to vector<8x1024xf32>
    %181 = arith.mulf %178, %180 : vector<8x1024xf32>
    %c0_55 = arith.constant 0 : index
    %c0_56 = arith.constant 0 : index
    %182 = vector.load %arg5[%c0_55, %c0_56] : memref<8x1xf32, #tpu.memory_space<vmem>>, vector<8x1xf32>
    %183 = vector.broadcast %182 : vector<8x1xf32> to vector<8x1024xf32>
    %184 = arith.addf %181, %183 : vector<8x1024xf32>
    %cst_57 = arith.constant 0.000000e+00 : f32
    %185 = vector.broadcast %cst_57 : f32 to vector<8x1024xf32>
    %186 = arith.maximumf %184, %185 : vector<8x1024xf32>
    %c73_i32_58 = arith.constant 73 : i32
    %187 = tpu.dynamic_rotate %186 by %c73_i32_58 dim 1 : vector<8x1024xf32>, i32 -> vector<8x1024xf32>
    %188 = vector.broadcast %42 : vector<1x1024xf32> to vector<8x1024xf32>
    %189 = arith.mulf %187, %188 : vector<8x1024xf32>
    %c0_59 = arith.constant 0 : index
    %c0_60 = arith.constant 0 : index
    %190 = vector.load %arg9[%c0_59, %c0_60] : memref<216x1024xf32, #tpu.memory_space<vmem>>, vector<8x1024xf32>
    tpu.vector_store %arg9[%c0_59, %c0_60], %189 {strides = array<i32>} : memref<216x1024xf32, #tpu.memory_space<vmem>>, vector<8x1024xf32>,
    %c72_i32_61 = arith.constant 72 : i32
    %191 = tpu.dynamic_rotate %186 by %c72_i32_61 dim 1 : vector<8x1024xf32>, i32 -> vector<8x1024xf32>
    %192 = vector.broadcast %43 : vector<1x1024xf32> to vector<8x1024xf32>
    %193 = arith.mulf %191, %192 : vector<8x1024xf32>
    %c8_62 = arith.constant 8 : index
    %c0_63 = arith.constant 0 : index
    %194 = vector.load %arg9[%c8_62, %c0_63] : memref<216x1024xf32, #tpu.memory_space<vmem>>, vector<8x1024xf32>
    tpu.vector_store %arg9[%c8_62, %c0_63], %193 {strides = array<i32>} : memref<216x1024xf32, #tpu.memory_space<vmem>>, vector<8x1024xf32>,
    %c71_i32_64 = arith.constant 71 : i32
    %195 = tpu.dynamic_rotate %186 by %c71_i32_64 dim 1 : vector<8x1024xf32>, i32 -> vector<8x1024xf32>
    %196 = vector.broadcast %45 : vector<1x1024xf32> to vector<8x1024xf32>
    %197 = arith.mulf %195, %196 : vector<8x1024xf32>
    %c16_65 = arith.constant 16 : index
    %c0_66 = arith.constant 0 : index
    %198 = vector.load %arg9[%c16_65, %c0_66] : memref<216x1024xf32, #tpu.memory_space<vmem>>, vector<8x1024xf32>
    tpu.vector_store %arg9[%c16_65, %c0_66], %197 {strides = array<i32>} : memref<216x1024xf32, #tpu.memory_space<vmem>>, vector<8x1024xf32>,
    %c65_i32_67 = arith.constant 65 : i32
    %199 = tpu.dynamic_rotate %186 by %c65_i32_67 dim 1 : vector<8x1024xf32>, i32 -> vector<8x1024xf32>
    %200 = vector.broadcast %46 : vector<1x1024xf32> to vector<8x1024xf32>
    %201 = arith.mulf %199, %200 : vector<8x1024xf32>
    %c24_68 = arith.constant 24 : index
    %c0_69 = arith.constant 0 : index
    %202 = vector.load %arg9[%c24_68, %c0_69] : memref<216x1024xf32, #tpu.memory_space<vmem>>, vector<8x1024xf32>
    tpu.vector_store %arg9[%c24_68, %c0_69], %201 {strides = array<i32>} : memref<216x1024xf32, #tpu.memory_space<vmem>>, vector<8x1024xf32>,
    %c64_i32_70 = arith.constant 64 : i32
    %203 = tpu.dynamic_rotate %186 by %c64_i32_70 dim 1 : vector<8x1024xf32>, i32 -> vector<8x1024xf32>
    %204 = vector.broadcast %15 : vector<1x1024xf32> to vector<8x1024xf32>
    %205 = arith.mulf %203, %204 : vector<8x1024xf32>
    %c32_71 = arith.constant 32 : index
    %c0_72 = arith.constant 0 : index
    %206 = vector.load %arg9[%c32_71, %c0_72] : memref<216x1024xf32, #tpu.memory_space<vmem>>, vector<8x1024xf32>
    tpu.vector_store %arg9[%c32_71, %c0_72], %205 {strides = array<i32>} : memref<216x1024xf32, #tpu.memory_space<vmem>>, vector<8x1024xf32>,
    %c63_i32_73 = arith.constant 63 : i32
    %207 = tpu.dynamic_rotate %186 by %c63_i32_73 dim 1 : vector<8x1024xf32>, i32 -> vector<8x1024xf32>
    %208 = vector.broadcast %47 : vector<1x1024xf32> to vector<8x1024xf32>
    %209 = arith.mulf %207, %208 : vector<8x1024xf32>
    %c40_74 = arith.constant 40 : index
    %c0_75 = arith.constant 0 : index
    %210 = vector.load %arg9[%c40_74, %c0_75] : memref<216x1024xf32, #tpu.memory_space<vmem>>, vector<8x1024xf32>
    tpu.vector_store %arg9[%c40_74, %c0_75], %209 {strides = array<i32>} : memref<216x1024xf32, #tpu.memory_space<vmem>>, vector<8x1024xf32>,
    %c57_i32_76 = arith.constant 57 : i32
    %211 = tpu.dynamic_rotate %186 by %c57_i32_76 dim 1 : vector<8x1024xf32>, i32 -> vector<8x1024xf32>
    %212 = vector.broadcast %49 : vector<1x1024xf32> to vector<8x1024xf32>
    %213 = arith.mulf %211, %212 : vector<8x1024xf32>
    %c48_77 = arith.constant 48 : index
    %c0_78 = arith.constant 0 : index
    %214 = vector.load %arg9[%c48_77, %c0_78] : memref<216x1024xf32, #tpu.memory_space<vmem>>, vector<8x1024xf32>
    tpu.vector_store %arg9[%c48_77, %c0_78], %213 {strides = array<i32>} : memref<216x1024xf32, #tpu.memory_space<vmem>>, vector<8x1024xf32>,
    %c56_i32_79 = arith.constant 56 : i32
    %215 = tpu.dynamic_rotate %186 by %c56_i32_79 dim 1 : vector<8x1024xf32>, i32 -> vector<8x1024xf32>
    %216 = vector.broadcast %50 : vector<1x1024xf32> to vector<8x1024xf32>
    %217 = arith.mulf %215, %216 : vector<8x1024xf32>
    %c56_80 = arith.constant 56 : index
    %c0_81 = arith.constant 0 : index
    %218 = vector.load %arg9[%c56_80, %c0_81] : memref<216x1024xf32, #tpu.memory_space<vmem>>, vector<8x1024xf32>
    tpu.vector_store %arg9[%c56_80, %c0_81], %217 {strides = array<i32>} : memref<216x1024xf32, #tpu.memory_space<vmem>>, vector<8x1024xf32>,
    %c55_i32_82 = arith.constant 55 : i32
    %219 = tpu.dynamic_rotate %186 by %c55_i32_82 dim 1 : vector<8x1024xf32>, i32 -> vector<8x1024xf32>
    %220 = vector.broadcast %52 : vector<1x1024xf32> to vector<8x1024xf32>
    %221 = arith.mulf %219, %220 : vector<8x1024xf32>
    %c64_83 = arith.constant 64 : index
    %c0_84 = arith.constant 0 : index
    %222 = vector.load %arg9[%c64_83, %c0_84] : memref<216x1024xf32, #tpu.memory_space<vmem>>, vector<8x1024xf32>
    tpu.vector_store %arg9[%c64_83, %c0_84], %221 {strides = array<i32>} : memref<216x1024xf32, #tpu.memory_space<vmem>>, vector<8x1024xf32>,
    %c9_i32_85 = arith.constant 9 : i32
    %223 = tpu.dynamic_rotate %186 by %c9_i32_85 dim 1 : vector<8x1024xf32>, i32 -> vector<8x1024xf32>
    %224 = vector.broadcast %53 : vector<1x1024xf32> to vector<8x1024xf32>
    %225 = arith.mulf %223, %224 : vector<8x1024xf32>
    %c72_86 = arith.constant 72 : index
    %c0_87 = arith.constant 0 : index
    %226 = vector.load %arg9[%c72_86, %c0_87] : memref<216x1024xf32, #tpu.memory_space<vmem>>, vector<8x1024xf32>
    tpu.vector_store %arg9[%c72_86, %c0_87], %225 {strides = array<i32>} : memref<216x1024xf32, #tpu.memory_space<vmem>>, vector<8x1024xf32>,
    %c8_i32_88 = arith.constant 8 : i32
    %227 = tpu.dynamic_rotate %186 by %c8_i32_88 dim 1 : vector<8x1024xf32>, i32 -> vector<8x1024xf32>
    %228 = vector.broadcast %25 : vector<1x1024xf32> to vector<8x1024xf32>
    %229 = arith.mulf %227, %228 : vector<8x1024xf32>
    %c80_89 = arith.constant 80 : index
    %c0_90 = arith.constant 0 : index
    %230 = vector.load %arg9[%c80_89, %c0_90] : memref<216x1024xf32, #tpu.memory_space<vmem>>, vector<8x1024xf32>
    tpu.vector_store %arg9[%c80_89, %c0_90], %229 {strides = array<i32>} : memref<216x1024xf32, #tpu.memory_space<vmem>>, vector<8x1024xf32>,
    %c7_i32_91 = arith.constant 7 : i32
    %231 = tpu.dynamic_rotate %186 by %c7_i32_91 dim 1 : vector<8x1024xf32>, i32 -> vector<8x1024xf32>
    %232 = vector.broadcast %54 : vector<1x1024xf32> to vector<8x1024xf32>
    %233 = arith.mulf %231, %232 : vector<8x1024xf32>
    %c88_92 = arith.constant 88 : index
    %c0_93 = arith.constant 0 : index
    %234 = vector.load %arg9[%c88_92, %c0_93] : memref<216x1024xf32, #tpu.memory_space<vmem>>, vector<8x1024xf32>
    tpu.vector_store %arg9[%c88_92, %c0_93], %233 {strides = array<i32>} : memref<216x1024xf32, #tpu.memory_space<vmem>>, vector<8x1024xf32>,
    %c1_i32_94 = arith.constant 1 : i32
    %235 = tpu.dynamic_rotate %186 by %c1_i32_94 dim 1 : vector<8x1024xf32>, i32 -> vector<8x1024xf32>
    %236 = vector.broadcast %35 : vector<1x1024xf32> to vector<8x1024xf32>
    %237 = arith.mulf %235, %236 : vector<8x1024xf32>
    %c96_95 = arith.constant 96 : index
    %c0_96 = arith.constant 0 : index
    %238 = vector.load %arg9[%c96_95, %c0_96] : memref<216x1024xf32, #tpu.memory_space<vmem>>, vector<8x1024xf32>
    tpu.vector_store %arg9[%c96_95, %c0_96], %237 {strides = array<i32>} : memref<216x1024xf32, #tpu.memory_space<vmem>>, vector<8x1024xf32>,
    %c104_97 = arith.constant 104 : index
    %c0_98 = arith.constant 0 : index
    %239 = vector.load %arg9[%c104_97, %c0_98] : memref<216x1024xf32, #tpu.memory_space<vmem>>, vector<8x1024xf32>
    tpu.vector_store %arg9[%c104_97, %c0_98], %186 {strides = array<i32>} : memref<216x1024xf32, #tpu.memory_space<vmem>>, vector<8x1024xf32>,
    %c1023_i32_99 = arith.constant 1023 : i32
    %240 = tpu.dynamic_rotate %186 by %c1023_i32_99 dim 1 : vector<8x1024xf32>, i32 -> vector<8x1024xf32>
    %241 = vector.broadcast %40 : vector<1x1024xf32> to vector<8x1024xf32>
    %242 = arith.mulf %240, %241 : vector<8x1024xf32>
    %c112_100 = arith.constant 112 : index
    %c0_101 = arith.constant 0 : index
    %243 = vector.load %arg9[%c112_100, %c0_101] : memref<216x1024xf32, #tpu.memory_space<vmem>>, vector<8x1024xf32>
    tpu.vector_store %arg9[%c112_100, %c0_101], %242 {strides = array<i32>} : memref<216x1024xf32, #tpu.memory_space<vmem>>, vector<8x1024xf32>,
    %c1017_i32_102 = arith.constant 1017 : i32
    %244 = tpu.dynamic_rotate %186 by %c1017_i32_102 dim 1 : vector<8x1024xf32>, i32 -> vector<8x1024xf32>
    %245 = vector.broadcast %55 : vector<1x1024xf32> to vector<8x1024xf32>
    %246 = arith.mulf %244, %245 : vector<8x1024xf32>
    %c120_103 = arith.constant 120 : index
    %c0_104 = arith.constant 0 : index
    %247 = vector.load %arg9[%c120_103, %c0_104] : memref<216x1024xf32, #tpu.memory_space<vmem>>, vector<8x1024xf32>
    tpu.vector_store %arg9[%c120_103, %c0_104], %246 {strides = array<i32>} : memref<216x1024xf32, #tpu.memory_space<vmem>>, vector<8x1024xf32>,
    %c1016_i32_105 = arith.constant 1016 : i32
    %248 = tpu.dynamic_rotate %186 by %c1016_i32_105 dim 1 : vector<8x1024xf32>, i32 -> vector<8x1024xf32>
    %249 = vector.broadcast %30 : vector<1x1024xf32> to vector<8x1024xf32>
    %250 = arith.mulf %248, %249 : vector<8x1024xf32>
    %c128_106 = arith.constant 128 : index
    %c0_107 = arith.constant 0 : index
    %251 = vector.load %arg9[%c128_106, %c0_107] : memref<216x1024xf32, #tpu.memory_space<vmem>>, vector<8x1024xf32>
    tpu.vector_store %arg9[%c128_106, %c0_107], %250 {strides = array<i32>} : memref<216x1024xf32, #tpu.memory_space<vmem>>, vector<8x1024xf32>,
    %c1015_i32_108 = arith.constant 1015 : i32
    %252 = tpu.dynamic_rotate %186 by %c1015_i32_108 dim 1 : vector<8x1024xf32>, i32 -> vector<8x1024xf32>
    %253 = vector.broadcast %56 : vector<1x1024xf32> to vector<8x1024xf32>
    %254 = arith.mulf %252, %253 : vector<8x1024xf32>
    %c136_109 = arith.constant 136 : index
    %c0_110 = arith.constant 0 : index
    %255 = vector.load %arg9[%c136_109, %c0_110] : memref<216x1024xf32, #tpu.memory_space<vmem>>, vector<8x1024xf32>
    tpu.vector_store %arg9[%c136_109, %c0_110], %254 {strides = array<i32>} : memref<216x1024xf32, #tpu.memory_space<vmem>>, vector<8x1024xf32>,
    %c969_i32_111 = arith.constant 969 : i32
    %256 = tpu.dynamic_rotate %186 by %c969_i32_111 dim 1 : vector<8x1024xf32>, i32 -> vector<8x1024xf32>
    %257 = vector.broadcast %58 : vector<1x1024xf32> to vector<8x1024xf32>
    %258 = arith.mulf %256, %257 : vector<8x1024xf32>
    %c144_112 = arith.constant 144 : index
    %c0_113 = arith.constant 0 : index
    %259 = vector.load %arg9[%c144_112, %c0_113] : memref<216x1024xf32, #tpu.memory_space<vmem>>, vector<8x1024xf32>
    tpu.vector_store %arg9[%c144_112, %c0_113], %258 {strides = array<i32>} : memref<216x1024xf32, #tpu.memory_space<vmem>>, vector<8x1024xf32>,
    %c968_i32_114 = arith.constant 968 : i32
    %260 = tpu.dynamic_rotate %186 by %c968_i32_114 dim 1 : vector<8x1024xf32>, i32 -> vector<8x1024xf32>
    %261 = vector.broadcast %59 : vector<1x1024xf32> to vector<8x1024xf32>
    %262 = arith.mulf %260, %261 : vector<8x1024xf32>
    %c152_115 = arith.constant 152 : index
    %c0_116 = arith.constant 0 : index
    %263 = vector.load %arg9[%c152_115, %c0_116] : memref<216x1024xf32, #tpu.memory_space<vmem>>, vector<8x1024xf32>
    tpu.vector_store %arg9[%c152_115, %c0_116], %262 {strides = array<i32>} : memref<216x1024xf32, #tpu.memory_space<vmem>>, vector<8x1024xf32>,
    %c967_i32_117 = arith.constant 967 : i32
    %264 = tpu.dynamic_rotate %186 by %c967_i32_117 dim 1 : vector<8x1024xf32>, i32 -> vector<8x1024xf32>
    %265 = vector.broadcast %61 : vector<1x1024xf32> to vector<8x1024xf32>
    %266 = arith.mulf %264, %265 : vector<8x1024xf32>
    %c160_118 = arith.constant 160 : index
    %c0_119 = arith.constant 0 : index
    %267 = vector.load %arg9[%c160_118, %c0_119] : memref<216x1024xf32, #tpu.memory_space<vmem>>, vector<8x1024xf32>
    tpu.vector_store %arg9[%c160_118, %c0_119], %266 {strides = array<i32>} : memref<216x1024xf32, #tpu.memory_space<vmem>>, vector<8x1024xf32>,
    %c961_i32_120 = arith.constant 961 : i32
    %268 = tpu.dynamic_rotate %186 by %c961_i32_120 dim 1 : vector<8x1024xf32>, i32 -> vector<8x1024xf32>
    %269 = vector.broadcast %62 : vector<1x1024xf32> to vector<8x1024xf32>
    %270 = arith.mulf %268, %269 : vector<8x1024xf32>
    %c168_121 = arith.constant 168 : index
    %c0_122 = arith.constant 0 : index
    %271 = vector.load %arg9[%c168_121, %c0_122] : memref<216x1024xf32, #tpu.memory_space<vmem>>, vector<8x1024xf32>
    tpu.vector_store %arg9[%c168_121, %c0_122], %270 {strides = array<i32>} : memref<216x1024xf32, #tpu.memory_space<vmem>>, vector<8x1024xf32>,
    %c960_i32_123 = arith.constant 960 : i32
    %272 = tpu.dynamic_rotate %186 by %c960_i32_123 dim 1 : vector<8x1024xf32>, i32 -> vector<8x1024xf32>
    %273 = vector.broadcast %20 : vector<1x1024xf32> to vector<8x1024xf32>
    %274 = arith.mulf %272, %273 : vector<8x1024xf32>
    %c176_124 = arith.constant 176 : index
    %c0_125 = arith.constant 0 : index
    %275 = vector.load %arg9[%c176_124, %c0_125] : memref<216x1024xf32, #tpu.memory_space<vmem>>, vector<8x1024xf32>
    tpu.vector_store %arg9[%c176_124, %c0_125], %274 {strides = array<i32>} : memref<216x1024xf32, #tpu.memory_space<vmem>>, vector<8x1024xf32>,
    %c959_i32_126 = arith.constant 959 : i32
    %276 = tpu.dynamic_rotate %186 by %c959_i32_126 dim 1 : vector<8x1024xf32>, i32 -> vector<8x1024xf32>
    %277 = vector.broadcast %63 : vector<1x1024xf32> to vector<8x1024xf32>
    %278 = arith.mulf %276, %277 : vector<8x1024xf32>
    %c184_127 = arith.constant 184 : index
    %c0_128 = arith.constant 0 : index
    %279 = vector.load %arg9[%c184_127, %c0_128] : memref<216x1024xf32, #tpu.memory_space<vmem>>, vector<8x1024xf32>
    tpu.vector_store %arg9[%c184_127, %c0_128], %278 {strides = array<i32>} : memref<216x1024xf32, #tpu.memory_space<vmem>>, vector<8x1024xf32>,
    %c953_i32_129 = arith.constant 953 : i32
    %280 = tpu.dynamic_rotate %186 by %c953_i32_129 dim 1 : vector<8x1024xf32>, i32 -> vector<8x1024xf32>
    %281 = vector.broadcast %65 : vector<1x1024xf32> to vector<8x1024xf32>
    %282 = arith.mulf %280, %281 : vector<8x1024xf32>
    %c192_130 = arith.constant 192 : index
    %c0_131 = arith.constant 0 : index
    %283 = vector.load %arg9[%c192_130, %c0_131] : memref<216x1024xf32, #tpu.memory_space<vmem>>, vector<8x1024xf32>
    tpu.vector_store %arg9[%c192_130, %c0_131], %282 {strides = array<i32>} : memref<216x1024xf32, #tpu.memory_space<vmem>>, vector<8x1024xf32>,
    %c952_i32_132 = arith.constant 952 : i32
    %284 = tpu.dynamic_rotate %186 by %c952_i32_132 dim 1 : vector<8x1024xf32>, i32 -> vector<8x1024xf32>
    %285 = vector.broadcast %66 : vector<1x1024xf32> to vector<8x1024xf32>
    %286 = arith.mulf %284, %285 : vector<8x1024xf32>
    %c200_133 = arith.constant 200 : index
    %c0_134 = arith.constant 0 : index
    %287 = vector.load %arg9[%c200_133, %c0_134] : memref<216x1024xf32, #tpu.memory_space<vmem>>, vector<8x1024xf32>
    tpu.vector_store %arg9[%c200_133, %c0_134], %286 {strides = array<i32>} : memref<216x1024xf32, #tpu.memory_space<vmem>>, vector<8x1024xf32>,
    %c951_i32_135 = arith.constant 951 : i32
    %288 = tpu.dynamic_rotate %186 by %c951_i32_135 dim 1 : vector<8x1024xf32>, i32 -> vector<8x1024xf32>
    %289 = vector.broadcast %68 : vector<1x1024xf32> to vector<8x1024xf32>
    %290 = arith.mulf %288, %289 : vector<8x1024xf32>
    %c208_136 = arith.constant 208 : index
    %c0_137 = arith.constant 0 : index
    %291 = vector.load %arg9[%c208_136, %c0_137] : memref<216x1024xf32, #tpu.memory_space<vmem>>, vector<8x1024xf32>
    tpu.vector_store %arg9[%c208_136, %c0_137], %290 {strides = array<i32>} : memref<216x1024xf32, #tpu.memory_space<vmem>>, vector<8x1024xf32>,
    %c0_138 = arith.constant 0 : index
    %c0_139 = arith.constant 0 : index
    %292 = vector.load %arg3[%c0_138, %c0_139] : memref<8x216xf32, #tpu.memory_space<vmem>>, vector<8x216xf32>
    %c0_140 = arith.constant 0 : index
    %c0_141 = arith.constant 0 : index
    %293 = vector.load %arg9[%c0_140, %c0_141] : memref<216x1024xf32, #tpu.memory_space<vmem>>, vector<216x1024xf32>
    %cst_142 = arith.constant dense<0.000000e+00> : vector<8x1024xf32>
    %294 = tpu.matmul %292, %293, %cst_142 {dimension_numbers = #tpu.dot_dimension_numbers<[1], [0], [0], [1], [0, 0, 1, 1], [], []>} : vector<8x216xf32>, vector<216x1024xf32>, vector<8x1024xf32> -> vector<8x1024xf32>
    %c0_143 = arith.constant 0 : index
    %c0_144 = arith.constant 0 : index
    %295 = vector.load %arg6[%c0_143, %c0_144] : memref<8x1xf32, #tpu.memory_space<vmem>>, vector<8x1xf32>
    %296 = vector.broadcast %295 : vector<8x1xf32> to vector<8x1024xf32>
    %297 = arith.mulf %294, %296 : vector<8x1024xf32>
    %c0_145 = arith.constant 0 : index
    %c0_146 = arith.constant 0 : index
    %298 = vector.load %arg7[%c0_145, %c0_146] : memref<8x1xf32, #tpu.memory_space<vmem>>, vector<8x1xf32>
    %299 = vector.broadcast %298 : vector<8x1xf32> to vector<8x1024xf32>
    %300 = arith.addf %297, %299 : vector<8x1024xf32>
    %301 = arith.addf %300, %70 : vector<8x1024xf32>
    %cst_147 = arith.constant 0.000000e+00 : f32
    %302 = vector.broadcast %cst_147 : f32 to vector<8x1024xf32>
    %303 = arith.maximumf %301, %302 : vector<8x1024xf32>
    %304 = arith.truncf %303 : vector<8x1024xf32> to vector<8x1024xbf16>
    %c0_148 = arith.constant 0 : index
    %c0_149 = arith.constant 0 : index
    %305 = vector.load %arg8[%c0_148, %c0_149] : memref<8x1024xbf16, #tpu.memory_space<vmem>>, vector<8x1024xbf16>
    tpu.vector_store %arg8[%c0_148, %c0_149], %304 {strides = array<i32>} : memref<8x1024xbf16, #tpu.memory_space<vmem>>, vector<8x1024xbf16>,
    return
  }
  func.func @transform_0(%arg0: i32) -> (i32, i32) {
    %c0_i32 = arith.constant 0 : i32
    %c0_i32_0 = arith.constant 0 : i32
    return %c0_i32, %arg0 : i32, i32
  }
  func.func @transform_1(%arg0: i32) -> (i32, i32) {
    %c0_i32 = arith.constant 0 : i32
    %c0_i32_0 = arith.constant 0 : i32
    %c0_i32_1 = arith.constant 0 : i32
    return %c0_i32, %c0_i32_0 : i32, i32
  }
  func.func @transform_2(%arg0: i32) -> (i32, i32) {
    %c0_i32 = arith.constant 0 : i32
    %c0_i32_0 = arith.constant 0 : i32
    %c0_i32_1 = arith.constant 0 : i32
    return %c0_i32, %c0_i32_0 : i32, i32
  }
  func.func @transform_3(%arg0: i32) -> (i32, i32) {
    %c0_i32 = arith.constant 0 : i32
    %c0_i32_0 = arith.constant 0 : i32
    %c0_i32_1 = arith.constant 0 : i32
    return %c0_i32, %c0_i32_0 : i32, i32
  }
  func.func @transform_4(%arg0: i32) -> (i32, i32) {
    %c0_i32 = arith.constant 0 : i32
    %c0_i32_0 = arith.constant 0 : i32
    %c0_i32_1 = arith.constant 0 : i32
    return %c0_i32, %c0_i32_0 : i32, i32
  }
  func.func @transform_5(%arg0: i32) -> (i32, i32) {
    %c0_i32 = arith.constant 0 : i32
    %c0_i32_0 = arith.constant 0 : i32
    %c0_i32_1 = arith.constant 0 : i32
    return %c0_i32, %c0_i32_0 : i32, i32
  }
  func.func @transform_6(%arg0: i32) -> (i32, i32) {
    %c0_i32 = arith.constant 0 : i32
    %c0_i32_0 = arith.constant 0 : i32
    %c0_i32_1 = arith.constant 0 : i32
    return %c0_i32, %c0_i32_0 : i32, i32
  }
  func.func @transform_7(%arg0: i32) -> (i32, i32) {
    %c0_i32 = arith.constant 0 : i32
    %c0_i32_0 = arith.constant 0 : i32
    return %c0_i32, %arg0 : i32, i32
  }
}

</mosaic_0001>

<bundles_post_ra>
// kernel: basic_block_forward.1
= control target key start
LH: loop header
LB: loop body
LE: loop exit
PB: predicated region body
PF: predicated region fallthrough
CT: control target
= control target key end

     0   :  { %s3578_s9 = smov 73   ;;  %s3580_s10 = smov 71   ;;  %v26_v35 = vlaneseq  ;;  %v7984_v51 = vmov 0.0   ;;  %s7969_s0 = inlined_call_operand.vmem [shape: bf16[8,1024], index: 0, kind: input, shape index: {}]   ;;  %s7970_s1 = inlined_call_operand.vmem [shape: f32[8,216], index: 1, kind: input, shape index: {}]   ;;  %s7971_s4 = inlined_call_operand.vmem [shape: f32[8,1], index: 4, kind: input, shape index: {}]   ;;  %s7972_s3 = inlined_call_operand.vmem [shape: f32[8,1], index: 3, kind: input, shape index: {}]   ;;  %s7973_s5 = inlined_call_operand.vmem [shape: f32[8,1], index: 5, kind: input, shape index: {}]   ;;  %s7974_s2 = inlined_call_operand.vmem [shape: f32[8,216], index: 2, kind: input, shape index: {}]   ;;  %s7975_s6 = inlined_call_operand.vmem [shape: f32[8,1], index: 6, kind: input, shape index: {}]   ;;  %s7976_s7 = inlined_call_operand.vmem [shape: bf16[8,1024], index: 7, kind: output, shape index: {}]  }
   0x1   :  { %v333_v0 = vld [vmem:[%s7969_s0 + $0x10] sm:$0xff]  ;;  %v331_v1 = vld [vmem:[%s7969_s0] sm:$0xff]  ;;  %v334_v6 = vld [vmem:[%s7969_s0 + $0x18] sm:$0xff]  ;;  %s3581_s11 = smov 65   ;;  %s3582_s12 = smov 64  }
   0x2   :  { %v3643_v2 = vunpack.c.l.bf16 %v333_v0  ;;  %v3645_v3 = vunpack.c.h.bf16 %v333_v0  ;;  %v3647_v4 = vunpack.c.l.bf16 %v331_v1  ;;  %v3649_v5 = vunpack.c.h.bf16 %v331_v1  ;;  %v332_v7 = vld [vmem:[%s7969_s0 + $0x8] sm:$0xff]  ;;  %s3579_s0 = smov 72   ;;  %s3583_s13 = smov 63  }
   0x3   :  { %v3669_v10 = vunpack.c.l.bf16 %v334_v6  ;;  %v3671_v11 = vunpack.c.h.bf16 %v334_v6  ;;  %v3673_v12 = vunpack.c.l.bf16 %v332_v7  ;;  %v3675_v13 = vunpack.c.h.bf16 %v332_v7  ;;  %s3584_s14 = smov 57   ;;  %s3585_s15 = smov 56  }
   0x4   :  { %8438 = vst [vmem:[#allocation3_spill] sm:$0xff] %v3643_v2  ;;  %v3659_v8 = vpack.i.bf16 %v3645_v3, %v3643_v2  ;;  %v3663_v9 = vpack.i.bf16 %v3649_v5, %v3647_v4  ;;  %s3586_s16 = smov 55   ;;  %s3587_s17 = smov 9   ;;  %v3834_v37 = vand.u32 127, %v26_v35  ;;  %v3564_v0 = vpack.i.bf16 %v3645_v3, %v3647_v4 }
   0x5   :  { %8439 = vst [vmem:[#allocation4_spill] sm:$0xff] %v3645_v3  ;;  %v3681_v14 = vpack.i.bf16 %v3671_v11, %v3669_v10  ;;  %v3685_v15 = vpack.i.bf16 %v3675_v13, %v3673_v12  ;;  %s3588_s18 = smov 8   ;;  %s3589_s19 = smov 7   ;;  %v3514_v31 = vpack.i.bf16 %v3673_v12, %v3649_v5  ;;  %v3519_v36 = vpack.i.bf16 %v3675_v13, %v3647_v4 }
   0x6   :  { %8440 = vst [vmem:[#allocation5_spill] sm:$0xff] %v3647_v4  ;;  %3245 = vrot.lane.b32.xlu1 %v3659_v8, %s3578_s9  ;;  %3235 = vrot.lane.b32.xlu0 %v3663_v9, %s3578_s9  ;;  %s3590_s20 = smov 1   ;;  %s3591_s21 = smov 127   ;;  %v35_v38 = vand.u32 511, %v3834_v37  ;;  %v28_v43 = vadd.s32 128, %v3834_v37  ;;  %v3559_v53 = vpack.i.bf16 %v3643_v2, %v3675_v13  ;;  %vm8316_vm3 = vcmp.lt.s32.totalorder %v3834_v37, 55 }
   0x7   :  { %8441 = vst [vmem:[#allocation6_spill] sm:$0xff] %v3649_v5  ;;  %3255 = vrot.lane.b32.xlu2 %v3663_v9, %s3579_s0  ;;  %s3592_s22 = smov 121   ;;  %s3593_s23 = smov 120   ;;  %vm646_vm10 = vcmp.lt.s32.totalorder %v3834_v37, 56  ;;  %vm605_vm11 = vcmp.lt.s32.totalorder %v3834_v37, 57  ;;  %vm564_vm12 = vcmp.lt.s32.totalorder %v3834_v37, 63 }
   0x8   :  { %8442 = vst [vmem:[#allocation7_spill] sm:$0xff] %v3669_v10  ;;  %v51_v42 = vand.u32 63, %v35_v38  ;;  %v3853_v44 = vshra.s32 %v35_v38, 6  ;;  %v36_v48 = vand.u32 511, %v28_v43  ;;  %s3595_s24 = smov 119   ;;  %v8484_v10 = vmov 0.0  }
   0x9   :  { %8443 = vst [vmem:[#allocation8_spill] sm:$0xff] %v3671_v11  ;;  %vm8249_vm13 = vcmp.lt.s32.totalorder %v3834_v37, 64  ;;  %vm359_vm14 = vcmp.lt.s32.totalorder %v3834_v37, 73  ;;  %vm8233_vm15 = vcmp.lt.s32.totalorder %v3834_v37, 65 }
   0xa   :  { %8444 = vst [vmem:[#allocation9_spill] sm:$0xff] %v3673_v12  ;;  %v59_v45 = vshra.s32 %v51_v42, 3  ;;  %v67_v50 = vand.u32 7, %v51_v42  ;;  %vm91_vm1 = vcmp.le.s32.totalorder %v3853_v44, 6  ;;  %v3869_v54 = vand.u32 63, %v36_v48 }
   0xb   :  { %8445 = vst [vmem:[#allocation10_spill] sm:$0xff] %v3675_v13  ;;  %v3875_v55 = vsel %vm91_vm1, 1.0, %v7984_v51  ;;  %v44_v60 = vshra.s32 %v36_v48, 6  ;;  %v30_v42 = vadd.s32 384, %v3834_v37  ;;  %v31_v48 = vadd.s32 512, %v3834_v37 }
   0xc   :  { %vm123_vm0 = vcmp.le.s32.totalorder %v59_v45, 6  ;;  %vm155_vm2 = vcmp.le.s32.totalorder %v67_v50, 6  ;;  %8464 = vst [vmem:[#allocation29_spill] sm:$0xff] %v3875_v55  ;;  %v7980_v61 = vshra.s32 %v3869_v54, 3  ;;  %vm107_vm4 = vcmp.ge.s32.totalorder %v59_v45, 1 }
   0xd   :  { %v3865_v52 = vsel %vm123_vm0, 1.0, %v7984_v51  ;;  %v3887_v59 = vsel %vm155_vm2, 1.0, %v7984_v51  ;;  %vm76_vm6 = vcmp.ge.s32.totalorder %v44_v60, 1  ;;  %vm139_vm7 = vcmp.ge.s32.totalorder %v67_v50, 1 }
   0xe   :  { %3250 = vrot.lane.b32.xlu1 %v3681_v14, %s3578_s9  ;;  %3240 = vrot.lane.b32.xlu0 %v3685_v15, %s3578_s9  ;;  %8463 = vst [vmem:[#allocation28_spill] sm:$0xff] %v3865_v52  ;;  %v3879_v56 = vmul.f32 %v3865_v52, %v3875_v55  ;;  %vm108_vm5 = vcmp.ge.s32.totalorder %v7980_v61, 1  ;;  %v3924_v35 = vsel %vm76_vm6, 1.0, %v7984_v51  ;;  %v3946_v50 = vsel %vm139_vm7, 1.0, %v7984_v51 }
   0xf   :  { %3260 = vrot.lane.b32.xlu2 %v3685_v15, %s3579_s0  ;;  %8468 = vst [vmem:[#allocation33_spill] sm:$0xff] %v3887_v59  ;;  %vm92_vm9 = vcmp.le.s32.totalorder %v44_v60, 6  ;;  %v39_v61 = vand.u32 511, %v31_v48  ;;  %v4018_v11 = vmul.f32 %v3887_v59, %v3875_v55  ;;  %vm75_vm0 = vcmp.ge.s32.totalorder %v3853_v44, 1 }
  0x10   :  { %8465 = vst [vmem:[#allocation30_spill] sm:$0xff] %v3879_v56  ;;  %v3894_v63 = vmul.f32 %v3879_v56, %v3887_v59  ;;  %v3965_v2 = vsel %vm92_vm9, 1.0, %v8484_v10  ;;  %v3988_v4 = vmul.f32 %v3879_v56, %v3946_v50  ;;  %vm441_vm2 = vcmp.lt.s32.totalorder %v3834_v37, 71 }
  0x11   :  { %8474 = vst [vmem:[#allocation39_spill] sm:$0xff] %v3924_v35  ;;  %v3976_v48 = vshra.s32 %v39_v61, 6 }
  0x12   :  { %8470 = vst [vmem:[#allocation35_spill] sm:$0xff] %v3894_v63 }
  0x13   :  { %8480 = vst [vmem:[#allocation45_spill] sm:$0xff] %v3946_v50  ;;  %vm79_vm6 = vcmp.ge.s32.totalorder %v3976_v48, 1 }
  0x14   :  { %8485 = vst [vmem:[#allocation49_spill] sm:$0xff] %v3965_v2 }
  0x15   :  { %8489 = vst [vmem:[#allocation53_spill] sm:$0xff] %v3988_v4 }
  0x16   :  { %3270 = vrot.lane.b32.xlu1 %v3681_v14, %s3579_s0  ;;  %3265 = vrot.lane.b32.xlu0 %v3659_v8, %s3579_s0  ;;  %8496 = vst [vmem:[#allocation57_spill] sm:$0xff] %v4018_v11 }
  0x17   :  { %3275 = vrot.lane.b32.xlu2 %v3663_v9, %s3580_s10 }
  0x1e   :  { %3285 = vrot.lane.b32.xlu1 %v3659_v8, %s3580_s10  ;;  %3280 = vrot.lane.b32.xlu0 %v3685_v15, %s3580_s10 }
  0x1f   :  { %3290 = vrot.lane.b32.xlu2 %v3681_v14, %s3580_s10 }
  0x26   :  { %3300 = vrot.lane.b32.xlu1 %v3685_v15, %s3581_s11  ;;  %3295 = vrot.lane.b32.xlu0 %v3663_v9, %s3581_s11 }
  0x27   :  { %3305 = vrot.lane.b32.xlu2 %v3659_v8, %s3581_s11 }
  0x2e   :  { %3315 = vrot.lane.b32.xlu1 %v3663_v9, %s3582_s12  ;;  %3310 = vrot.lane.b32.xlu0 %v3681_v14, %s3581_s11 }
  0x2f   :  { %3320 = vrot.lane.b32.xlu2 %v3685_v15, %s3582_s12 }
  0x36   :  { %3330 = vrot.lane.b32.xlu1 %v3681_v14, %s3582_s12  ;;  %3325 = vrot.lane.b32.xlu0 %v3659_v8, %s3582_s12 }
  0x37   :  { %3335 = vrot.lane.b32.xlu2 %v3663_v9, %s3583_s13 }
  0x3e   :  { %3345 = vrot.lane.b32.xlu1 %v3659_v8, %s3583_s13  ;;  %3340 = vrot.lane.b32.xlu0 %v3685_v15, %s3583_s13 }
  0x3f   :  { %3350 = vrot.lane.b32.xlu2 %v3681_v14, %s3583_s13 }
  0x46   :  { %3360 = vrot.lane.b32.xlu1 %v3685_v15, %s3584_s14  ;;  %3355 = vrot.lane.b32.xlu0 %v3663_v9, %s3584_s14 }
  0x47   :  { %3365 = vrot.lane.b32.xlu2 %v3659_v8, %s3584_s14 }
  0x4e   :  { %3375 = vrot.lane.b32.xlu1 %v3663_v9, %s3585_s15  ;;  %3370 = vrot.lane.b32.xlu0 %v3681_v14, %s3584_s14 }
  0x4f   :  { %3380 = vrot.lane.b32.xlu2 %v3685_v15, %s3585_s15 }
  0x56   :  { %3390 = vrot.lane.b32.xlu1 %v3681_v14, %s3585_s15  ;;  %3385 = vrot.lane.b32.xlu0 %v3659_v8, %s3585_s15 }
  0x57   :  { %3395 = vrot.lane.b32.xlu2 %v3663_v9, %s3586_s16 }
  0x5e   :  { %3405 = vrot.lane.b32.xlu1 %v3659_v8, %s3586_s16  ;;  %3400 = vrot.lane.b32.xlu0 %v3685_v15, %s3586_s16 }
  0x5f   :  { %3410 = vrot.lane.b32.xlu2 %v3681_v14, %s3586_s16 }
  0x61   :  { %v3753_v16 = vpop.permute.xlu2 %3255 }
  0x66   :  { %3420 = vrot.lane.b32.xlu1 %v3685_v15, %s3587_s17  ;;  %3415 = vrot.lane.b32.xlu0 %v3663_v9, %s3587_s17 }
  0x67   :  { %3425 = vrot.lane.b32.xlu2 %v3659_v8, %s3587_s17 }
  0x69   :  { %v3761_v17 = vpop.permute.xlu2 %3260 }
  0x6e   :  { %3435 = vrot.lane.b32.xlu1 %v3663_v9, %s3588_s18  ;;  %3430 = vrot.lane.b32.xlu0 %v3681_v14, %s3587_s17 }
  0x6f   :  { %3440 = vrot.lane.b32.xlu2 %v3685_v15, %s3588_s18 }
  0x71   :  { %v3769_v18 = vpop.permute.xlu2 %3275 }
  0x76   :  { %3450 = vrot.lane.b32.xlu1 %v3681_v14, %s3588_s18  ;;  %3445 = vrot.lane.b32.xlu0 %v3659_v8, %s3588_s18 }
  0x77   :  { %3455 = vrot.lane.b32.xlu2 %v3663_v9, %s3589_s19 }
  0x78   :  { %v3777_v19 = vpop.permute.xlu1 %3245  ;;  %v3779_v20 = vpop.permute.xlu0 %3235 }
  0x79   :  { %8446 = vst [vmem:[#allocation11_spill] sm:$0xff] %v3777_v19  ;;  %v3781_v21 = vpop.permute.xlu2 %3290 }
  0x7a   :  { %8447 = vst [vmem:[#allocation12_spill] sm:$0xff] %v3781_v21 }
  0x7e   :  { %3465 = vrot.lane.b32.xlu1 %v3659_v8, %s3589_s19  ;;  %3460 = vrot.lane.b32.xlu0 %v3685_v15, %s3589_s19 }
  0x7f   :  { %3470 = vrot.lane.b32.xlu2 %v3681_v14, %s3589_s19 }
  0x80   :  { %v3789_v22 = vpop.permute.xlu1 %3250  ;;  %v3791_v23 = vpop.permute.xlu0 %3240 }
  0x81   :  { %8448 = vst [vmem:[#allocation13_spill] sm:$0xff] %v3789_v22  ;;  %v3793_v24 = vpop.permute.xlu2 %3305 }
  0x82   :  { %8449 = vst [vmem:[#allocation14_spill] sm:$0xff] %v3793_v24 }
  0x86   :  { %3480 = vrot.lane.b32.xlu1 %v3685_v15, %s3590_s20  ;;  %3475 = vrot.lane.b32.xlu0 %v3663_v9, %s3590_s20 }
  0x87   :  { %3485 = vrot.lane.b32.xlu2 %v3659_v8, %s3590_s20 }
  0x88   :  { %v3801_v25 = vpop.permute.xlu1 %3270  ;;  %v3803_v26 = vpop.permute.xlu0 %3265 }
  0x89   :  { %8450 = vst [vmem:[#allocation15_spill] sm:$0xff] %v3801_v25  ;;  %v3805_v27 = vpop.permute.xlu2 %3320 }
  0x8a   :  { %8451 = vst [vmem:[#allocation16_spill] sm:$0xff] %v3803_v26 }
  0x8e   :  { %3495 = vrot.lane.b32.xlu1 %v3663_v9, %s3591_s21  ;;  %3490 = vrot.lane.b32.xlu0 %v3681_v14, %s3590_s20 }
  0x8f   :  { %3500 = vrot.lane.b32.xlu2 %v3685_v15, %s3591_s21 }
  0x90   :  { %v3813_v28 = vpop.permute.xlu1 %3285  ;;  %v3815_v29 = vpop.permute.xlu0 %3280 }
  0x91   :  { %8452 = vst [vmem:[#allocation17_spill] sm:$0xff] %v3813_v28  ;;  %v3817_v30 = vpop.permute.xlu2 %3335 }
  0x92   :  { %8453 = vst [vmem:[#allocation18_spill] sm:$0xff] %v3817_v30 }
  0x96   :  { %3510 = vrot.lane.b32.xlu1 %v3681_v14, %s3591_s21  ;;  %3505 = vrot.lane.b32.xlu0 %v3659_v8, %s3591_s21 }
  0x97   :  { %3515 = vrot.lane.b32.xlu2 %v3514_v31, %s3592_s22 }
  0x98   :  { %v3826_v32 = vpop.permute.xlu1 %3300  ;;  %v3828_v33 = vpop.permute.xlu0 %3295 }
  0x99   :  { %8454 = vst [vmem:[#allocation19_spill] sm:$0xff] %v3826_v32  ;;  %v3830_v34 = vpop.permute.xlu2 %3350 }
  0x9a   :  { %8455 = vst [vmem:[#allocation20_spill] sm:$0xff] %v3828_v33 }
  0x9b   :  { %8456 = vst [vmem:[#allocation21_spill] sm:$0xff] %v3830_v34 }
  0x9e   :  { %3525 = vrot.lane.b32.xlu1 %v3659_v8, %s3592_s22  ;;  %3520 = vrot.lane.b32.xlu0 %v3519_v36, %s3592_s22 }
  0x9f   :  { %3530 = vrot.lane.b32.xlu2 %v3681_v14, %s3592_s22 }
  0xa0   :  { %v3842_v39 = vpop.permute.xlu1 %3315  ;;  %v3844_v40 = vpop.permute.xlu0 %3310 }
  0xa1   :  { %8457 = vst [vmem:[#allocation22_spill] sm:$0xff] %v3842_v39  ;;  %v3846_v41 = vpop.permute.xlu2 %3365 }
  0xa2   :  { %8458 = vst [vmem:[#allocation23_spill] sm:$0xff] %v3844_v40 }
  0xa3   :  { %8459 = vst [vmem:[#allocation24_spill] sm:$0xff] %v3846_v41  ;;  %v3994_v41 = vand.u32 63, %v39_v61 }
  0xa6   :  { %3540 = vrot.lane.b32.xlu1 %v3685_v15, %s3593_s23  ;;  %3535 = vrot.lane.b32.xlu0 %v3663_v9, %s3593_s23  ;;  %v3918_v15 = vsel %vm107_vm4, 1.0, %v7984_v51  ;;  %vm400_vm4 = vcmp.lt.s32.totalorder %v3834_v37, 72 }
  0xa7   :  { %3545 = vrot.lane.b32.xlu2 %v3659_v8, %s3593_s23  ;;  %v7979_v8 = vand.u32 7, %v3869_v54  ;;  %8472 = vst [vmem:[#allocation37_spill] sm:$0xff] %v3918_v15  ;;  %v3937_v43 = vmul.f32 %v3918_v15, %v3875_v55 }
  0xa8   :  { %v3857_v46 = vpop.permute.xlu1 %3330  ;;  %v3859_v47 = vpop.permute.xlu0 %3325 }
  0xa9   :  { %8460 = vst [vmem:[#allocation25_spill] sm:$0xff] %v3857_v46  ;;  %v3861_v49 = vpop.permute.xlu2 %3380  ;;  %vm140_vm8 = vcmp.ge.s32.totalorder %v7979_v8, 1  ;;  %v4062_v46 = vmul.f32 %v3946_v50, %v3875_v55 }
  0xaa   :  { %8461 = vst [vmem:[#allocation26_spill] sm:$0xff] %v3859_v47  ;;  %v8518_v47 = vand.u32 7, %v3869_v54 }
  0xab   :  { %8462 = vst [vmem:[#allocation27_spill] sm:$0xff] %v3861_v49 }
  0xac   :  { %8478 = vst [vmem:[#allocation43_spill] sm:$0xff] %v3937_v43 }
  0xad   :  { %8507 = vst [vmem:[#allocation64_spill] sm:$0xff] %v4062_v46 }
  0xae   :  { %3555 = vrot.lane.b32.xlu1 %v3514_v31, %s3595_s24  ;;  %3550 = vrot.lane.b32.xlu0 %v3681_v14, %s3593_s23  ;;  %v3921_v31 = vsel %vm108_vm5, 1.0, %v7984_v51  ;;  %vm156_vm5 = vcmp.le.s32.totalorder %v8518_v47, 6 }
  0xaf   :  { %3560 = vrot.lane.b32.xlu2 %v3559_v53, %s3595_s24  ;;  %8473 = vst [vmem:[#allocation38_spill] sm:$0xff] %v3921_v31  ;;  %v3941_v45 = vmul.f32 %v3921_v31, %v3924_v35  ;;  %v34_v53 = vadd.s32 896, %v3834_v37 }
  0xb0   :  { %v3882_v57 = vpop.permute.xlu1 %3345  ;;  %v3884_v58 = vpop.permute.xlu0 %3340 }
  0xb1   :  { %8466 = vst [vmem:[#allocation31_spill] sm:$0xff] %v3882_v57  ;;  %v3890_v62 = vpop.permute.xlu2 %3395 }
  0xb2   :  { %8467 = vst [vmem:[#allocation32_spill] sm:$0xff] %v3884_v58  ;;  %v7978_v1 = vunpack.i.h.bf16 %v3890_v62  ;;  %v7977_v6 = vunpack.i.l.bf16 %v3890_v62 }
  0xb3   :  { %8469 = vst [vmem:[#allocation34_spill] sm:$0xff] %v3890_v62 }
  0xb4   :  { %v3907_v7 = vsel %vm8316_vm3, %v7977_v6, %v7978_v1  ;;  %8479 = vst [vmem:[#allocation44_spill] sm:$0xff] %v3941_v45  ;;  %v38_v6 = vand.u32 511, %v30_v42  ;;  %v3956_v1 = vmul.f32 %v3937_v43, %v3946_v50 }
  0xb5   :  { %8471 = vst [vmem:[#allocation36_spill] sm:$0xff] %v3907_v7  ;;  %v1176_v9 = vmul.f32 %v3907_v7, %v3894_v63  ;;  %v42_v63 = vand.u32 511, %v34_v53 }
  0xb6   :  { %3570 = vrot.lane.b32.xlu1 %v3681_v14, %s3595_s24  ;;  %3565 = vrot.lane.b32.xlu0 %v3564_v0, %s3595_s24  ;;  %v3949_v0 = vsel %vm140_vm8, 1.0, %v7984_v51  ;;  %8482 = vst [vmem:[#allocation47_spill] sm:$0xff] %v3956_v1  ;;  %v3974_v13 = vshra.s32 %v38_v6, 6  ;;  %v3983_v60 = vand.u32 63, %v38_v6 }
  0xb7   :  { %1439 = vmatpush.msra.mxu1 %v1176_v9  ;;  %8481 = vst [vmem:[#allocation46_spill] sm:$0xff] %v3949_v0  ;;  %v3952_v9 = vadd.s32 256, %v3834_v37  ;;  %v3960_v8 = vmul.f32 %v3941_v45, %v3949_v0  ;;  %v4039_v5 = vand.u32 63, %v42_v63 }
  0xb8   :  { %v3926_v36 = vpop.permute.xlu1 %3360  ;;  %v3928_v38 = vpop.permute.xlu0 %3355  ;;  %vm94_vm7 = vcmp.le.s32.totalorder %v3974_v13, 6 }
  0xb9   :  { %8475 = vst [vmem:[#allocation40_spill] sm:$0xff] %v3926_v36  ;;  %v3932_v14 = vpop.permute.xlu2 %3410  ;;  %v8494_v7 = vunpack.i.l.bf16 %v3928_v38 }
  0xba   :  { %8476 = vst [vmem:[#allocation41_spill] sm:$0xff] %v3928_v38 }
  0xbb   :  { %8477 = vst [vmem:[#allocation42_spill] sm:$0xff] %v3932_v14  ;;  %v3992_v14 = vmul.f32 %v3921_v31, %v3965_v2  ;;  %v8508_v31 = vshra.s32 %v3869_v54, 3 }
  0xbc   :  { %8483 = vst [vmem:[#allocation48_spill] sm:$0xff] %v3960_v8 }
  0xbd   :  { %8490 = vst [vmem:[#allocation54_spill] sm:$0xff] %v3992_v14  ;;  %vm124_vm1 = vcmp.le.s32.totalorder %v8508_v31, 6 }
  0xbe   :  { %8501 = vst [vmem:[#allocation60_spill] sm:$0xff] %v4039_v5 }
  0xc0   :  { %v3968_v42 = vpop.permute.xlu1 %3375  ;;  %v3970_v3 = vpop.permute.xlu0 %3370 }
  0xc1   :  { %8486 = vst [vmem:[#allocation50_spill] sm:$0xff] %v3968_v42  ;;  %v8003_v51 = vunpack.i.h.bf16 %v3968_v42  ;;  %v3981_v12 = vpop.permute.xlu2 %3425  ;;  %v8491_v6 = vunpack.i.l.bf16 %v3968_v42  ;;  %v8546_v28 = vunpack.i.h.bf16 %v3968_v42 }
  0xc2   :  { %8487 = vst [vmem:[#allocation51_spill] sm:$0xff] %v3970_v3 }
  0xc3   :  { %8488 = vst [vmem:[#allocation52_spill] sm:$0xff] %v3981_v12  ;;  %v4004_v3 = vsel %vm646_vm10, %v8491_v6, %v8003_v51  ;;  %v8493_v12 = vunpack.i.h.bf16 %v3928_v38 }
  0xc4   :  { %8492 = vst [vmem:[#allocation55_spill] sm:$0xff] %v4004_v3  ;;  %v1160_v53 = vmul.f32 %v4004_v3, %v3879_v56  ;;  %v4033_v3 = vshra.s32 %v42_v63, 6 }
  0xc5   :  { %v4012_v61 = vsel %vm605_vm11, %v8494_v7, %v8493_v12  ;;  %v8497_v12 = vunpack.i.h.bf16 %v3817_v30  ;;  %v8498_v7 = vunpack.i.l.bf16 %v3817_v30 }
  0xc6   :  { %8495 = vst [vmem:[#allocation56_spill] sm:$0xff] %v4012_v61  ;;  %1440 = vmatpush.msra.mxu1 %v1160_v53  ;;  %v1144_v57 = vmul.f32 %v4012_v61, %v3988_v4  ;;  %v8510_v4 = vunpack.i.l.bf16 %v3828_v33  ;;  %vm98_vm8 = vcmp.le.s32.totalorder %v4033_v3, 6 }
  0xc7   :  { %v4031_v56 = vsel %vm564_vm12, %v8498_v7, %v8497_v12  ;;  %8500 = vst [vmem:[#allocation59_spill] sm:$0xff] %v4033_v3  ;;  %v8502_v12 = vunpack.i.h.bf16 %v3842_v39  ;;  %v8503_v7 = vunpack.i.l.bf16 %v3842_v39 }
  0xc8   :  { %8499 = vst [vmem:[#allocation58_spill] sm:$0xff] %v4031_v56  ;;  %v4054_v63 = vpop.permute.xlu1 %3390  ;;  %v4056_v61 = vpop.permute.xlu0 %3385  ;;  %1441 = vmatpush.msra.mxu1 %v1144_v57  ;;  %v1128_v51 = vmul.f32 %v4031_v56, %v4018_v11  ;;  %v4079_v11 = vmul.f32 %v3992_v14, %v3949_v0  ;;  %v4180_v56 = vsel %vm98_vm8, 1.0, %v8484_v10 }
  0xc9   :  { %v4050_v53 = vsel %vm8249_vm13, %v8503_v7, %v8502_v12  ;;  %8505 = vst [vmem:[#allocation62_spill] sm:$0xff] %v4054_v63  ;;  %v8509_v7 = vunpack.i.h.bf16 %v3828_v33  ;;  %v4075_v57 = vpop.permute.xlu2 %3440  ;;  %v4086_v12 = vmul.f32 %v3937_v43, %v3887_v59  ;;  %v8516_v63 = vunpack.i.l.bf16 %v3769_v18 }
  0xca   :  { %8504 = vst [vmem:[#allocation61_spill] sm:$0xff] %v4050_v53  ;;  %1442 = vmatpush.msra.mxu1 %v1128_v51  ;;  %v1112_v31 = vmul.f32 %v4050_v53, %v3875_v55  ;;  %v4101_v55 = vsel %vm124_vm1, 1.0, %v8484_v10  ;;  %v8520_v53 = vunpack.i.l.bf16 %v3753_v16 }
  0xcb   :  { %8506 = vst [vmem:[#allocation63_spill] sm:$0xff] %v4056_v61  ;;  %v4073_v6 = vsel %vm8233_vm15, %v8510_v4, %v8509_v7  ;;  %v8519_v4 = vunpack.i.h.bf16 %v3753_v16  ;;  %v4122_v54 = vmul.f32 %v4101_v55, %v3965_v2  ;;  %v8522_v7 = vand.u32 7, %v3983_v60 }
  0xcc   :  { %8511 = vst [vmem:[#allocation65_spill] sm:$0xff] %v4073_v6  ;;  %1443 = vmatpush.msra.mxu1 %v1112_v31  ;;  %v1096_v61 = vmul.f32 %v4073_v6, %v4062_v46  ;;  %v8528_v46 = vand.u32 7, %v3994_v41 }
  0xcd   :  { %8512 = vst [vmem:[#allocation66_spill] sm:$0xff] %v4075_v57  ;;  %v8515_v57 = vunpack.i.h.bf16 %v3769_v18  ;;  %vm4127_vm9 = vcmp.ge.s32.totalorder %v8522_v7, 1 }
  0xce   :  { %8513 = vst [vmem:[#allocation67_spill] sm:$0xff] %v4079_v11  ;;  %1444 = vmatpush.msra.mxu1 %v1096_v61  ;;  %v8526_v61 = vunpack.i.l.bf16 %v3779_v20  ;;  %vm4145_vm1 = vcmp.ge.s32.totalorder %v8528_v46, 1  ;;  %v4166_v46 = vsel %vm94_vm7, 1.0, %v8484_v10 }
  0xcf   :  { %8514 = vst [vmem:[#allocation68_spill] sm:$0xff] %v4086_v12  ;;  %v4098_v51 = vsel %vm441_vm2, %v8516_v63, %v8515_v57  ;;  %v407_v63 = vsel %vm400_vm4, %v8520_v53, %v8519_v4  ;;  %v8525_v57 = vunpack.i.h.bf16 %v3779_v20  ;;  %v4192_v44 = vsel %vm4145_vm1, 1.0, %v8484_v10 }
  0xd0   :  { %8517 = vst [vmem:[#allocation69_spill] sm:$0xff] %v4101_v55  ;;  %v1080_v47 = vmul.f32 %v4098_v51, %v4086_v12  ;;  %v4141_v12 = vsel %vm156_vm5, 1.0, %v8484_v10  ;;  %v4149_v40 = vpop.permute.xlu1 %3405  ;;  %v4151_v4 = vpop.permute.xlu0 %3400  ;;  %v1064_v52 = vmul.f32 %v407_v63, %v3937_v43  ;;  %v4175_v43 = vsel %vm75_vm0, 1.0, %v8484_v10 }
  0xd1   :  { %8521 = vst [vmem:[#allocation70_spill] sm:$0xff] %v4122_v54  ;;  %v4138_v31 = vsel %vm359_vm14, %v8526_v61, %v8525_v57  ;;  %v4156_v57 = vmul.f32 %v4122_v54, %v4141_v12  ;;  %v4161_v61 = vsel %vm79_vm6, 1.0, %v8484_v10  ;;  %v4170_v6 = vpop.permute.xlu2 %3455  ;;  %v8545_v53 = vunpack.i.l.bf16 %v3861_v49 }
  0xd2   :  { %8527 = vst [vmem:[#allocation71_spill] sm:$0xff] %v4141_v12  ;;  %1445 = vmatpush.msra.mxu1 %v1080_v47  ;;  %v1048_v34 = vmul.f32 %v4138_v31, %v3956_v1  ;;  %v8541_v47 = vand.u32 7, %v4039_v5 }
  0xd3   :  { %8531 = vst [vmem:[#allocation72_spill] sm:$0xff] %v4149_v40  ;;  %v4187_v40 = vsel %vm4127_vm9, 1.0, %v8484_v10  ;;  %v4211_v7 = vsel %vm646_vm10, %v8546_v28, %v8545_v53  ;;  %v8553_v53 = vunpack.i.l.bf16 %v3926_v36  ;;  %v8580_v28 = vunpack.i.h.bf16 %v3828_v33 }
  0xd4   :  { %8532 = vst [vmem:[#allocation73_spill] sm:$0xff] %v4151_v4  ;;  %1446 = vmatpush.msra.mxu1 %v1064_v52  ;;  %vm146_vm0 = vcmp.ge.s32.totalorder %v8541_v47, 1  ;;  %v8542_v52 = vunpack.i.l.bf16 %v4151_v4  ;;  %v8548_v47 = vand.u32 511, %v3952_v9  ;;  %v1161_v9 = vmul.f32 %v4211_v7, %v4122_v54 }
  0xd5   :  { %8533 = vst [vmem:[#allocation74_spill] sm:$0xff] %v4156_v57 }
  0xd6   :  { %8534 = vst [vmem:[#allocation75_spill] sm:$0xff] %v4161_v61  ;;  %v4215_v55 = vshra.s32 %v8548_v47, 6  ;;  %1447 = vmatpush.msra.mxu1 %v1048_v34  ;;  %v8551_v42 = vmov %v8548_v47  ;;  %v8554_v34 = vunpack.i.h.bf16 %v3928_v38 }
  0xd7   :  { %8535 = vst [vmem:[#allocation76_spill] sm:$0xff] %v4166_v46 }
  0xd8   :  { %8536 = vst [vmem:[#allocation77_spill] sm:$0xff] %v4170_v6  ;;  %v8543_v6 = vunpack.i.h.bf16 %v3890_v62  ;;  %v4228_v62 = vand.u32 63, %v8551_v42  ;;  %v4237_v47 = vsel %vm605_vm11, %v8554_v34, %v8553_v53  ;;  %v4252_v42 = vmul.f32 %v4141_v12, %v3965_v2  ;;  %v4275_v36 = vpop.permute.xlu1 %3420  ;;  %v4277_v4 = vpop.permute.xlu0 %3415 }
  0xd9   :  { %8537 = vst [vmem:[#allocation78_spill] sm:$0xff] %v4175_v43  ;;  %v8561_v34 = vshra.s32 %v3983_v60, 3  ;;  %vm93_vm7 = vcmp.le.s32.totalorder %v4215_v55, 6 }
  0xda   :  { %8538 = vst [vmem:[#allocation79_spill] sm:$0xff] %v4180_v56  ;;  %v4203_v1 = vsel %vm8316_vm3, %v8543_v6, %v8542_v52  ;;  %v4221_v6 = vmul.f32 %v4122_v54, %v3949_v0  ;;  %v4224_v52 = vmul.f32 %v407_v63, %v3941_v45  ;;  %v8557_v63 = vshra.s32 %v3994_v41, 3 }
  0xdb   :  { %8539 = vst [vmem:[#allocation80_spill] sm:$0xff] %v4187_v40  ;;  %v1177_v3 = vmul.f32 %v4203_v1, %v4156_v57  ;;  %v4240_v57 = vsel %vm146_vm0, 1.0, %v8484_v10  ;;  %v69_v53 = vand.u32 7, %v4228_v62  ;;  %vm4257_vm6 = vcmp.ge.s32.totalorder %v8561_v34, 1 }
  0xdc   :  { %8540 = vst [vmem:[#allocation81_spill] sm:$0xff] %v4192_v44  ;;  %vm4244_vm5 = vcmp.ge.s32.totalorder %v8557_v63, 1  ;;  %v8565_v54 = vunpack.i.h.bf16 %v3817_v30  ;;  %v1145_v63 = vmul.f32 %v4237_v47, %v4221_v6  ;;  %v8571_v34 = vunpack.i.h.bf16 %v3842_v39 }
  0xdd   :  { %8544 = vst [vmem:[#allocation82_spill] sm:$0xff] %v4203_v1  ;;  %1479 = vmatpush.msra.mxu3 %v1177_v3  ;;  %v8564_v3 = vunpack.i.l.bf16 %v3884_v58  ;;  %v8570_v58 = vunpack.i.l.bf16 %v3805_v27  ;;  %v4302_v1 = vsel %vm4257_vm6, 1.0, %v8484_v10  ;;  %vm4310_vm8 = vcmp.ge.s32.totalorder %v69_v53, 1 }
  0xde   :  { %8547 = vst [vmem:[#allocation83_spill] sm:$0xff] %v4211_v7  ;;  %v8607_v30 = vand.u32 7, %v4039_v5 }
  0xdf   :  { %8549 = vst [vmem:[#allocation84_spill] sm:$0xff] %v4221_v6  ;;  %v4269_v7 = vsel %vm564_vm12, %v8565_v54, %v8564_v3  ;;  %1480 = vmatpush.msra.mxu3 %v1161_v9  ;;  %v4285_v54 = vsel %vm4244_vm5, 1.0, %v8484_v10  ;;  %v4296_v9 = vpop.permute.xlu2 %3470  ;;  %v4308_v3 = vmul.f32 %v3949_v0, %v3965_v2  ;;  %v8579_v6 = vunpack.i.l.bf16 %v3826_v32 }
  0xe0   :  { %8550 = vst [vmem:[#allocation85_spill] sm:$0xff] %v4224_v52  ;;  %v4272_v52 = vadd.s32 640, %v3834_v37  ;;  %v1129_v38 = vmul.f32 %v4269_v7, %v4252_v42  ;;  %v4403_v33 = vpop.permute.xlu0 %3430  ;;  %vm162_vm6 = vcmp.le.s32.totalorder %v8607_v30, 6 }
  0xe1   :  { %8552 = vst [vmem:[#allocation86_spill] sm:$0xff] %v4228_v62  ;;  %1481 = vmatpush.msra.mxu3 %v1145_v63  ;;  %v4322_v63 = vsel %vm8233_vm15, %v8580_v28, %v8579_v6  ;;  %v4341_v6 = vmul.f32 %v3992_v14, %v4141_v12  ;;  %v4345_v28 = vmul.f32 %v4302_v1, %v4166_v46 }
  0xe2   :  { %8555 = vst [vmem:[#allocation87_spill] sm:$0xff] %v4237_v47  ;;  %v8583_v47 = vunpack.i.h.bf16 %v3753_v16 }
  0xe3   :  { %8556 = vst [vmem:[#allocation88_spill] sm:$0xff] %v4240_v57  ;;  %1482 = vmatpush.msra.mxu3 %v1129_v38  ;;  %v8589_v38 = vunpack.i.h.bf16 %v3769_v18  ;;  %v4430_v30 = vmul.f32 %v4345_v28, %v4187_v40 }
  0xe4   :  { %8560 = vst [vmem:[#allocation89_spill] sm:$0xff] %v4252_v42  ;;  %v8582_v42 = vunpack.i.l.bf16 %v3761_v17 }
  0xe5   :  { %8566 = vst [vmem:[#allocation90_spill] sm:$0xff] %v4269_v7 }
  0xe6   :  { %8567 = vst [vmem:[#allocation91_spill] sm:$0xff] %v4275_v36  ;;  %v4294_v36 = vsel %vm8249_vm13, %v8571_v34, %v8570_v58  ;;  %v8578_v34 = vshra.s32 %v4039_v5, 3  ;;  %v4330_v7 = vsel %vm400_vm4, %v8583_v47, %v8582_v42  ;;  %v4349_v47 = vmul.f32 %v3918_v15, %v4175_v43  ;;  %v4401_v58 = vpop.permute.xlu1 %3435 }
  0xe7   :  { %8568 = vst [vmem:[#allocation92_spill] sm:$0xff] %v4277_v4  ;;  %v1113_v39 = vmul.f32 %v4294_v36, %v3965_v2  ;;  %v1097_v42 = vmul.f32 %v4322_v63, %v4308_v3  ;;  %v1065_v15 = vmul.f32 %v4330_v7, %v3992_v14 }
  0xe8   :  { %8569 = vst [vmem:[#allocation93_spill] sm:$0xff] %v4285_v54  ;;  %vm114_vm9 = vcmp.ge.s32.totalorder %v8578_v34, 1  ;;  %v40_v34 = vand.u32 511, %v4272_v52  ;;  %v8588_v52 = vunpack.i.l.bf16 %v3815_v29  ;;  %v4434_v49 = vmul.f32 %v4349_v47, %v3946_v50 }
  0xe9   :  { %8572 = vst [vmem:[#allocation94_spill] sm:$0xff] %v4294_v36  ;;  %v8592_v36 = vshra.s32 %v4228_v62, 3  ;;  %1483 = vmatpush.msra.mxu3 %v1113_v39 }
  0xea   :  { %8573 = vst [vmem:[#allocation95_spill] sm:$0xff] %v4296_v9  ;;  %v4334_v9 = vmul.f32 %v4285_v54, %v4161_v61  ;;  %v4358_v2 = vsel %vm441_vm2, %v8589_v38, %v8588_v52  ;;  %v4361_v54 = vsel %vm114_vm9, 1.0, %v8484_v10  ;;  %v4376_v52 = vsel %vm93_vm7, 1.0, %v8484_v10 }
  0xeb   :  { %8574 = vst [vmem:[#allocation96_spill] sm:$0xff] %v4302_v1  ;;  %vm4365_vm1 = vcmp.ge.s32.totalorder %v8592_v36, 1  ;;  %v4381_v38 = vsel %vm4310_vm8, 1.0, %v8484_v10  ;;  %v8597_v36 = vand.u32 7, %v3983_v60  ;;  %v4399_v4 = vand.u32 63, %v40_v34  ;;  %1484 = vmatpush.msra.mxu3 %v1097_v42 }
  0xec   :  { %8575 = vst [vmem:[#allocation97_spill] sm:$0xff] %v4308_v3  ;;  %v8600_v3 = vand.u32 7, %v3994_v41  ;;  %v4416_v62 = vsel %vm4365_vm1, 1.0, %v8484_v10  ;;  %vm157_vm7 = vcmp.le.s32.totalorder %v69_v53, 6  ;;  %vm77_vm8 = vcmp.ge.s32.totalorder %v4215_v55, 1 }
  0xed   :  { %8581 = vst [vmem:[#allocation98_spill] sm:$0xff] %v4322_v63  ;;  %vm4385_vm0 = vcmp.le.s32.totalorder %v8597_v36, 6  ;;  %v4397_v63 = vmul.f32 %v4334_v9, %v4192_v44  ;;  %v1081_v36 = vmul.f32 %v4358_v2, %v4341_v6  ;;  %v4461_v53 = vmul.f32 %v3941_v45, %v4141_v12 }
  0xee   :  { %8584 = vst [vmem:[#allocation99_spill] sm:$0xff] %v4334_v9  ;;  %vm4391_vm5 = vcmp.le.s32.totalorder %v8600_v3, 6  ;;  %v4411_v3 = vmul.f32 %v4361_v54, %v4180_v56  ;;  %v4464_v55 = vsel %vm157_vm7, 1.0, %v8484_v10  ;;  %v4479_v39 = vsel %vm77_vm8, 1.0, %v8484_v10  ;;  %v4505_v5 = vpop.permute.xlu1 %3450 }
  0xef   :  { %8585 = vst [vmem:[#allocation100_spill] sm:$0xff] %v4341_v6  ;;  %v4426_v6 = vpop.permute.xlu2 %3485  ;;  %1485 = vmatpush.msra.mxu3 %v1081_v36  ;;  %v4454_v36 = vmul.f32 %v4416_v62, %v4376_v52  ;;  %vm78_vm9 = vcmp.ge.s32.totalorder %v3974_v13, 1  ;;  %v8627_v32 = vand.u32 7, %v4399_v4  ;;  %v8629_v13 = vunpack.i.l.bf16 %v3769_v18 }
  0xf0   :  { %8586 = vst [vmem:[#allocation101_spill] sm:$0xff] %v4345_v28  ;;  %v8631_v12 = vshra.s32 %v4399_v4, 3  ;;  %vm941_vm7 = vcmp.lt.s32.totalorder %v3834_v37, 121 }
  0xf1   :  { %8587 = vst [vmem:[#allocation102_spill] sm:$0xff] %v4349_v47  ;;  %1486 = vmatpush.msra.mxu3 %v1065_v15  ;;  %vm144_vm1 = vcmp.ge.s32.totalorder %v8627_v32, 1  ;;  %v4507_v32 = vpop.permute.xlu0 %3445  ;;  %v4515_v18 = vmul.f32 %v4454_v36, %v4464_v55 }
  0xf2   :  { %8590 = vst [vmem:[#allocation103_spill] sm:$0xff] %v4358_v2 }
  0xf3   :  { %8591 = vst [vmem:[#allocation104_spill] sm:$0xff] %v4361_v54  ;;  %v4439_v54 = vsel %vm4385_vm0, 1.0, %v8484_v10  ;;  %vm112_vm0 = vcmp.ge.s32.totalorder %v8631_v12, 1  ;;  %v4524_v12 = vmul.f32 %v3949_v0, %v3924_v35 }
  0xf4   :  { %8595 = vst [vmem:[#allocation105_spill] sm:$0xff] %v4376_v52  ;;  %v4476_v15 = vmul.f32 %v4345_v28, %v4439_v54 }
  0xf5   :  { %8596 = vst [vmem:[#allocation106_spill] sm:$0xff] %v4381_v38 }
  0xf6   :  { %8603 = vst [vmem:[#allocation107_spill] sm:$0xff] %v4397_v63 }
  0xf7   :  { %8604 = vst [vmem:[#allocation108_spill] sm:$0xff] %v4399_v4 }
  0xf8   :  { %8605 = vst [vmem:[#allocation109_spill] sm:$0xff] %v4401_v58  ;;  %v8610_v58 = vunpack.i.l.bf16 %v3791_v23 }
  0xf9   :  { %8606 = vst [vmem:[#allocation110_spill] sm:$0xff] %v4403_v33  ;;  %v8611_v33 = vunpack.i.h.bf16 %v3779_v20 }
  0xfa   :  { %8608 = vst [vmem:[#allocation111_spill] sm:$0xff] %v4411_v3 }
  0xfb   :  { %8609 = vst [vmem:[#allocation112_spill] sm:$0xff] %v4416_v62  ;;  %v4424_v42 = vsel %vm359_vm14, %v8611_v33, %v8610_v58  ;;  %v4444_v33 = vsel %vm4391_vm5, 1.0, %v8484_v10  ;;  %v4468_v58 = vmul.f32 %v4411_v3, %v4240_v57 }
  0xfc   :  { %8612 = vst [vmem:[#allocation113_spill] sm:$0xff] %v4426_v6  ;;  %v4450_v6 = vsel %vm162_vm6, 1.0, %v8484_v10  ;;  %v1049_v14 = vmul.f32 %v4424_v42, %v4079_v11  ;;  %v4472_v2 = vmul.f32 %v4334_v9, %v4444_v33  ;;  %v4484_v11 = vmul.f32 %v4349_v47, %v3887_v59 }
  0xfd   :  { %8613 = vst [vmem:[#allocation114_spill] sm:$0xff] %v4430_v30  ;;  %v4488_v45 = vmul.f32 %v4411_v3, %v4450_v6  ;;  %vm95_vm6 = vcmp.le.s32.totalorder %v3976_v48, 6 }
  0xfe   :  { %8614 = vst [vmem:[#allocation115_spill] sm:$0xff] %v4434_v49  ;;  %1487 = vmatpush.msra.mxu3 %v1049_v14  ;;  %v8630_v14 = vunpack.i.h.bf16 %v3781_v21 }
  0xff   :  { %8615 = vst [vmem:[#allocation116_spill] sm:$0xff] %v4439_v54 }
 0x100   :  { %8616 = vst [vmem:[#allocation117_spill] sm:$0xff] %v4444_v33  ;;  %v3243_v33 = vunpack.i.h.bf16 %v3791_v23  ;;  %v449_v59 = vsel %vm441_vm2, %v8630_v14, %v8629_v13  ;;  %v4520_v13 = vpop.permute.xlu2 %3500  ;;  %v4528_v14 = vmul.f32 %v4138_v31, %v3960_v8  ;;  %v8645_v31 = vunpack.i.l.bf16 %v3777_v19 }
 0x101   :  { %8617 = vst [vmem:[#allocation118_spill] sm:$0xff] %v4450_v6  ;;  %v4535_v6 = vmul.f32 %v4454_v36, %v4381_v38  ;;  %v4541_v21 = vmul.f32 %v449_v59, %v4488_v45  ;;  %v8650_v19 = vunpack.i.h.bf16 %v3789_v22 }
 0x102   :  { %8618 = vst [vmem:[#allocation119_spill] sm:$0xff] %v4454_v36  ;;  %v363_v8 = vsel %vm359_vm14, %v3243_v33, %v8645_v31  ;;  %v8649_v31 = vunpack.i.l.bf16 %v3779_v20  ;;  %v8655_v20 = vunpack.i.l.bf16 %v3761_v17 }
 0x103   :  { %8619 = vst [vmem:[#allocation120_spill] sm:$0xff] %v4461_v53 }
 0x104   :  { %8620 = vst [vmem:[#allocation121_spill] sm:$0xff] %v4464_v55 }
 0x105   :  { %8621 = vst [vmem:[#allocation122_spill] sm:$0xff] %v4468_v58 }
 0x106   :  { %8622 = vst [vmem:[#allocation123_spill] sm:$0xff] %v4472_v2  ;;  %v4492_v2 = vshra.s32 %v40_v34, 6  ;;  %v4511_v34 = vmul.f32 %v4098_v51, %v4461_v53  ;;  %v4531_v51 = vsel %vm144_vm1, 1.0, %v8484_v10  ;;  %v4538_v53 = vmul.f32 %v449_v59, %v4484_v11 }
 0x107   :  { %8623 = vst [vmem:[#allocation124_spill] sm:$0xff] %v4476_v15  ;;  %v4518_v15 = vsel %vm78_vm9, 1.0, %v8484_v10 }
 0x108   :  { %8624 = vst [vmem:[#allocation125_spill] sm:$0xff] %v4479_v39  ;;  %vm80_vm5 = vcmp.ge.s32.totalorder %v4492_v2, 1  ;;  %v4558_v59 = vmul.f32 %v4302_v1, %v4518_v15  ;;  %v8654_v1 = vunpack.i.h.bf16 %v3761_v17 }
 0x109   :  { %8625 = vst [vmem:[#allocation126_spill] sm:$0xff] %v4484_v11  ;;  %v4582_v11 = vmul.f32 %v4240_v57, %v4180_v56 }
 0x10a   :  { %8626 = vst [vmem:[#allocation127_spill] sm:$0xff] %v4488_v45  ;;  %v4578_v45 = vmul.f32 %v3946_v50, %v4175_v43  ;;  %v405_v22 = vsel %vm400_vm4, %v8655_v20, %v8654_v1 }
 0x10b   :  { %8628 = vst [vmem:[#allocation128_spill] sm:$0xff] %v4492_v2 }
 0x10c   :  { %8632 = vst [vmem:[#allocation129_spill] sm:$0xff] %v4505_v5  ;;  %v8658_v5 = vunpack.i.l.bf16 %v3791_v23  ;;  %v4617_v23 = vmul.f32 %v405_v22, %v4454_v36  ;;  %v8677_v36 = vunpack.i.h.bf16 %v3801_v25 }
 0x10d   :  { %8633 = vst [vmem:[#allocation130_spill] sm:$0xff] %v4507_v32  ;;  %v4544_v32 = vsel %vm112_vm0, 1.0, %v8484_v10 }
 0x10e   :  { %8634 = vst [vmem:[#allocation131_spill] sm:$0xff] %v4511_v34  ;;  %v4595_v34 = vmul.f32 %v363_v8, %v4430_v30 }
 0x10f   :  { %8635 = vst [vmem:[#allocation132_spill] sm:$0xff] %v4515_v18  ;;  %v4604_v18 = vmul.f32 %v4381_v38, %v4376_v52 }
 0x110   :  { %8636 = vst [vmem:[#allocation133_spill] sm:$0xff] %v4518_v15  ;;  %v4633_v15 = vpop.permute.xlu2 %3515 }
 0x111   :  { %8637 = vst [vmem:[#allocation134_spill] sm:$0xff] %v4520_v13 }
 0x112   :  { %8638 = vst [vmem:[#allocation135_spill] sm:$0xff] %v4524_v12 }
 0x113   :  { %8639 = vst [vmem:[#allocation136_spill] sm:$0xff] %v4528_v14  ;;  %v4554_v14 = vmul.f32 %v4416_v62, %v4479_v39  ;;  %v4574_v62 = vmul.f32 %v4187_v40, %v4166_v46 }
 0x114   :  { %8640 = vst [vmem:[#allocation137_spill] sm:$0xff] %v4531_v51  ;;  %v364_v51 = vsel %vm359_vm14, %v8658_v5, %v3243_v33  ;;  %v4622_v5 = vsel %vm80_vm5, 1.0, %v8484_v10  ;;  %v4627_v33 = vsel %vm95_vm6, 1.0, %v8484_v10  ;;  %vm900_vm6 = vcmp.lt.s32.totalorder %v3834_v37, 127 }
 0x115   :  { %8641 = vst [vmem:[#allocation138_spill] sm:$0xff] %v4535_v6  ;;  %v4641_v30 = vmul.f32 %v364_v51, %v4535_v6  ;;  %v4645_v48 = vmul.f32 %v4554_v14, %v4381_v38  ;;  %v8675_v6 = vld [vmem:[#allocation17_spill] sm:$0xff] }
 0x116   :  { %8642 = vst [vmem:[#allocation139_spill] sm:$0xff] %v4538_v53  ;;  %v367_v53 = vsel %vm359_vm14, %v8650_v19, %v8649_v31  ;;  %v4592_v31 = vmul.f32 %v363_v8, %v4397_v63  ;;  %v4612_v19 = vpop.permute.xlu1 %3465  ;;  %v4614_v8 = vpop.permute.xlu0 %3460 }
 0x117   :  { %8643 = vst [vmem:[#allocation140_spill] sm:$0xff] %v4541_v21  ;;  %v4564_v21 = vmul.f32 %v4192_v44, %v4161_v61  ;;  %v4607_v1 = vmul.f32 %v367_v53, %v4434_v49  ;;  %v4610_v20 = vmul.f32 %v367_v53, %v4468_v58  ;;  %v4631_v53 = vmul.f32 %v4554_v14, %v4464_v55  ;;  %v8668_v58 = vld [vmem:[#allocation69_spill] sm:$0xff] }
 0x118   :  { %8644 = vst [vmem:[#allocation141_spill] sm:$0xff] %v4544_v32  ;;  %v4637_v63 = vmul.f32 %v3949_v0, %v8668_v58 }
 0x119   :  { %8646 = vst [vmem:[#allocation142_spill] sm:$0xff] %v4554_v14 }
 0x11a   :  { %8647 = vst [vmem:[#allocation143_spill] sm:$0xff] %v4558_v59 }
 0x11b   :  { %8648 = vst [vmem:[#allocation144_spill] sm:$0xff] %v4564_v21 }
 0x11c   :  { %8651 = vst [vmem:[#allocation145_spill] sm:$0xff] %v4574_v62 }
 0x11d   :  { %8652 = vst [vmem:[#allocation146_spill] sm:$0xff] %v4578_v45 }
 0x11e   :  { %8653 = vst [vmem:[#allocation147_spill] sm:$0xff] %v4582_v11 }
 0x11f   :  { %8656 = vst [vmem:[#allocation148_spill] sm:$0xff] %v4592_v31  ;;  %v8673_v31 = vunpack.i.h.bf16 %v3761_v17  ;;  %v4669_v17 = vmul.f32 %v4544_v32, %v4622_v5  ;;  %v8718_v32 = vld [vmem:[#allocation33_spill] sm:$0xff] }
 0x120   :  { %8657 = vst [vmem:[#allocation149_spill] sm:$0xff] %v4595_v34  ;;  %v4775_v34 = vmul.f32 %v8718_v32, %v4175_v43 }
 0x121   :  { %8659 = vst [vmem:[#allocation150_spill] sm:$0xff] %v4604_v18 }
 0x122   :  { %8660 = vst [vmem:[#allocation151_spill] sm:$0xff] %v4607_v1  ;;  %v8676_v1 = vunpack.i.l.bf16 %v3753_v16  ;;  %v8681_v16 = vand.u32 7, %v4399_v4 }
 0x123   :  { %8661 = vst [vmem:[#allocation152_spill] sm:$0xff] %v4610_v20  ;;  %v8672_v20 = vunpack.i.l.bf16 %v3803_v26  ;;  %v8716_v26 = vld [vmem:[#allocation86_spill] sm:$0xff] }
 0x124   :  { %8662 = vst [vmem:[#allocation153_spill] sm:$0xff] %v4612_v19  ;;  %v3283_v19 = vunpack.i.h.bf16 %v3815_v29  ;;  %v408_v49 = vsel %vm400_vm4, %v8677_v36, %v8676_v1  ;;  %vm160_vm8 = vcmp.le.s32.totalorder %v8681_v16, 6 }
 0x125   :  { %8663 = vst [vmem:[#allocation154_spill] sm:$0xff] %v4614_v8  ;;  %v404_v2 = vsel %vm400_vm4, %v8673_v31, %v8672_v20  ;;  %v8680_v20 = vunpack.i.l.bf16 %v4633_v15  ;;  %v4690_v31 = vmul.f32 %v4424_v42, %v4645_v48  ;;  %v8692_v42 = vshra.s32 %v3983_v60, 3 }
 0x126   :  { %8664 = vst [vmem:[#allocation155_spill] sm:$0xff] %v4617_v23  ;;  %v4657_v23 = vmul.f32 %v4330_v7, %v4554_v14  ;;  %v8679_v7 = vunpack.i.h.bf16 %v4633_v15  ;;  %v4682_v14 = vmul.f32 %v4558_v59, %v4187_v40  ;;  %v4686_v1 = vmul.f32 %v404_v2, %v4334_v9 }
 0x127   :  { %8665 = vst [vmem:[#allocation156_spill] sm:$0xff] %v4622_v5  ;;  %v4703_v16 = vmul.f32 %v404_v2, %v4345_v28  ;;  %v4709_v9 = vmul.f32 %v408_v49, %v4411_v3  ;;  %vm126_vm1 = vcmp.le.s32.totalorder %v8692_v42, 6  ;;  %v4721_v2 = vmul.f32 %v405_v22, %v4558_v59  ;;  %v8696_v28 = vld [vmem:[#allocation21_spill] sm:$0xff] }
 0x128   :  { %8666 = vst [vmem:[#allocation157_spill] sm:$0xff] %v4627_v33  ;;  %v4732_v42 = vmul.f32 %v4381_v38, %v4479_v39  ;;  %v4739_v22 = vmul.f32 %v8668_v58, %v3924_v35  ;;  %v8741_v33 = vunpack.i.l.bf16 %v3793_v24 }
 0x129   :  { %8667 = vst [vmem:[#allocation158_spill] sm:$0xff] %v4631_v53 }
 0x12a   :  { %8669 = vst [vmem:[#allocation159_spill] sm:$0xff] %v4637_v63 }
 0x12b   :  { %8670 = vst [vmem:[#allocation160_spill] sm:$0xff] %v4641_v30  ;;  %v947_v30 = vsel %vm941_vm7, %v8680_v20, %v8679_v7  ;;  %v8686_v7 = vshra.s32 %v3994_v41, 3  ;;  %v8714_v20 = vld [vmem:[#allocation19_spill] sm:$0xff] }
 0x12c   :  { %8671 = vst [vmem:[#allocation161_spill] sm:$0xff] %v4645_v48  ;;  %v951_v36 = vmul.f32 %v947_v30, %v4637_v63  ;;  %v4706_v30 = vmul.f32 %v408_v49, %v4349_v47  ;;  %v8693_v48 = vunpack.i.l.bf16 %v8675_v6  ;;  %v4724_v63 = vpop.permute.xlu1 %3480  ;;  %v4726_v49 = vpop.permute.xlu0 %3475  ;;  %v8703_v47 = vld [vmem:[#allocation71_spill] sm:$0xff]  ;;  %v8717_v6 = vshra.s32 %v8716_v26, 3 }
 0x12d   :  { %8674 = vst [vmem:[#allocation162_spill] sm:$0xff] %v4657_v23  ;;  %v4694_v23 = vmul.f32 %v4558_v59, %v4439_v54  ;;  %vm4698_vm9 = vcmp.le.s32.totalorder %v8686_v7, 6  ;;  %v4718_v7 = vsel %vm160_vm8, 1.0, %v8484_v10  ;;  %v4743_v3 = vmul.f32 %v8703_v47, %v3924_v35 }
 0x12e   :  { %8678 = vst [vmem:[#allocation163_spill] sm:$0xff] %v4669_v17  ;;  %1454 = vmatpush.msra.mxu2 %v951_v36  ;;  %v445_v41 = vsel %vm441_vm2, %v3283_v19, %v8693_v48  ;;  %v8698_v36 = vld [vmem:[#allocation60_spill] sm:$0xff]  ;;  %v4735_v48 = vmul.f32 %v364_v51, %v4682_v14  ;;  %v4755_v51 = vsel %vm126_vm1, 1.0, %v8484_v10  ;;  %vm125_vm5 = vcmp.le.s32.totalorder %v8717_v6, 6 }
 0x12f   :  { %8682 = vst [vmem:[#allocation164_spill] sm:$0xff] %v4682_v14  ;;  %v8699_v60 = vshra.s32 %v8698_v36, 3  ;;  %v4748_v36 = vsel %vm4698_vm9, 1.0, %v8484_v10  ;;  %v4759_v14 = vmul.f32 %v4439_v54, %v4166_v46  ;;  %v8725_v26 = vunpack.i.l.bf16 %v3805_v27 }
 0x130   :  { %8683 = vst [vmem:[#allocation165_spill] sm:$0xff] %v4686_v1  ;;  %vm851_vm8 = vcmp.lt.s32.totalorder %v3834_v37, 1  ;;  %vm8319_vm9 = vcmp.lt.s32.totalorder %v3834_v37, 7  ;;  %vm8286_vm1 = vcmp.lt.s32.totalorder %v3834_v37, 8 }
 0x131   :  { %8684 = vst [vmem:[#allocation166_spill] sm:$0xff] %v4690_v31  ;;  %vm130_vm0 = vcmp.le.s32.totalorder %v8699_v60, 6  ;;  %v8706_v60 = vld [vmem:[#allocation117_spill] sm:$0xff]  ;;  %v3303_v31 = vunpack.i.h.bf16 %v8714_v20 }
 0x132   :  { %8685 = vst [vmem:[#allocation167_spill] sm:$0xff] %v4694_v23  ;;  %v4752_v59 = vmul.f32 %v8706_v60, %v4161_v61  ;;  %v4769_v25 = vsel %vm130_vm0, 1.0, %v8484_v10  ;;  %vm8317_vm0 = vcmp.lt.s32.totalorder %v3834_v37, 9 }
 0x133   :  { %8689 = vst [vmem:[#allocation168_spill] sm:$0xff] %v4703_v16  ;;  %v8724_v16 = vunpack.i.h.bf16 %v3805_v27 }
 0x134   :  { %8690 = vst [vmem:[#allocation169_spill] sm:$0xff] %v4706_v30  ;;  %v4779_v30 = vmul.f32 %v4748_v36, %v4161_v61 }
 0x135   :  { %8691 = vst [vmem:[#allocation170_spill] sm:$0xff] %v4709_v9  ;;  %v8710_v9 = vld [vmem:[#allocation123_spill] sm:$0xff]  ;;  %v4793_v6 = vsel %vm8249_vm13, %v8725_v26, %v8724_v16  ;;  %v4815_v16 = vmul.f32 %v4755_v51, %v4166_v46  ;;  %v4826_v26 = vsel %vm125_vm5, 1.0, %v8484_v10  ;;  %v4843_v10 = vpop.permute.xlu0 %3490 }
 0x136   :  { %8694 = vst [vmem:[#allocation171_spill] sm:$0xff] %v4718_v7  ;;  %v4762_v1 = vmul.f32 %v445_v41, %v8710_v9  ;;  %v8721_v9 = vld [vmem:[#allocation18_spill] sm:$0xff]  ;;  %v4856_v58 = vmul.f32 %v4826_v26, %v4376_v52 }
 0x137   :  { %8695 = vst [vmem:[#allocation172_spill] sm:$0xff] %v4721_v2  ;;  %v4863_v4 = vmul.f32 %v4815_v16, %v4187_v40 }
 0x138   :  { %8697 = vst [vmem:[#allocation173_spill] sm:$0xff] %v4724_v63 }
 0x139   :  { %8700 = vst [vmem:[#allocation60_spill] sm:$0xff] %v4732_v42 }
 0x13a   :  { %8701 = vst [vmem:[#allocation174_spill] sm:$0xff] %v4735_v48  ;;  %v8712_v48 = vld [vmem:[#allocation124_spill] sm:$0xff] }
 0x13b   :  { %8702 = vst [vmem:[#allocation175_spill] sm:$0xff] %v4739_v22  ;;  %v4765_v2 = vmul.f32 %v445_v41, %v8712_v48  ;;  %v8723_v41 = vunpack.i.h.bf16 %v8696_v28  ;;  %v8730_v28 = vld [vmem:[#allocation65_spill] sm:$0xff] }
 0x13c   :  { %8704 = vst [vmem:[#allocation176_spill] sm:$0xff] %v4743_v3  ;;  %v4811_v8 = vmul.f32 %v8730_v28, %v4524_v12  ;;  %v8739_v28 = vld [vmem:[#allocation23_spill] sm:$0xff]  ;;  %v4852_v12 = vmul.f32 %v4779_v30, %v4192_v44 }
 0x13d   :  { %8705 = vst [vmem:[#allocation177_spill] sm:$0xff] %v4748_v36 }
 0x13e   :  { %8707 = vst [vmem:[#allocation178_spill] sm:$0xff] %v4752_v59 }
 0x13f   :  { %8708 = vst [vmem:[#allocation179_spill] sm:$0xff] %v4755_v51  ;;  %v8744_v51 = vld [vmem:[#allocation61_spill] sm:$0xff] }
 0x140   :  { %8709 = vst [vmem:[#allocation180_spill] sm:$0xff] %v4759_v14 }
 0x141   :  { %8711 = vst [vmem:[#allocation181_spill] sm:$0xff] %v4762_v1  ;;  %v8722_v1 = vunpack.i.l.bf16 %v8721_v9  ;;  %v4803_v9 = vmul.f32 %v4739_v22, %v3949_v0 }
 0x142   :  { %8713 = vst [vmem:[#allocation182_spill] sm:$0xff] %v4765_v2  ;;  %v8726_v2 = vunpack.i.l.bf16 %v3815_v29  ;;  %v8733_v29 = vld [vmem:[#allocation28_spill] sm:$0xff] }
 0x143   :  { %8715 = vst [vmem:[#allocation19_spill] sm:$0xff] %v4769_v25  ;;  %v572_v48 = vsel %vm564_vm12, %v8723_v41, %v8722_v1  ;;  %v8728_v1 = vld [vmem:[#allocation58_spill] sm:$0xff] }
 0x144   :  { %8719 = vst [vmem:[#allocation86_spill] sm:$0xff] %v4775_v34  ;;  %v4799_v63 = vsel %vm441_vm2, %v8726_v2, %v3283_v19  ;;  %v4807_v41 = vmul.f32 %v8728_v1, %v4743_v3  ;;  %v4819_v19 = vmul.f32 %v8733_v29, %v4175_v43  ;;  %v4823_v2 = vmul.f32 %v4769_v25, %v4180_v56  ;;  %v8737_v1 = vld [vmem:[#allocation118_spill] sm:$0xff] }
 0x145   :  { %8720 = vst [vmem:[#allocation183_spill] sm:$0xff] %v4779_v30  ;;  %v4830_v3 = vmul.f32 %v8737_v1, %v4180_v56  ;;  %v4835_v36 = vmul.f32 %v572_v48, %v4775_v34  ;;  %v486_v25 = vsel %vm8233_vm15, %v3303_v31, %v8741_v33  ;;  %v4848_v1 = vmul.f32 %v8744_v51, %v3924_v35  ;;  %v8752_v34 = vld [vmem:[#allocation77_spill] sm:$0xff] }
 0x146   :  { %8727 = vst [vmem:[#allocation18_spill] sm:$0xff] %v4803_v9  ;;  %v4868_v51 = vmul.f32 %v4819_v19, %v3946_v50  ;;  %v4872_v35 = vmul.f32 %v4823_v2, %v4240_v57 }
 0x147   :  { %8729 = vst [vmem:[#allocation58_spill] sm:$0xff] %v4807_v41  ;;  %v4875_v33 = vmul.f32 %v572_v48, %v4830_v3  ;;  %v4893_v48 = vmul.f32 %v4856_v58, %v4381_v38 }
 0x148   :  { %8731 = vst [vmem:[#allocation65_spill] sm:$0xff] %v4811_v8  ;;  %v4841_v8 = vpop.permute.xlu1 %3495 }
 0x149   :  { %8732 = vst [vmem:[#allocation184_spill] sm:$0xff] %v4815_v16  ;;  %v8754_v44 = vunpack.i.h.bf16 %v4841_v8 }
 0x14a   :  { %8734 = vst [vmem:[#allocation185_spill] sm:$0xff] %v4819_v19  ;;  %v4933_v19 = vpop.permute.xlu0 %3505 }
 0x14b   :  { %8735 = vst [vmem:[#allocation186_spill] sm:$0xff] %v4823_v2  ;;  %v8773_v2 = vld [vmem:[#allocation6_spill] sm:$0xff] }
 0x14c   :  { %8736 = vst [vmem:[#allocation187_spill] sm:$0xff] %v4826_v26 }
 0x14d   :  { %8738 = vst [vmem:[#allocation188_spill] sm:$0xff] %v4830_v3 }
 0x14e   :  { %8740 = vst [vmem:[#allocation189_spill] sm:$0xff] %v4835_v36  ;;  %v8753_v36 = vunpack.i.l.bf16 %v4520_v13 }
 0x14f   :  { %8742 = vst [vmem:[#allocation190_spill] sm:$0xff] %v4841_v8 }
 0x150   :  { %8743 = vst [vmem:[#allocation191_spill] sm:$0xff] %v4843_v10 }
 0x151   :  { %8745 = vst [vmem:[#allocation61_spill] sm:$0xff] %v4848_v1  ;;  %v4885_v1 = vmul.f32 %v486_v25, %v4564_v21  ;;  %v8768_v21 = vld [vmem:[#allocation25_spill] sm:$0xff] }
 0x152   :  { %8746 = vst [vmem:[#allocation192_spill] sm:$0xff] %v4852_v12  ;;  %v8758_v12 = vld [vmem:[#allocation20_spill] sm:$0xff] }
 0x153   :  { %8747 = vst [vmem:[#allocation193_spill] sm:$0xff] %v4856_v58  ;;  %v8759_v3 = vunpack.i.l.bf16 %v8758_v12 }
 0x154   :  { %8748 = vst [vmem:[#allocation194_spill] sm:$0xff] %v4863_v4  ;;  %v906_v4 = vsel %vm900_vm6, %v8754_v44, %v8753_v36  ;;  %v4903_v44 = vmul.f32 %v4464_v55, %v4376_v52  ;;  %v8762_v36 = vld [vmem:[#allocation109_spill] sm:$0xff] }
 0x155   :  { %8749 = vst [vmem:[#allocation195_spill] sm:$0xff] %v4868_v51  ;;  %v4888_v51 = vmul.f32 %v486_v25, %v4574_v62  ;;  %v910_v57 = vmul.f32 %v906_v4, %v8703_v47  ;;  %v8763_v62 = vunpack.i.h.bf16 %v4726_v49  ;;  %v8769_v25 = vld [vmem:[#allocation92_spill] sm:$0xff]  ;;  %v4939_v4 = vmul.f32 %v4793_v6, %v4376_v52 }
 0x156   :  { %8750 = vst [vmem:[#allocation196_spill] sm:$0xff] %v4872_v35  ;;  %v8779_v52 = vld [vmem:[#allocation132_spill] sm:$0xff] }
 0x157   :  { %8751 = vst [vmem:[#allocation197_spill] sm:$0xff] %v4875_v33  ;;  %v8760_v33 = vunpack.i.h.bf16 %v8739_v28  ;;  %v8765_v28 = vld [vmem:[#allocation26_spill] sm:$0xff]  ;;  %1455 = vmatpush.msra.mxu2 %v910_v57 }
 0x158   :  { %8755 = vst [vmem:[#allocation198_spill] sm:$0xff] %v4885_v1  ;;  %v8764_v1 = vunpack.i.l.bf16 %v4726_v49 }
 0x159   :  { %8756 = vst [vmem:[#allocation199_spill] sm:$0xff] %v4888_v51  ;;  %v490_v35 = vsel %vm8233_vm15, %v8760_v33, %v8759_v3  ;;  %v3327_v51 = vunpack.i.l.bf16 %v8765_v28  ;;  %v8766_v3 = vld [vmem:[#allocation38_spill] sm:$0xff]  ;;  %1456 = vmatpush.msra.mxu2 %v8773_v2 }
 0x15a   :  { %8757 = vst [vmem:[#allocation200_spill] sm:$0xff] %v4893_v48  ;;  %v858_v12 = vsel %vm851_vm8, %v8764_v1, %v8763_v62  ;;  %v4917_v33 = vmul.f32 %v8703_v47, %v8766_v3  ;;  %v8771_v62 = vunpack.i.l.bf16 %v8752_v34  ;;  %v4930_v1 = vpop.permute.xlu1 %3510  ;;  %v8775_v48 = vunpack.i.l.bf16 %v8714_v20  ;;  %v8786_v20 = vld [vmem:[#allocation22_spill] sm:$0xff] }
 0x15b   :  { %8761 = vst [vmem:[#allocation20_spill] sm:$0xff] %v4903_v44  ;;  %v8770_v44 = vunpack.i.h.bf16 %v8752_v34  ;;  %v861_v41 = vmul.f32 %v858_v12, %v3949_v0  ;;  %v4952_v12 = vmul.f32 %v490_v35, %v4578_v45  ;;  %v8784_v45 = vunpack.i.h.bf16 %v8769_v25 }
 0x15c   :  { %8767 = vst [vmem:[#allocation109_spill] sm:$0xff] %v4917_v33  ;;  %v487_v13 = vsel %vm8233_vm15, %v8775_v48, %v3303_v31  ;;  %v4965_v48 = vmul.f32 %v3949_v0, %v8766_v3 }
 0x15d   :  { %v817_v57 = vsel %vm8319_vm9, %v8771_v62, %v8770_v44  ;;  %8772 = vst [vmem:[#allocation92_spill] sm:$0xff] %v4930_v1  ;;  %v8776_v44 = vunpack.i.h.bf16 %v8762_v36  ;;  %v8777_v62 = vunpack.i.l.bf16 %v8762_v36  ;;  %v4955_v1 = vmul.f32 %v490_v35, %v4582_v11  ;;  %1457 = vmatpush.msra.mxu2 %v861_v41  ;;  %v8783_v35 = vld [vmem:[#allocation27_spill] sm:$0xff] }
 0x15e   :  { %8774 = vst [vmem:[#allocation201_spill] sm:$0xff] %v4939_v4  ;;  %v4959_v4 = vmul.f32 %v4799_v63, %v8779_v52  ;;  %v820_v31 = vmul.f32 %v817_v57, %v4917_v33  ;;  %v8785_v52 = vunpack.i.l.bf16 %v8769_v25  ;;  %v8787_v57 = vunpack.i.l.bf16 %v8786_v20 }
 0x15f   :  { %v776_v2 = vsel %vm8286_vm1, %v8777_v62, %v8776_v44  ;;  %8778 = vst [vmem:[#allocation202_spill] sm:$0xff] %v4955_v1  ;;  %v8782_v44 = vunpack.i.h.bf16 %v3805_v27  ;;  %v8788_v33 = vunpack.i.h.bf16 %v8768_v21  ;;  %v4985_v27 = vmul.f32 %v487_v13, %v4604_v18  ;;  %v8800_v1 = vld [vmem:[#allocation133_spill] sm:$0xff] }
 0x160   :  { %8780 = vst [vmem:[#allocation203_spill] sm:$0xff] %v4959_v4  ;;  %v735_v41 = vsel %vm8317_vm0, %v8785_v52, %v8784_v45  ;;  %1458 = vmatpush.msra.mxu2 %v820_v31  ;;  %v4990_v11 = vmul.f32 %v4739_v22, %v8703_v47  ;;  %v4994_v45 = vmul.f32 %v4464_v55, %v4479_v39  ;;  %v8791_v52 = vld [vmem:[#allocation94_spill] sm:$0xff] }
 0x161   :  { %8781 = vst [vmem:[#allocation204_spill] sm:$0xff] %v4965_v48  ;;  %v527_v62 = vsel %vm8249_vm13, %v8782_v44, %v3327_v51  ;;  %v531_v0 = vsel %vm8249_vm13, %v8788_v33, %v8787_v57  ;;  %v779_v44 = vmul.f32 %v776_v2, %v8766_v3  ;;  %v4998_v20 = vmul.f32 %v8791_v52, %v4479_v39  ;;  %v8795_v31 = vld [vmem:[#allocation98_spill] sm:$0xff] }
 0x162   :  { %8789 = vst [vmem:[#allocation27_spill] sm:$0xff] %v4990_v11  ;;  %v5001_v33 = vmul.f32 %v527_v62, %v4161_v61  ;;  %v5004_v57 = vmul.f32 %v527_v62, %v4166_v46  ;;  %v5008_v2 = vmul.f32 %v4826_v26, %v4479_v39  ;;  %v5012_v18 = vmul.f32 %v8795_v31, %v4732_v42  ;;  %v8808_v39 = vld [vmem:[#allocation36_spill] sm:$0xff] }
 0x163   :  { %8790 = vst [vmem:[#allocation22_spill] sm:$0xff] %v4994_v45  ;;  %1459 = vmatpush.msra.mxu2 %v779_v44  ;;  %v738_v3 = vmul.f32 %v735_v41, %v4965_v48  ;;  %v5016_v52 = vmul.f32 %v531_v0, %v4175_v43  ;;  %v5019_v61 = vmul.f32 %v531_v0, %v4180_v56  ;;  %v8798_v62 = vunpack.i.h.bf16 %v8765_v28  ;;  %v8802_v41 = vld [vmem:[#allocation103_spill] sm:$0xff]  ;;  %v8806_v43 = vld [vmem:[#allocation32_spill] sm:$0xff] }
 0x164   :  { %8792 = vst [vmem:[#allocation94_spill] sm:$0xff] %v4998_v20  ;;  %v5030_v31 = vmul.f32 %v4439_v54, %v8800_v1  ;;  %v5034_v44 = vmul.f32 %v8802_v41, %v4631_v53  ;;  %v5038_v0 = vmul.f32 %v4187_v40, %v8800_v1  ;;  %v8805_v56 = vld [vmem:[#allocation31_spill] sm:$0xff]  ;;  %v3343_v48 = vunpack.i.h.bf16 %v8806_v43  ;;  %v8859_v20 = vld [vmem:[#allocation42_spill] sm:$0xff] }
 0x165   :  { %8793 = vst [vmem:[#allocation205_spill] sm:$0xff] %v5001_v33  ;;  %v5025_v46 = vsel %vm8249_vm13, %v3327_v51, %v8798_v62  ;;  %v5042_v51 = vpop.permute.xlu1 %3525  ;;  %v5044_v62 = vpop.permute.xlu0 %3520  ;;  %1460 = vmatpush.msra.mxu2 %v738_v3  ;;  %v5050_v41 = vmul.f32 %v3946_v50, %v8733_v29  ;;  %v5055_v33 = vmul.f32 %v5008_v2, %v4381_v38  ;;  %v8814_v28 = vunpack.i.h.bf16 %v8783_v35 }
 0x166   :  { %8794 = vst [vmem:[#allocation206_spill] sm:$0xff] %v5008_v2  ;;  %v5059_v42 = vmul.f32 %v4793_v6, %v8800_v1  ;;  %v5063_v3 = vmul.f32 %v5025_v46, %v4622_v5  ;;  %v8815_v53 = vunpack.i.l.bf16 %v8783_v35  ;;  %v5077_v6 = vmul.f32 %v4799_v63, %v4694_v23 }
 0x167   :  { %8796 = vst [vmem:[#allocation98_spill] sm:$0xff] %v5012_v18  ;;  %v5097_v23 = vmul.f32 %v487_v13, %v5038_v0  ;;  %v8826_v18 = vunpack.i.l.bf16 %v8805_v56  ;;  %v8830_v13 = vld [vmem:[#allocation95_spill] sm:$0xff]  ;;  %v8860_v56 = vld [vmem:[#allocation72_spill] sm:$0xff]  ;;  %vm1410_vm13 = vcmask 719872  }
 0x168   :  { %8797 = vst [vmem:[#allocation207_spill] sm:$0xff] %v5019_v61  ;;  %v697_v61 = vmul.f32 %v8808_v39, %v4990_v11  ;;  %v8813_v39 = vld [vmem:[#allocation55_spill] sm:$0xff] }
 0x169   :  { %8799 = vst [vmem:[#allocation208_spill] sm:$0xff] %v5025_v46  ;;  %v656_v11 = vmul.f32 %v8813_v39, %v4739_v22  ;;  %v8820_v39 = vunpack.i.l.bf16 %v4633_v15  ;;  %v8821_v22 = vunpack.i.l.bf16 %v5044_v62 }
 0x16a   :  { %8801 = vst [vmem:[#allocation209_spill] sm:$0xff] %v5030_v31  ;;  %1461 = vmatpush.msra.mxu2 %v697_v61 }
 0x16b   :  { %8803 = vst [vmem:[#allocation103_spill] sm:$0xff] %v5034_v44  ;;  %v5073_v44 = vsel %vm646_vm10, %v8815_v53, %v8814_v28  ;;  %v8822_v53 = vunpack.i.h.bf16 %v4841_v8  ;;  %v8823_v28 = vunpack.i.l.bf16 %v4841_v8  ;;  %v8828_v8 = vunpack.i.l.bf16 %v3793_v24 }
 0x16c   :  { %8804 = vst [vmem:[#allocation210_spill] sm:$0xff] %v5038_v0  ;;  %1462 = vmatpush.msra.mxu2 %v656_v11  ;;  %v8836_v11 = vunpack.i.l.bf16 %v8806_v43 }
 0x16d   :  { %8807 = vst [vmem:[#allocation32_spill] sm:$0xff] %v5044_v62  ;;  %v907_v63 = vsel %vm900_vm6, %v8823_v28, %v8822_v53  ;;  %v8834_v28 = vld [vmem:[#allocation24_spill] sm:$0xff]  ;;  %v5150_v0 = vpop.permute.xlu1 %3540  ;;  %v5152_v43 = vpop.permute.xlu0 %3535 }
 0x16e   :  { %8809 = vst [vmem:[#allocation36_spill] sm:$0xff] %v5050_v41 }
 0x16f   :  { %8810 = vst [vmem:[#allocation211_spill] sm:$0xff] %v5055_v33 }
 0x170   :  { %8811 = vst [vmem:[#allocation212_spill] sm:$0xff] %v5059_v42  ;;  %v8818_v42 = vld [vmem:[#allocation137_spill] sm:$0xff] }
 0x171   :  { %8812 = vst [vmem:[#allocation213_spill] sm:$0xff] %v5063_v3  ;;  %v5081_v46 = vmul.f32 %v8818_v42, %v4622_v5  ;;  %v948_v3 = vsel %vm941_vm7, %v8821_v22, %v8820_v39  ;;  %v568_v22 = vsel %vm564_vm12, %v3343_v48, %v8826_v18  ;;  %v8827_v39 = vunpack.i.h.bf16 %v3793_v24  ;;  %v8862_v42 = vld [vmem:[#allocation5_spill] sm:$0xff] }
 0x172   :  { %8816 = vst [vmem:[#allocation55_spill] sm:$0xff] %v5073_v44  ;;  %v950_v61 = vmul.f32 %v948_v3, %v5050_v41  ;;  %v5117_v3 = vmul.f32 %v4779_v30, %v8706_v60  ;;  %v5125_v18 = vmul.f32 %v4669_v17, %v4718_v7  ;;  %v8837_v41 = vld [vmem:[#allocation129_spill] sm:$0xff]  ;;  %v8839_v30 = vunpack.i.h.bf16 %v4843_v10 }
 0x173   :  { %8817 = vst [vmem:[#allocation214_spill] sm:$0xff] %v5077_v6  ;;  %v8825_v6 = vld [vmem:[#allocation56_spill] sm:$0xff]  ;;  %v5112_v53 = vsel %vm8233_vm15, %v8828_v8, %v8827_v39  ;;  %v909_v8 = vmul.f32 %v907_v63, %v8718_v32  ;;  %v5131_v39 = vmul.f32 %v4856_v58, %v4464_v55  ;;  %v5148_v63 = vmul.f32 %v568_v22, %v4759_v14  ;;  %v8845_v10 = vld [vmem:[#allocation185_spill] sm:$0xff] }
 0x174   :  { %8819 = vst [vmem:[#allocation215_spill] sm:$0xff] %v5081_v46  ;;  %v615_v21 = vmul.f32 %v8825_v6, %v4803_v9  ;;  %v5121_v6 = vmul.f32 %v4815_v16, %v4439_v54  ;;  %1414 = vmatpush.msra.mxu0 %v950_v61  ;;  %v569_v9 = vsel %vm564_vm12, %v8836_v11, %v3343_v48  ;;  %v8842_v48 = vld [vmem:[#allocation58_spill] sm:$0xff]  ;;  %v8843_v11 = vld [vmem:[#allocation37_spill] sm:$0xff]  ;;  %v8854_v17 = vunpack.i.h.bf16 %v8830_v13 }
 0x175   :  { %8824 = vst [vmem:[#allocation216_spill] sm:$0xff] %v5097_v23  ;;  %v8838_v23 = vunpack.i.l.bf16 %v4726_v49  ;;  %v5145_v61 = vmul.f32 %v568_v22, %v4752_v59  ;;  %v5157_v24 = vmul.f32 %v8718_v32, %v8843_v11  ;;  %v8847_v22 = vld [vmem:[#allocation108_spill] sm:$0xff]  ;;  %v8861_v60 = vld [vmem:[#allocation73_spill] sm:$0xff]  ;;  %vm982_vm15 = vcmp.lt.s32.totalorder %v3834_v37, 120 }
 0x176   :  { %8829 = vst [vmem:[#allocation56_spill] sm:$0xff] %v5112_v53  ;;  %1463 = vmatpush.msra.mxu2 %v615_v21  ;;  %1415 = vmatpush.msra.mxu0 %v909_v8  ;;  %v8848_v59 = vshra.s32 %v8847_v22, 3  ;;  %v8851_v8 = vld [vmem:[#allocation110_spill] sm:$0xff]  ;;  %v8858_v22 = vld [vmem:[#allocation20_spill] sm:$0xff]  ;;  %v3403_v4 = vunpack.i.h.bf16 %v8861_v60  ;;  %v8881_v14 = vld [vmem:[#allocation177_spill] sm:$0xff] }
 0x177   :  { %8831 = vst [vmem:[#allocation217_spill] sm:$0xff] %v5117_v3  ;;  %v859_v21 = vsel %vm851_vm8, %v8839_v30, %v8838_v23  ;;  %v5161_v23 = vmul.f32 %v8845_v10, %v8718_v32  ;;  %v5165_v30 = vmul.f32 %v5073_v44, %v4856_v58  ;;  %v8853_v3 = vunpack.i.l.bf16 %v8752_v34  ;;  %v8855_v53 = vld [vmem:[#allocation118_spill] sm:$0xff]  ;;  %v8863_v34 = vld [vmem:[#allocation61_spill] sm:$0xff]  ;;  %v8867_v44 = vld [vmem:[#allocation179_spill] sm:$0xff] }
 0x178   :  { %8832 = vst [vmem:[#allocation218_spill] sm:$0xff] %v5121_v6  ;;  %1464 = vmatpush.msra.mxu2 %v8842_v48  ;;  %vm5169_vm5 = vcmp.le.s32.totalorder %v8848_v59, 6  ;;  %v8856_v58 = vld [vmem:[#allocation186_spill] sm:$0xff]  ;;  %v5187_v59 = vmul.f32 %v569_v9, %v8858_v22  ;;  %1416 = vmatpush.msra.mxu0 %v8862_v42  ;;  %v860_v13 = vmul.f32 %v859_v21, %v3946_v50 }
 0x179   :  { %8833 = vst [vmem:[#allocation219_spill] sm:$0xff] %v5125_v18  ;;  %v818_v18 = vsel %vm8319_vm9, %v8854_v17, %v8853_v3  ;;  %v5184_v46 = vmul.f32 %v8856_v58, %v8855_v53  ;;  %v8864_v17 = vld [vmem:[#allocation63_spill] sm:$0xff]  ;;  %v8865_v53 = vunpack.i.l.bf16 %v8762_v36  ;;  %v8866_v58 = vunpack.i.h.bf16 %v8837_v41 }
 0x17a   :  { %8835 = vst [vmem:[#allocation24_spill] sm:$0xff] %v5131_v39  ;;  %1465 = vmatpush.msra.mxu2 %v8863_v34  ;;  %v5204_v48 = vmul.f32 %v8867_v44, %v8800_v1  ;;  %1417 = vmatpush.msra.mxu0 %v860_v13  ;;  %v8871_v34 = vld [vmem:[#allocation65_spill] sm:$0xff]  ;;  %v819_v21 = vmul.f32 %v818_v18, %v5157_v24  ;;  %v8873_v41 = vmov 0.0   ;;  %v8876_v1 = vld [vmem:[#allocation62_spill] sm:$0xff]  ;;  %v8877_v13 = vunpack.i.l.bf16 %v8769_v25 }
 0x17b   :  { %8840 = vst [vmem:[#allocation220_spill] sm:$0xff] %v5145_v61  ;;  %v5174_v61 = vpop.permute.xlu2 %3530  ;;  %v777_v22 = vsel %vm8286_vm1, %v8866_v58, %v8865_v53  ;;  %v5214_v3 = vmul.f32 %v3946_v50, %v8843_v11  ;;  %v5219_v58 = vsel %vm5169_vm5, 1.0, %v8873_v41  ;;  %v5222_v53 = vmul.f32 %v569_v9, %v5030_v31  ;;  %v8883_v41 = vld [vmem:[#allocation40_spill] sm:$0xff]  ;;  %v8884_v31 = vld [vmem:[#allocation131_spill] sm:$0xff] }
 0x17c   :  { %8841 = vst [vmem:[#allocation221_spill] sm:$0xff] %v5152_v43  ;;  %1466 = vmatpush.msra.mxu2 %v8871_v34  ;;  %v8878_v34 = vunpack.i.h.bf16 %v8851_v8  ;;  %v3363_v9 = vunpack.i.h.bf16 %v8883_v41  ;;  %1418 = vmatpush.msra.mxu0 %v819_v21  ;;  %v8885_v8 = vunpack.i.l.bf16 %v8860_v56  ;;  %v5269_v56 = vpop.permute.xlu0 %3550  ;;  %vm1023_vm5 = vcmp.lt.s32.totalorder %v3834_v37, 119 }
 0x17d   :  { %8844 = vst [vmem:[#allocation58_spill] sm:$0xff] %v5157_v24  ;;  %v8880_v24 = vld [vmem:[#allocation157_spill] sm:$0xff] }
 0x17e   :  { %8846 = vst [vmem:[#allocation222_spill] sm:$0xff] %v5161_v23  ;;  %v736_v18 = vsel %vm8317_vm0, %v8878_v34, %v8877_v13  ;;  %v5237_v50 = vmul.f32 %v8881_v14, %v8880_v24  ;;  %1467 = vmatpush.msra.mxu2 %v8884_v31  ;;  %v5246_v13 = vsel %vm8316_vm3, %v3403_v4, %v8885_v8  ;;  %v8887_v34 = vld [vmem:[#allocation34_spill] sm:$0xff]  ;;  %v8890_v24 = vld [vmem:[#allocation51_spill] sm:$0xff]  ;;  %v8896_v31 = vld [vmem:[#allocation69_spill] sm:$0xff] }
 0x17f   :  { %8852 = vst [vmem:[#allocation108_spill] sm:$0xff] %v5174_v61 }
 0x180   :  { %8857 = vst [vmem:[#allocation223_spill] sm:$0xff] %v5184_v46  ;;  %v8869_v46 = vld [vmem:[#allocation90_spill] sm:$0xff] }
 0x181   :  { %8868 = vst [vmem:[#allocation73_spill] sm:$0xff] %v5204_v48  ;;  %v5208_v42 = vmul.f32 %v8869_v46, %v4994_v45  ;;  %v5233_v45 = vmul.f32 %v5219_v58, %v4622_v5  ;;  %v778_v46 = vmul.f32 %v777_v22, %v8843_v11  ;;  %v8891_v11 = vunpack.i.l.bf16 %v8864_v17 }
 0x182   :  { %8872 = vst [vmem:[#allocation63_spill] sm:$0xff] %v5214_v3  ;;  %v5275_v22 = vmul.f32 %v8703_v47, %v8896_v31  ;;  %v5296_v47 = vld [vmem:[%s7970_s1] sm:$0xff] }
 0x183   :  { %8870 = vst [vmem:[#allocation61_spill] sm:$0xff] %v5208_v42  ;;  %v8889_v42 = vunpack.i.h.bf16 %v8859_v20  ;;  %1419 = vmatpush.msra.mxu0 %v778_v46  ;;  %v1179_v46 = vmul.f32 %v5246_v13, %v5121_v6 }
 0x184   :  { %8874 = vst [vmem:[#allocation90_spill] sm:$0xff] %v5219_v58 }
 0x185   :  { %8875 = vst [vmem:[#allocation65_spill] sm:$0xff] %v5222_v53  ;;  %v8888_v53 = vunpack.i.l.bf16 %v8887_v34  ;;  %v5267_v34 = vpop.permute.xlu1 %3555 }
 0x186   :  { %8879 = vst [vmem:[#allocation224_spill] sm:$0xff] %v5233_v45  ;;  %v8892_v45 = vunpack.i.h.bf16 %v8783_v35  ;;  %v8904_v35 = vld [vmem:[#allocation136_spill] sm:$0xff] }
 0x187   :  { %8882 = vst [vmem:[#allocation225_spill] sm:$0xff] %v5237_v50  ;;  %v5254_v50 = vsel %vm8316_vm3, %v8889_v42, %v8888_v53  ;;  %v8895_v42 = vld [vmem:[#allocation85_spill] sm:$0xff]  ;;  %v737_v53 = vmul.f32 %v736_v18, %v5214_v3  ;;  %v8901_v18 = vunpack.i.h.bf16 %v8876_v1 }
 0x188   :  { %8886 = vst [vmem:[#allocation40_spill] sm:$0xff] %v5246_v13  ;;  %v5265_v8 = vsel %vm646_vm10, %v8892_v45, %v8891_v11  ;;  %1468 = vmatpush.msra.mxu2 %v8895_v42  ;;  %v5281_v11 = vpop.permute.xlu2 %3545  ;;  %v8899_v42 = vld [vmem:[#allocation50_spill] sm:$0xff]  ;;  %v696_v6 = vmul.f32 %v5254_v50, %v5161_v23  ;;  %v8908_v45 = vunpack.i.l.bf16 %v5267_v34  ;;  %v8911_v13 = vunpack.i.h.bf16 %v8890_v24 }
 0x189   :  { %8893 = vst [vmem:[#allocation131_spill] sm:$0xff] %v5265_v8  ;;  %v8900_v21 = vunpack.i.l.bf16 %v8899_v42  ;;  %1420 = vmatpush.msra.mxu0 %v737_v53  ;;  %v8905_v42 = vunpack.i.l.bf16 %v8834_v28  ;;  %v1163_v53 = vmul.f32 %v5265_v8, %v4815_v16 }
 0x18a   :  { %8894 = vst [vmem:[#allocation34_spill] sm:$0xff] %v5269_v56  ;;  %1469 = vmatpush.msra.mxu2 %v8904_v35  ;;  %v8907_v35 = vunpack.i.h.bf16 %v5267_v34  ;;  %v8909_v56 = vld [vmem:[#allocation41_spill] sm:$0xff] }
 0x18b   :  { %8897 = vst [vmem:[#allocation51_spill] sm:$0xff] %v5275_v22  ;;  %v5291_v3 = vsel %vm646_vm10, %v8901_v18, %v8900_v21  ;;  %v5306_v1 = vsel %vm605_vm11, %v3363_v9, %v8905_v42  ;;  %v8906_v21 = vunpack.i.l.bf16 %v8883_v41  ;;  %v8910_v42 = vunpack.i.l.bf16 %v8909_v56  ;;  %1421 = vmatpush.msra.mxu0 %v696_v6  ;;  %1470 = vmatmul.f32.vlgmr.msra.gmra.mxu2 %v5296_v47 }
 0x18c   :  { %8898 = vst [vmem:[#allocation85_spill] sm:$0xff] %v5281_v11  ;;  %1559 = vmatpush.msrb.mxu2 %v1179_v46  ;;  %v1029_v23 = vsel %vm1023_vm5, %v8908_v45, %v8907_v35  ;;  %v8913_v46 = vunpack.i.h.bf16 %v5152_v43  ;;  %v655_v16 = vmul.f32 %v5291_v3, %v8845_v10  ;;  %v8914_v56 = vunpack.i.l.bf16 %v8861_v60  ;;  %v1748_v60 = vld [vmem:[%s7971_s4] sm:$0xff] }
 0x18d   :  { %8902 = vst [vmem:[#allocation50_spill] sm:$0xff] %v5291_v3  ;;  %v5312_v18 = vsel %vm605_vm11, %v8906_v21, %v3363_v9  ;;  %v5328_v41 = vsel %vm605_vm11, %v8911_v13, %v8910_v42  ;;  %v8912_v9 = vunpack.i.l.bf16 %v5150_v0  ;;  %v1033_v45 = vmul.f32 %v1029_v23, %v5275_v22  ;;  %v8921_v10 = vld [vmem:[#allocation91_spill] sm:$0xff] }
 0x18e   :  { %8903 = vst [vmem:[#allocation226_spill] sm:$0xff] %v5296_v47  ;;  %v5343_v35 = vsel %vm8316_vm3, %v8914_v56, %v3403_v4  ;;  %v8915_v13 = vunpack.i.h.bf16 %v8859_v20  ;;  %v8916_v42 = vunpack.i.l.bf16 %v8859_v20  ;;  %1560 = vmatpush.msrb.mxu2 %v1163_v53  ;;  %v5362_v4 = vmul.f32 %v4718_v7, %v4622_v5  ;;  %v8920_v56 = vld [vmem:[#allocation66_spill] sm:$0xff]  ;;  %1422 = vmatpush.msra.mxu0 %v655_v16  ;;  %v8922_v53 = vld [vmem:[#allocation195_spill] sm:$0xff]  ;;  %v8923_v20 = vld [vmem:[#allocation200_spill] sm:$0xff] }
 0x18f   :  { %v988_v21 = vsel %vm982_vm15, %v8913_v46, %v8912_v9  ;;  %v8918_v9 = vld [vmem:[#allocation194_spill] sm:$0xff]  ;;  %v8244_v46 = vmov 0   ;;  %1488 = vmatpush.msra.mxu3 %v1033_v45  ;;  %v1146_v5 = vmul.f32 %v5312_v18, %v8923_v20  ;;  %v5380_v45 = vpop.permute.xlu0 %3565  ;;  %v5392_v22 = vmul.f32 %v5204_v48, %v4187_v40  ;;  %v8928_v16 = vld [vmem:[#allocation112_spill] sm:$0xff] }
 0x190   :  { %v5352_v6 = vsel %vm8316_vm3, %v8916_v42, %v8915_v13  ;;  %v1147_v23 = vmul.f32 %v5306_v1, %v8918_v9  ;;  %3575 = vset.pattern.permute.xlu0 %v8244_v46  ;;  %8919 = vst [vmem:[#allocation41_spill] sm:$0xff] %v5362_v4  ;;  %v614_v42 = vmul.f32 %v5328_v41, %v8922_v53  ;;  %v5377_v13 = vld [vmem:[%s7970_s1 + $0x8] sm:$0xff]  ;;  %v8935_v20 = vunpack.i.l.bf16 %v8921_v10 }
 0x191   :  { %8917 = vst [vmem:[#allocation136_spill] sm:$0xff] %v5352_v6  ;;  %v992_v9 = vmul.f32 %v988_v21, %v8896_v31  ;;  %v1178_v6 = vmul.f32 %v5343_v35, %v5131_v39  ;;  %1751 = vperm.xlu0 %3575, %v1748_v60   ;;  %v5384_v21 = vmul.f32 %v8718_v32, %v8733_v29  ;;  %v8932_v31 = vld [vmem:[#allocation189_spill] sm:$0xff]  ;;  %v8936_v39 = vunpack.i.h.bf16 %v8769_v25  ;;  %v5428_v32 = vpop.permute.xlu2 %3560 }
 0x192   :  { %1561 = vmatpush.msrb.mxu2 %v1147_v23  ;;  %8924 = vst [vmem:[#allocation66_spill] sm:$0xff] %v5380_v45  ;;  %1423 = vmatpush.msra.mxu0 %v614_v42  ;;  %v8926_v23 = vld [vmem:[#allocation87_spill] sm:$0xff]  ;;  %v5402_v42 = vmul.f32 %v5008_v2, %v4464_v55  ;;  %v5446_v3 = vmul.f32 %v4381_v38, %v4826_v26 }
 0x193   :  { %1489 = vmatpush.msra.mxu3 %v992_v9  ;;  %8925 = vst [vmem:[#allocation91_spill] sm:$0xff] %v5384_v21  ;;  %v5388_v46 = vmul.f32 %v8926_v23, %v5055_v33  ;;  %v5398_v9 = vmul.f32 %v4381_v38, %v8928_v16  ;;  %v8931_v23 = vld [vmem:[#allocation83_spill] sm:$0xff] }
 0x194   :  { %8927 = vst [vmem:[#allocation87_spill] sm:$0xff] %v5392_v22  ;;  %1562 = vmatpush.msrb.mxu2 %v5148_v63  ;;  %v5406_v33 = vmul.f32 %v8931_v23, %v5008_v2  ;;  %1424 = vmatpush.msra.mxu0 %v8932_v31  ;;  %v8934_v63 = vunpack.i.h.bf16 %v8762_v36  ;;  %v734_v23 = vsel %vm8317_vm0, %v8936_v39, %v8935_v20  ;;  %v8938_v2 = vld [vmem:[#allocation134_spill] sm:$0xff]  ;;  %v8939_v36 = vunpack.i.l.bf16 %v5267_v34 }
 0x195   :  { %1519 = vmatpush.msrb.mxu3 %v1178_v6  ;;  %8929 = vst [vmem:[#allocation227_spill] sm:$0xff] %v5398_v9  ;;  %v8933_v6 = vunpack.i.l.bf16 %v8920_v56  ;;  %v5425_v31 = vmul.f32 %v5204_v48, %v4439_v54  ;;  %v3503_v53 = vunpack.i.h.bf16 %v8938_v2  ;;  %v8941_v20 = vunpack.i.h.bf16 %v5152_v43 }
 0x196   :  { %8930 = vst [vmem:[#allocation228_spill] sm:$0xff] %v5402_v42  ;;  %3200 = vmatmul.msk.f32.vlgmr.msra.gmra.mxu3 %vm1410_vm13, %v5377_v13  ;;  %1563 = vmatpush.msrb.mxu2 %v5004_v57  ;;  %v8942_v39 = vunpack.i.l.bf16 %v5152_v43 }
 0x197   :  { %v775_v60 = vsel %vm8286_vm1, %v8934_v63, %v8933_v6  ;;  %8937 = vst [vmem:[#allocation83_spill] sm:$0xff] %v5425_v31  ;;  %1520 = vmatpush.msrb.mxu3 %v5165_v30  ;;  %v8940_v6 = vunpack.i.l.bf16 %v5380_v45  ;;  %1425 = vmatpush.msra.mxu0 %v5016_v52  ;;  %v8944_v30 = vunpack.i.h.bf16 %v5044_v62  ;;  %v8945_v45 = vunpack.i.h.bf16 %v4633_v15 }
 0x198   :  { %v989_v63 = vsel %vm982_vm15, %v8942_v39, %v8941_v20  ;;  %8943 = vst [vmem:[#allocation189_spill] sm:$0xff] %v5446_v3  ;;  %v8948_v20 = vmov 0   ;;  %v8949_v39 = vld [vmem:[#allocation199_spill] sm:$0xff]  ;;  %v8950_v52 = vunpack.i.l.bf16 %v8938_v2  ;;  %v5470_v15 = vmul.f32 %v734_v23, %v5398_v9  ;;  %v8951_v2 = vld [vmem:[#allocation154_spill] sm:$0xff] }
 0x199   :  { %v1030_v25 = vsel %vm1023_vm5, %v8940_v6, %v8939_v36  ;;  %v946_v36 = vsel %vm941_vm7, %v8945_v45, %v8944_v30  ;;  %v8946_v6 = vld [vmem:[#allocation96_spill] sm:$0xff]  ;;  %3574 = vset.pattern.permute.xlu2 %v8948_v20  ;;  %1521 = vmatpush.msrb.mxu3 %v1146_v5  ;;  %v8263_v30 = vunpack.i.h.bf16 %v5428_v32  ;;  %v991_v5 = vmul.f32 %v989_v63, %v8733_v29  ;;  %v8957_v20 = vld [vmem:[#allocation201_spill] sm:$0xff] }
 0x19a   :  { %v1032_v57 = vmul.f32 %v1030_v25, %v5384_v21  ;;  %v5458_v43 = vmul.f32 %v4187_v40, %v8946_v6  ;;  %1564 = vmatpush.msrb.mxu2 %v8949_v39  ;;  %v905_v25 = vsel %vm900_vm6, %v8950_v52, %v3503_v53  ;;  %v5467_v21 = vmul.f32 %v775_v60, %v8928_v16  ;;  %v8952_v52 = vld [vmem:[#allocation173_spill] sm:$0xff]  ;;  %v8953_v60 = vld [vmem:[#allocation182_spill] sm:$0xff]  ;;  %v8959_v63 = vld [vmem:[#allocation92_spill] sm:$0xff] }
 0x19b   :  { %1426 = vmatpush.msra.mxu0 %v4952_v12  ;;  %v3482_v8 = vunpack.i.l.bf16 %v8952_v52  ;;  %1522 = vmatpush.msrb.mxu3 %v5187_v59  ;;  %v952_v23 = vmul.f32 %v946_v36, %v5446_v3  ;;  %v5484_v45 = vmul.f32 %v4439_v54, %v8867_v44  ;;  %v8956_v59 = vunpack.i.l.bf16 %v5428_v32  ;;  %v8966_v29 = vld [vmem:[#allocation149_spill] sm:$0xff] }
 0x19c   :  { %8947 = vst [vmem:[#allocation134_spill] sm:$0xff] %v5458_v43  ;;  %1448 = vmatpush.msra.mxu1 %v1032_v57  ;;  %1565 = vmatpush.msrb.mxu2 %v8953_v60  ;;  %v8955_v57 = vld [vmem:[#allocation139_spill] sm:$0xff]  ;;  %v3528_v60 = vunpack.i.h.bf16 %v5042_v51  ;;  %v911_v12 = vmul.f32 %v905_v25, %v4464_v55  ;;  %v8964_v3 = vunpack.i.h.bf16 %v4726_v49  ;;  %v8969_v49 = vunpack.i.l.bf16 %v5281_v11 }
 0x19d   :  { %8954 = vst [vmem:[#allocation199_spill] sm:$0xff] %v5484_v45  ;;  %1427 = vmatpush.msra.mxu0 %v8955_v57  ;;  %v1027_v36 = vsel %vm1023_vm5, %v8956_v59, %v8263_v30  ;;  %1523 = vmatpush.msrb.mxu3 %v8957_v20  ;;  %v5502_v57 = vmul.f32 %v4187_v40, %v8867_v44  ;;  %v8960_v59 = vld [vmem:[#allocation168_spill] sm:$0xff]  ;;  %v8961_v30 = vld [vmem:[#allocation169_spill] sm:$0xff]  ;;  %v8963_v20 = vunpack.i.h.bf16 %v5044_v62  ;;  %v8980_v11 = vunpack.i.l.bf16 %v8959_v63 }
 0x19e   :  { %1449 = vmatpush.msra.mxu1 %v991_v5  ;;  %1566 = vmatpush.msrb.mxu2 %v8960_v59  ;;  %v1035_v5 = vmul.f32 %v1027_v36, %v5484_v45  ;;  %v857_v59 = vsel %vm851_vm8, %v8964_v3, %v3482_v8  ;;  %v8970_v36 = vunpack.i.h.bf16 %v5150_v0  ;;  %v8978_v62 = vld [vmem:[#allocation9_spill] sm:$0xff] }
 0x19f   :  { %8958 = vst [vmem:[#allocation154_spill] sm:$0xff] %v5502_v57  ;;  %1428 = vmatpush.msra.mxu0 %v8961_v30  ;;  %1524 = vmatpush.msrb.mxu3 %v4985_v27  ;;  %v5524_v30 = vmul.f32 %v4464_v55, %v8928_v16  ;;  %v5577_v16 = vmul.f32 %v4464_v55, %v4826_v26 }
 0x1a0   :  { %1494 = vmatpush.msrb.mxu1 %v952_v23  ;;  %v8962_v23 = vunpack.i.l.bf16 %v5042_v51  ;;  %1567 = vmatpush.msrb.mxu2 %v8966_v29  ;;  %v986_v3 = vsel %vm982_vm15, %v8970_v36, %v8969_v49  ;;  %v8975_v49 = vld [vmem:[#allocation77_spill] sm:$0xff] }
 0x1a1   :  { %8965 = vst [vmem:[#allocation173_spill] sm:$0xff] %v5524_v30  ;;  %3199 = vmatmul.msk.f32.vlgmr.msra.gmra.mxu1 %vm1410_vm13, %v5377_v13  ;;  %v8976_v36 = vunpack.i.h.bf16 %v8975_v49  ;;  %v8977_v29 = vld [vmem:[#allocation113_spill] sm:$0xff]  ;;  %v8982_v49 = vunpack.i.h.bf16 %v8952_v52 }
 0x1a2   :  { %v945_v25 = vsel %vm941_vm7, %v8963_v20, %v8962_v23  ;;  %1495 = vmatpush.msrb.mxu1 %v911_v12  ;;  %v8967_v23 = vld [vmem:[#allocation151_spill] sm:$0xff]  ;;  %v8968_v12 = vunpack.i.l.bf16 %v4933_v19  ;;  %v8971_v20 = vld [vmem:[#allocation137_spill] sm:$0xff]  ;;  %1568 = vmatpush.msrb.mxu2 %v1035_v5  ;;  %8983 = vst [vmem:[#allocation139_spill] sm:$0xff] %v5577_v16  ;;  %v8987_v5 = vunpack.i.h.bf16 %v5267_v34 }
 0x1a3   :  { %1429 = vmatpush.msra.mxu0 %v8967_v23  ;;  %v5541_v39 = vmul.f32 %v8971_v20, %v5219_v58  ;;  %v8973_v23 = vunpack.i.l.bf16 %v5174_v61  ;;  %v8979_v61 = vld [vmem:[#allocation203_spill] sm:$0xff] }
 0x1a4   :  { %v904_v27 = vsel %vm900_vm6, %v3503_v53, %v8968_v12  ;;  %1430 = vmatmul.f32.vlgmr.msra.gmra.mxu0 %v5296_v47  ;;  %v953_v53 = vmul.f32 %v945_v25, %v5502_v57  ;;  %v8974_v12 = vunpack.i.l.bf16 %v8951_v2  ;;  %1496 = vmatpush.msrb.mxu1 %v8978_v62  ;;  %v8981_v47 = vunpack.i.h.bf16 %v4933_v19  ;;  %v8984_v62 = vld [vmem:[#allocation153_spill] sm:$0xff] }
 0x1a5   :  { %8972 = vst [vmem:[#allocation182_spill] sm:$0xff] %v5541_v39  ;;  %v943_v9 = vsel %vm941_vm7, %v3528_v60, %v8973_v23  ;;  %1525 = vmatpush.msrb.mxu3 %v8979_v61  ;;  %v862_v23 = vmul.f32 %v857_v59, %v4381_v38  ;;  %v912_v61 = vmul.f32 %v904_v27, %v4439_v54 }
 0x1a6   :  { %v816_v45 = vsel %vm8319_vm9, %v8976_v36, %v8974_v12  ;;  %v902_v25 = vsel %vm900_vm6, %v8981_v47, %v8980_v11  ;;  %v856_v12 = vsel %vm851_vm8, %v3482_v8, %v8982_v49  ;;  %1534 = vmatpush.msrb.mxu0 %v953_v53  ;;  %v994_v59 = vmul.f32 %v986_v3, %v8867_v44  ;;  %v8985_v47 = vld [vmem:[#allocation155_spill] sm:$0xff]  ;;  %v8988_v3 = vld [vmem:[#allocation130_spill] sm:$0xff] }
 0x1a7   :  { %1497 = vmatpush.msrb.mxu1 %v862_v23  ;;  %1526 = vmatpush.msrb.mxu3 %v8985_v47  ;;  %v955_v11 = vmul.f32 %v943_v9, %v5541_v39  ;;  %v821_v8 = vmul.f32 %v816_v45, %v5524_v30  ;;  %v8986_v53 = vunpack.i.l.bf16 %v5428_v32  ;;  %v863_v57 = vmul.f32 %v856_v12, %v4187_v40  ;;  %v9001_v39 = vld [vmem:[#allocation11_spill] sm:$0xff]  ;;  %v9010_v40 = vld [vmem:[#allocation4_spill] sm:$0xff] }
 0x1a8   :  { %1535 = vmatpush.msrb.mxu0 %v912_v61  ;;  %1569 = vmatpush.msrb.mxu2 %v994_v59  ;;  %v5593_v23 = vmul.f32 %v4439_v54, %v8946_v6  ;;  %v8990_v9 = vunpack.i.h.bf16 %v8951_v2  ;;  %v8991_v45 = vunpack.i.l.bf16 %v8951_v2  ;;  %v3467_v47 = vunpack.i.l.bf16 %v8984_v62  ;;  %v9084_v54 = vld [vmem:[#allocation183_spill] sm:$0xff] }
 0x1a9   :  { %v1028_v27 = vsel %vm1023_vm5, %v8987_v5, %v8986_v53  ;;  %1498 = vmatpush.msrb.mxu1 %v821_v8  ;;  %v914_v61 = vmul.f32 %v902_v25, %v4718_v7  ;;  %v8992_v59 = vunpack.i.h.bf16 %v5150_v0  ;;  %v8993_v12 = vunpack.i.l.bf16 %v5150_v0  ;;  %v8994_v5 = vld [vmem:[#allocation81_spill] sm:$0xff]  ;;  %v8997_v8 = vld [vmem:[#allocation160_spill] sm:$0xff]  ;;  %v8998_v25 = vld [vmem:[#allocation10_spill] sm:$0xff]  ;;  %3202 = vmatmul.msk.f32.vlgmr.msrb.gmra.mxu2 %vm1410_vm13, %v5377_v13 }
 0x1aa   :  { %8989 = vst [vmem:[#allocation201_spill] sm:$0xff] %v5593_v23  ;;  %v815_v34 = vsel %vm8319_vm9, %v8991_v45, %v8990_v9  ;;  %1614 = vmatpush.msra.mxu2 %v955_v11  ;;  %v5611_v49 = vmul.f32 %v8994_v5, %v8881_v14  ;;  %v8996_v9 = vunpack.i.l.bf16 %v5042_v51  ;;  %1527 = vmatpush.msrb.mxu3 %v8997_v8  ;;  %v8999_v45 = vunpack.i.h.bf16 %v8977_v29  ;;  %v9085_v30 = vld [vmem:[#allocation131_spill] sm:$0xff] }
 0x1ab   :  { %v987_v53 = vsel %vm982_vm15, %v8993_v12, %v8992_v59  ;;  %1536 = vmatpush.msrb.mxu0 %v8998_v25  ;;  %v1034_v0 = vmul.f32 %v1028_v27, %v5577_v16  ;;  %v9000_v59 = vunpack.i.l.bf16 %v8977_v29  ;;  %1499 = vmatpush.msrb.mxu1 %v5467_v21  ;;  %v9002_v51 = vunpack.i.h.bf16 %v8920_v56  ;;  %v9004_v27 = vld [vmem:[#allocation141_spill] sm:$0xff] }
 0x1ac   :  { %8995 = vst [vmem:[#allocation92_spill] sm:$0xff] %v5611_v49  ;;  %v944_v11 = vsel %vm941_vm7, %v8996_v9, %v3528_v60  ;;  %1615 = vmatpush.msra.mxu2 %v914_v61  ;;  %v9003_v60 = vunpack.i.l.bf16 %v8920_v56  ;;  %v5637_v8 = vmul.f32 %v4718_v7, %v9004_v27  ;;  %v9006_v25 = vunpack.i.h.bf16 %v8984_v62 }
 0x1ad   :  { %v854_v12 = vsel %vm851_vm8, %v9000_v59, %v8999_v45  ;;  %v9007_v59 = vld [vmem:[#allocation52_spill] sm:$0xff]  ;;  %1528 = vmatpush.msrb.mxu3 %v1034_v0  ;;  %1537 = vmatpush.msrb.mxu0 %v863_v57  ;;  %v993_v21 = vmul.f32 %v987_v53, %v4826_v26  ;;  %v822_v36 = vmul.f32 %v815_v34, %v5593_v23  ;;  %v9008_v44 = vunpack.i.h.bf16 %v4933_v19  ;;  %v9051_v26 = vld [vmem:[#allocation223_spill] sm:$0xff] }
 0x1ae   :  { %v774_v9 = vsel %vm8286_vm1, %v9003_v60, %v9002_v51  ;;  %9005 = vst [vmem:[#allocation168_spill] sm:$0xff] %v5637_v8  ;;  %v813_v45 = vsel %vm8319_vm9, %v3467_v47, %v9006_v25  ;;  %v9009_v51 = vunpack.i.l.bf16 %v4933_v19  ;;  %1616 = vmatpush.msra.mxu2 %v9010_v40  ;;  %1500 = vmatpush.msrb.mxu1 %v5470_v15  ;;  %v9011_v53 = vunpack.i.h.bf16 %v8921_v10  ;;  %v9013_v0 = vld [vmem:[#allocation72_spill] sm:$0xff] }
 0x1af   :  { %v954_v25 = vmul.f32 %v944_v11, %v5611_v49  ;;  %v865_v57 = vmul.f32 %v854_v12, %v8971_v20  ;;  %v9012_v34 = vunpack.i.l.bf16 %v8921_v10  ;;  %1529 = vmatpush.msrb.mxu3 %v993_v21  ;;  %1538 = vmatpush.msrb.mxu0 %v822_v36  ;;  %v781_v15 = vmul.f32 %v774_v9, %v8946_v6  ;;  %v9017_v40 = vld [vmem:[#allocation12_spill] sm:$0xff]  ;;  %v9024_v49 = vld [vmem:[#allocation13_spill] sm:$0xff] }
 0x1b0   :  { %v903_v60 = vsel %vm900_vm6, %v9009_v51, %v9008_v44  ;;  %v9014_v44 = vld [vmem:[#allocation82_spill] sm:$0xff]  ;;  %v9015_v11 = vunpack.i.h.bf16 %v8988_v3  ;;  %v9016_v12 = vunpack.i.l.bf16 %v8988_v3  ;;  %v824_v36 = vmul.f32 %v813_v45, %v5637_v8  ;;  %3201 = vmatmul.msk.f32.vlgmr.msrb.gmra.mxu3 %vm1410_vm13, %v5377_v13 }
 0x1b1   :  { %v733_v19 = vsel %vm8317_vm0, %v9012_v34, %v9011_v53  ;;  %v698_v51 = vmul.f32 %v9014_v44, %v5402_v42  ;;  %1574 = vmatpush.msra.mxu3 %v954_v25  ;;  %1617 = vmatpush.msra.mxu2 %v865_v57  ;;  %v9018_v53 = vld [vmem:[#allocation117_spill] sm:$0xff]  ;;  %v5678_v21 = vmul.f32 %v8971_v20, %v9004_v27  ;;  %v9023_v45 = vunpack.i.l.bf16 %v9007_v59  ;;  %v9079_v42 = vld [vmem:[#allocation196_spill] sm:$0xff] }
 0x1b2   :  { %v772_v16 = vsel %vm8286_vm1, %v9016_v12, %v9015_v11  ;;  %v913_v34 = vmul.f32 %v903_v60, %v9018_v53  ;;  %1539 = vmatpush.msrb.mxu0 %v781_v15  ;;  %v740_v44 = vmul.f32 %v733_v19, %v5458_v43  ;;  %v9020_v11 = vunpack.i.l.bf16 %v8977_v29  ;;  %v9091_v29 = vld [vmem:[#allocation216_spill] sm:$0xff] }
 0x1b3   :  { %9019 = vst [vmem:[#allocation169_spill] sm:$0xff] %v5678_v21  ;;  %1501 = vmatpush.msrb.mxu1 %v698_v51  ;;  %v9021_v12 = vunpack.i.h.bf16 %v8952_v52  ;;  %v9022_v60 = vunpack.i.h.bf16 %v9007_v59  ;;  %1618 = vmatpush.msra.mxu2 %v824_v36  ;;  %v783_v19 = vmul.f32 %v772_v16, %v9004_v27  ;;  %v9025_v51 = vld [vmem:[#allocation93_spill] sm:$0xff]  ;;  %v9027_v52 = vld [vmem:[#allocation224_spill] sm:$0xff]  ;;  %v9031_v36 = vunpack.i.h.bf16 %v9013_v0 }
 0x1b4   :  { %1575 = vmatpush.msra.mxu3 %v913_v34  ;;  %v5698_v15 = vmul.f32 %v9018_v53, %v9025_v51  ;;  %1540 = vmatpush.msrb.mxu0 %v740_v44  ;;  %v9030_v34 = vunpack.i.h.bf16 %v8951_v2  ;;  %v9035_v44 = vld [vmem:[#allocation17_spill] sm:$0xff]  ;;  %v9037_v61 = vunpack.i.l.bf16 %v8988_v3  ;;  %v9050_v8 = vunpack.i.h.bf16 %v8921_v10  ;;  %v9090_v3 = vld [vmem:[#allocation50_spill] sm:$0xff] }
 0x1b5   :  { %v855_v25 = vsel %vm851_vm8, %v9021_v12, %v9020_v11  ;;  %v731_v57 = vsel %vm8317_vm0, %v9023_v45, %v9022_v60  ;;  %v5702_v11 = vmul.f32 %v9027_v52, %v4718_v7  ;;  %v9029_v12 = vld [vmem:[#allocation31_spill] sm:$0xff]  ;;  %1502 = vmatpush.msrb.mxu1 %v5406_v33  ;;  %v699_v60 = vmul.f32 %v5343_v35, %v5425_v31  ;;  %v9075_v31 = vld [vmem:[#allocation40_spill] sm:$0xff] }
 0x1b6   :  { %9026 = vst [vmem:[#allocation149_spill] sm:$0xff] %v5698_v15  ;;  %v814_v16 = vsel %vm8319_vm9, %v9030_v34, %v3467_v47  ;;  %v9032_v45 = vunpack.i.l.bf16 %v9013_v0  ;;  %v9033_v33 = vld [vmem:[#allocation3_spill] sm:$0xff]  ;;  %1619 = vmatpush.msra.mxu2 %v783_v19  ;;  %v864_v35 = vmul.f32 %v855_v25, %v8994_v5  ;;  %v742_v2 = vmul.f32 %v731_v57, %v5678_v21 }
 0x1b7   :  { %9028 = vst [vmem:[#allocation151_spill] sm:$0xff] %v5702_v11  ;;  %1576 = vmatpush.msra.mxu3 %v9033_v33  ;;  %v5726_v47 = vmul.f32 %v9027_v52, %v8971_v20  ;;  %1503 = vmatpush.msrb.mxu1 %v5388_v46  ;;  %v9038_v19 = vunpack.i.h.bf16 %v8920_v56  ;;  %v9039_v57 = vunpack.i.h.bf16 %v8864_v17  ;;  %v9040_v33 = vunpack.i.l.bf16 %v8864_v17  ;;  %v9048_v21 = vld [vmem:[#allocation15_spill] sm:$0xff] }
 0x1b8   :  { %v5718_v9 = vsel %vm8316_vm3, %v9032_v45, %v9031_v36  ;;  %1541 = vmatpush.msrb.mxu0 %v699_v60  ;;  %v9036_v36 = vld [vmem:[#allocation55_spill] sm:$0xff]  ;;  %1620 = vmatpush.msra.mxu2 %v742_v2  ;;  %v823_v46 = vmul.f32 %v814_v16, %v5698_v15  ;;  %v9041_v56 = vunpack.i.h.bf16 %v8834_v28  ;;  %v617_v16 = vmul.f32 %v5312_v18, %v5392_v22  ;;  %v9060_v22 = vld [vmem:[#allocation98_spill] sm:$0xff] }
 0x1b9   :  { %9034 = vst [vmem:[#allocation77_spill] sm:$0xff] %v5726_v47  ;;  %v658_v45 = vmul.f32 %v9036_v36, %v5204_v48  ;;  %v773_v25 = vsel %vm8286_vm1, %v9038_v19, %v9037_v61  ;;  %v5744_v34 = vsel %vm646_vm10, %v9040_v33, %v9039_v57  ;;  %1577 = vmatpush.msra.mxu3 %v864_v35  ;;  %v9042_v36 = vunpack.i.l.bf16 %v8834_v28  ;;  %v9043_v33 = vld [vmem:[#allocation16_spill] sm:$0xff]  ;;  %v9044_v35 = vld [vmem:[#allocation61_spill] sm:$0xff] }
 0x1ba   :  { %v701_v60 = vmul.f32 %v5718_v9, %v5702_v11  ;;  %v5758_v19 = vadd.s32 768, %v3834_v37  ;;  %1504 = vmatpush.msrb.mxu1 %v9044_v35  ;;  %v5766_v2 = vmul.f32 %v8994_v5, %v9025_v51  ;;  %v9046_v11 = vunpack.i.h.bf16 %v9029_v12 }
 0x1bb   :  { %v5755_v61 = vsel %vm605_vm11, %v9042_v36, %v9041_v56  ;;  %1542 = vmatpush.msrb.mxu0 %v658_v45  ;;  %v9047_v56 = vunpack.i.l.bf16 %v9029_v12  ;;  %1578 = vmatpush.msra.mxu3 %v823_v46  ;;  %v782_v45 = vmul.f32 %v773_v25, %v9025_v51  ;;  %v660_v18 = vmul.f32 %v5744_v34, %v9027_v52  ;;  %v9056_v52 = vld [vmem:[#allocation128_spill] sm:$0xff] }
 0x1bc   :  { %9045 = vst [vmem:[#allocation203_spill] sm:$0xff] %v5766_v2  ;;  %1621 = vmatpush.msra.mxu2 %v701_v60  ;;  %v9049_v35 = vunpack.i.l.bf16 %v9007_v59  ;;  %v9053_v60 = vld [vmem:[#allocation94_spill] sm:$0xff]  ;;  %v9054_v25 = vunpack.i.h.bf16 %v9035_v44  ;;  %v9055_v57 = vunpack.i.l.bf16 %v9035_v44  ;;  %vm96_vm1 = vcmp.le.s32.totalorder %v9056_v52, 6  ;;  %v9076_v52 = vld [vmem:[#allocation103_spill] sm:$0xff] }
 0x1bd   :  { %v5774_v36 = vsel %vm564_vm12, %v9047_v56, %v9046_v11  ;;  %v5788_v11 = vmul.f32 %v5254_v50, %v9051_v26  ;;  %v9052_v56 = vld [vmem:[#allocation192_spill] sm:$0xff]  ;;  %1505 = vmatpush.msrb.mxu1 %v9053_v60  ;;  %1543 = vmatpush.msrb.mxu0 %v617_v16  ;;  %v619_v50 = vmul.f32 %v5755_v61, %v5726_v47  ;;  %v41_v60 = vand.u32 511, %v5758_v19  ;;  %v9059_v26 = vld [vmem:[#allocation21_spill] sm:$0xff]  ;;  %v9089_v59 = vld [vmem:[#allocation186_spill] sm:$0xff] }
 0x1be   :  { %v732_v15 = vsel %vm8317_vm0, %v9050_v8, %v9049_v35  ;;  %v618_v46 = vmul.f32 %v5306_v1, %v9052_v56  ;;  %v444_v10 = vsel %vm441_vm2, %v9055_v57, %v9054_v25  ;;  %1579 = vmatpush.msra.mxu3 %v782_v45  ;;  %1622 = vmatpush.msra.mxu2 %v660_v18  ;;  %v9057_v8 = vld [vmem:[#allocation215_spill] sm:$0xff]  ;;  %v9058_v35 = vld [vmem:[#allocation56_spill] sm:$0xff]  ;;  %v9061_v57 = vld [vmem:[#allocation65_spill] sm:$0xff]  ;;  %v9062_v18 = vunpack.i.h.bf16 %v9043_v33 }
 0x1bf   :  { %v578_v1 = vmul.f32 %v5774_v36, %v5362_v4  ;;  %v496_v16 = vmul.f32 %v9058_v35, %v9057_v8  ;;  %1506 = vmatpush.msrb.mxu1 %v9060_v22  ;;  %1544 = vmatpush.msrb.mxu0 %v9061_v57  ;;  %v741_v45 = vmul.f32 %v732_v15, %v5766_v2  ;;  %v9063_v25 = vunpack.i.l.bf16 %v9043_v33  ;;  %v9064_v47 = vld [vmem:[#allocation157_spill] sm:$0xff]  ;;  %v9066_v22 = vld [vmem:[#allocation219_spill] sm:$0xff] }
 0x1c0   :  { %v5819_v8 = vmul.f32 %v9025_v51, %v9064_v47  ;;  %1623 = vmatpush.msra.mxu2 %v619_v50  ;;  %v455_v19 = vmul.f32 %v444_v10, %v9066_v22  ;;  %v9067_v57 = vmov 0.0   ;;  %v9069_v56 = vld [vmem:[#allocation163_spill] sm:$0xff]  ;;  %v9073_v50 = vld [vmem:[#allocation25_spill] sm:$0xff]  ;;  %v5847_v6 = vmul.f32 %v8994_v5, %v9064_v47 }
 0x1c1   :  { %v403_v4 = vsel %vm400_vm4, %v9063_v25, %v9062_v18  ;;  %v5827_v15 = vsel %vm96_vm1, 1.0, %v9067_v57  ;;  %v5831_v2 = vmul.f32 %v9069_v56, %v8971_v20  ;;  %v9071_v18 = vunpack.i.h.bf16 %v9001_v39  ;;  %v9074_v22 = vld [vmem:[#allocation217_spill] sm:$0xff]  ;;  %1580 = vmatpush.msra.mxu3 %v741_v45  ;;  %1507 = vmatpush.msrb.mxu1 %v9076_v52 }
 0x1c2   :  { %9065 = vst [vmem:[#allocation155_spill] sm:$0xff] %v5819_v8  ;;  %v9072_v25 = vunpack.i.l.bf16 %v9001_v39  ;;  %v700_v43 = vmul.f32 %v9075_v31, %v9074_v22  ;;  %v5851_v23 = vmul.f32 %v5819_v8, %v9018_v53  ;;  %v9082_v31 = vld [vmem:[#allocation212_spill] sm:$0xff]  ;;  %1624 = vmatpush.msra.mxu2 %v578_v1  ;;  %v5866_v52 = vand.u32 63, %v41_v60  ;;  %v9088_v1 = vld [vmem:[#allocation34_spill] sm:$0xff] }
 0x1c3   :  { %9068 = vst [vmem:[#allocation160_spill] sm:$0xff] %v5827_v15  ;;  %1545 = vmatpush.msrb.mxu0 %v9082_v31  ;;  %v659_v38 = vmul.f32 %v9085_v30, %v9084_v54  ;;  %v5875_v31 = vmul.f32 %v9004_v27, %v5827_v15  ;;  %v5880_v62 = vmul.f32 %v9090_v3, %v9089_v59  ;;  %v9095_v59 = vld [vmem:[#allocation166_spill] sm:$0xff]  ;;  %v9103_v54 = vunpack.i.h.bf16 %v9013_v0  ;;  %v9109_v0 = vld [vmem:[#allocation23_spill] sm:$0xff] }
 0x1c4   :  { %9070 = vst [vmem:[#allocation11_spill] sm:$0xff] %v5831_v2  ;;  %v5839_v51 = vsel %vm359_vm14, %v9072_v25, %v9071_v18  ;;  %v5855_v18 = vmul.f32 %v5328_v41, %v9079_v42  ;;  %v9080_v25 = vld [vmem:[#allocation225_spill] sm:$0xff]  ;;  %1581 = vmatpush.msra.mxu3 %v700_v43  ;;  %v9086_v41 = vld [vmem:[#allocation162_spill] sm:$0xff]  ;;  %v414_v42 = vmul.f32 %v403_v4, %v9069_v56 }
 0x1c5   :  { %9077 = vst [vmem:[#allocation72_spill] sm:$0xff] %v5847_v6  ;;  %v5859_v48 = vmul.f32 %v9080_v25, %v9018_v53  ;;  %v5864_v45 = vmul.f32 %v9080_v25, %v8994_v5  ;;  %1508 = vmatpush.msrb.mxu1 %v9086_v41  ;;  %1546 = vmatpush.msrb.mxu0 %v9091_v29  ;;  %v9092_v41 = vld [vmem:[#allocation62_spill] sm:$0xff]  ;;  %v9093_v56 = vld [vmem:[#allocation213_spill] sm:$0xff] }
 0x1c6   :  { %9078 = vst [vmem:[#allocation82_spill] sm:$0xff] %v5851_v23  ;;  %v1164_v43 = vmul.f32 %v5744_v34, %v9080_v25  ;;  %v373_v30 = vmul.f32 %v5839_v51, %v5831_v2  ;;  %1582 = vmatpush.msra.mxu3 %v659_v38  ;;  %1625 = vmatpush.msra.mxu2 %v9093_v56  ;;  %v9096_v22 = vld [vmem:[#allocation214_spill] sm:$0xff] }
 0x1c7   :  { %9081 = vst [vmem:[#allocation12_spill] sm:$0xff] %v5859_v48  ;;  %v5893_v3 = vmul.f32 %v5219_v58, %v5827_v15  ;;  %v5897_v29 = vmul.f32 %v9058_v35, %v5847_v6  ;;  %v5900_v55 = vmul.f32 %v444_v10, %v5851_v23  ;;  %v1180_v34 = vmul.f32 %v5718_v9, %v5859_v48  ;;  %v9098_v2 = vld [vmem:[#allocation226_spill] sm:$0xff] }
 0x1c8   :  { %9083 = vst [vmem:[#allocation13_spill] sm:$0xff] %v5864_v45  ;;  %1509 = vmatpush.msrb.mxu1 %v9095_v59  ;;  %1547 = vmatpush.msrb.mxu0 %v9096_v22  ;;  %v1148_v38 = vmul.f32 %v5755_v61, %v5864_v45  ;;  %v5910_v56 = vmul.f32 %v9018_v53, %v9064_v47  ;;  %v65_v35 = vshra.s32 %v5866_v52, 3  ;;  %v73_v59 = vand.u32 7, %v5866_v52  ;;  %v9101_v22 = vld [vmem:[#allocation42_spill] sm:$0xff] }
 0x1c9   :  { %9087 = vst [vmem:[#allocation31_spill] sm:$0xff] %v5875_v31  ;;  %1510 = vmatmul.f32.vlgmr.msrb.gmra.mxu1 %v9098_v2  ;;  %1583 = vmatpush.msra.mxu3 %v618_v46  ;;  %v5916_v10 = vmul.f32 %v5893_v3, %v4718_v7  ;;  %v5920_v9 = vmul.f32 %v403_v4, %v5819_v8  ;;  %v9102_v27 = vunpack.i.l.bf16 %v9101_v22  ;;  %v5934_v23 = vshra.s32 %v41_v60, 6  ;;  %v9106_v4 = vld [vmem:[#allocation221_spill] sm:$0xff] }
 0x1ca   :  { %9094 = vst [vmem:[#allocation17_spill] sm:$0xff] %v5893_v3  ;;  %v5924_v61 = vmul.f32 %v5819_v8, %v8994_v5  ;;  %1599 = vmatpush.msra.mxu1 %v1180_v34  ;;  %1626 = vmatpush.msra.mxu2 %v496_v16  ;;  %vm5936_vm1 = vcmp.le.s32.totalorder %v65_v35, 6  ;;  %v9107_v6 = vunpack.i.l.bf16 %v9106_v4  ;;  %v9108_v8 = vunpack.i.h.bf16 %v9088_v1  ;;  %v9112_v16 = vld [vmem:[#allocation208_spill] sm:$0xff] }
 0x1cb   :  { %9097 = vst [vmem:[#allocation55_spill] sm:$0xff] %v5910_v56  ;;  %v5932_v46 = vsel %vm8316_vm3, %v9103_v54, %v9102_v27  ;;  %v3312_v5 = vunpack.i.l.bf16 %v9109_v0  ;;  %v9110_v54 = vld [vmem:[#allocation172_spill] sm:$0xff]  ;;  %v1116_v60 = vmul.f32 %v9112_v16, %v9064_v47  ;;  %v5955_v34 = vmul.f32 %v5875_v31, %v8971_v20 }
 0x1cc   :  { %9099 = vst [vmem:[#allocation16_spill] sm:$0xff] %v5916_v10  ;;  %v5946_v22 = vsel %vm982_vm15, %v9108_v8, %v9107_v6  ;;  %1548 = vmatpush.msrb.mxu0 %v9110_v54  ;;  %v9111_v27 = vld [vmem:[#allocation220_spill] sm:$0xff]  ;;  %v9114_v4 = vunpack.i.l.bf16 %v9024_v49  ;;  %v9115_v45 = vunpack.i.h.bf16 %v9001_v39  ;;  %1600 = vmatpush.msra.mxu1 %v1164_v43  ;;  %v1132_v8 = vmul.f32 %v5774_v36, %v5910_v56  ;;  %v9119_v39 = vld [vmem:[#allocation26_spill] sm:$0xff]  ;;  %v9123_v36 = vld [vmem:[#allocation205_spill] sm:$0xff] }
 0x1cd   :  { %9100 = vst [vmem:[#allocation61_spill] sm:$0xff] %v5924_v61  ;;  %1584 = vmatpush.msra.mxu3 %v9111_v27  ;;  %1627 = vmatpush.msra.mxu2 %v455_v19  ;;  %v9116_v54 = vunpack.i.l.bf16 %v9092_v41  ;;  %v9117_v27 = vunpack.i.h.bf16 %v8864_v17  ;;  %v9118_v47 = vunpack.i.l.bf16 %v9073_v50  ;;  %v9120_v25 = vunpack.i.h.bf16 %v9119_v39  ;;  %v9122_v19 = vld [vmem:[#allocation174_spill] sm:$0xff] }
 0x1ce   :  { %9113 = vst [vmem:[#allocation15_spill] sm:$0xff] %v5955_v34  ;;  %v5963_v6 = vsel %vm359_vm14, %v9115_v45, %v9114_v4  ;;  %vm9121_vm3 = vcmp.lt.s32.totalorder %v3834_v37, 64  ;;  %vm97_vm0 = vcmp.le.s32.totalorder %v5934_v23, 6  ;;  %1549 = vmatpush.msrb.mxu0 %v9122_v19  ;;  %v1181_v17 = vmul.f32 %v5932_v46, %v5916_v10  ;;  %1601 = vmatpush.msra.mxu1 %v1148_v38 }
 0x1cf   :  { %v5973_v16 = vsel %vm646_vm10, %v9117_v27, %v9116_v54  ;;  %v5981_v45 = vsel %vm9121_vm3, %v9120_v25, %v9118_v47  ;;  %1585 = vmatpush.msra.mxu3 %v9123_v36  ;;  %v5990_v43 = vmul.f32 %v5893_v3, %v8971_v20  ;;  %v5995_v4 = vsel %vm5936_vm1, 1.0, %v9067_v57  ;;  %1550 = vmatmul.f32.vlgmr.msrb.gmra.mxu0 %v9098_v2 }
 0x1d0   :  { %9125 = vst [vmem:[#allocation128_spill] sm:$0xff] %v5995_v4  ;;  %vm5997_vm3 = vcmp.ge.s32.totalorder %v73_v59, 1  ;;  %v9128_v25 = vunpack.i.l.bf16 %v8890_v24  ;;  %v9129_v54 = vunpack.i.h.bf16 %v8834_v28  ;;  %v6012_v52 = vmul.f32 %v4718_v7, %v5827_v15  ;;  %1628 = vmatpush.msra.mxu2 %v414_v42  ;;  %1639 = vmatpush.msra.mxu0 %v1181_v17  ;;  %v9140_v17 = vld [vmem:[#allocation14_spill] sm:$0xff] }
 0x1d1   :  { %9124 = vst [vmem:[#allocation94_spill] sm:$0xff] %v5990_v43  ;;  %v9131_v39 = vunpack.i.l.bf16 %v9059_v26  ;;  %v9132_v19 = vunpack.i.h.bf16 %v9029_v12  ;;  %vm6022_vm1 = vcmp.le.s32.totalorder %v73_v59, 6  ;;  %v1165_v28 = vmul.f32 %v5973_v16, %v5893_v3  ;;  %1602 = vmatpush.msra.mxu1 %v1132_v8 }
 0x1d2   :  { %v6008_v27 = vsel %vm605_vm11, %v9129_v54, %v9128_v25  ;;  %9130 = vst [vmem:[#allocation56_spill] sm:$0xff] %v6012_v52  ;;  %v6031_v25 = vsel %vm97_vm0, 1.0, %v9067_v57  ;;  %v6035_v12 = vmul.f32 %v8971_v20, %v5827_v15  ;;  %v6039_v59 = vmul.f32 %v5875_v31, %v4718_v7  ;;  %v9138_v54 = vld [vmem:[#allocation198_spill] sm:$0xff]  ;;  %1629 = vmatpush.msra.mxu2 %v373_v30 }
 0x1d3   :  { %v6020_v36 = vsel %vm564_vm12, %v9132_v19, %v9131_v39  ;;  %9135 = vst [vmem:[#allocation21_spill] sm:$0xff] %v6031_v25  ;;  %1586 = vmatpush.msra.mxu3 %v9138_v54  ;;  %v6044_v42 = vmul.f32 %v5995_v4, %v6031_v25  ;;  %v9141_v39 = vunpack.i.h.bf16 %v9140_v17  ;;  %vm9142_vm0 = vcmp.lt.s32.totalorder %v3834_v37, 65  ;;  %1640 = vmatpush.msra.mxu0 %v1165_v28  ;;  %v1734_v54 = vld [vmem:[%s7972_s3] sm:$0xff] }
 0x1d4   :  { %9136 = vst [vmem:[#allocation98_spill] sm:$0xff] %v6035_v12  ;;  %v6055_v3 = vsel %vm5997_vm3, 1.0, %v9067_v57  ;;  %vm6057_vm9 = vcmp.ge.s32.totalorder %v65_v35, 1  ;;  %v1149_v8 = vmul.f32 %v6008_v27, %v5990_v43  ;;  %v6069_v17 = vsel %vm6022_vm1, 1.0, %v9067_v57  ;;  %1719 = vmatpush.msrb.mxu2 %v5788_v11  ;;  %vm9155_vm3 = vmmov %vm9142_vm0  ;;  %1603 = vmatpush.msra.mxu1 %v1116_v60 }
 0x1d5   :  { %9137 = vst [vmem:[#allocation65_spill] sm:$0xff] %v6039_v59  ;;  %v6050_v19 = vsel %vm9142_vm0, %v9141_v39, %v3312_v5  ;;  %v9147_v47 = vunpack.i.l.bf16 %v9017_v40  ;;  %v9148_v35 = vunpack.i.h.bf16 %v9035_v44  ;;  %v6081_v28 = vmul.f32 %v6055_v3, %v6031_v25  ;;  %v9150_v39 = vld [vmem:[#allocation181_spill] sm:$0xff]  ;;  %1737 = vperm.xlu2 %3574, %v1734_v54   ;;  %1630 = vmatmul.f32.vlgmr.msra.gmra.mxu2 %v9098_v2 }
 0x1d6   :  { %9139 = vst [vmem:[#allocation25_spill] sm:$0xff] %v6044_v42  ;;  %1587 = vmatpush.msra.mxu3 %v9150_v39  ;;  %v6087_v38 = vmul.f32 %v6044_v42, %v6069_v17  ;;  %v9152_v43 = vunpack.i.l.bf16 %v9048_v21  ;;  %v9153_v44 = vunpack.i.h.bf16 %v9043_v33  ;;  %1641 = vmatpush.msra.mxu0 %v1149_v8  ;;  %v1133_v11 = vmul.f32 %v6020_v36, %v6012_v52  ;;  %v9158_v8 = vld [vmem:[#allocation66_spill] sm:$0xff] }
 0x1d7   :  { %9143 = vst [vmem:[#allocation40_spill] sm:$0xff] %v6055_v3  ;;  %v6077_v30 = vsel %vm441_vm2, %v9148_v35, %v9147_v47  ;;  %v9154_v35 = vunpack.i.h.bf16 %v9109_v0  ;;  %v1117_v39 = vmul.f32 %v5981_v45, %v5827_v15  ;;  %v1052_v33 = vmul.f32 %v5839_v51, %v5924_v61  ;;  %1720 = vmatpush.msrb.mxu2 %v5880_v62 }
 0x1d8   :  { %9146 = vst [vmem:[#allocation103_spill] sm:$0xff] %v6069_v17  ;;  %v6095_v47 = vsel %vm400_vm4, %v9153_v44, %v9152_v43  ;;  %v6112_v43 = vsel %vm6057_vm9, 1.0, %v9067_v57  ;;  %v1085_v0 = vmul.f32 %v6077_v30, %v6039_v59  ;;  %v3568_v51 = vunpack.i.h.bf16 %v9158_v8  ;;  %v9159_v44 = vld [vmem:[#allocation165_spill] sm:$0xff]  ;;  %1604 = vmatpush.msra.mxu1 %v5897_v29  ;;  %1642 = vmatpush.msra.mxu0 %v1133_v11  ;;  %v9164_v11 = vld [vmem:[#allocation148_spill] sm:$0xff] }
 0x1d9   :  { %9149 = vst [vmem:[#allocation212_spill] sm:$0xff] %v6081_v28  ;;  %v6101_v10 = vsel %vm9155_vm3, %v3312_v5, %v9154_v35  ;;  %v1101_v5 = vmul.f32 %v6050_v19, %v6035_v12  ;;  %v6121_v60 = vmul.f32 %v6112_v43, %v6031_v25  ;;  %1588 = vmatpush.msra.mxu3 %v9159_v44  ;;  %v9160_v35 = vld [vmem:[#allocation136_spill] sm:$0xff]  ;;  %v9161_v44 = vunpack.i.h.bf16 %v9092_v41 }
 0x1da   :  { %9151 = vst [vmem:[#allocation131_spill] sm:$0xff] %v6087_v38  ;;  %v1069_v62 = vmul.f32 %v6095_v47, %v5875_v31  ;;  %v6130_v20 = vmul.f32 %v5963_v6, %v5955_v34  ;;  %v6134_v54 = vmul.f32 %v6101_v10, %v6081_v28  ;;  %1721 = vmatpush.msrb.mxu2 %v5855_v18  ;;  %v9162_v29 = vunpack.i.l.bf16 %v9092_v41  ;;  %v6151_v28 = vpop.permute.xlu1 %3570 }
 0x1db   :  { %9156 = vst [vmem:[#allocation162_spill] sm:$0xff] %v6112_v43  ;;  %v1182_v59 = vmul.f32 %v9160_v35, %v6087_v38  ;;  %v6149_v34 = vmul.f32 %v6121_v60, %v6069_v17  ;;  %1589 = vmatpush.msra.mxu3 %v9164_v11  ;;  %1605 = vmatpush.msra.mxu1 %v5900_v55  ;;  %v9166_v41 = vunpack.i.h.bf16 %v9017_v40  ;;  %v9167_v38 = vunpack.i.l.bf16 %v9017_v40 }
 0x1dc   :  { %9157 = vst [vmem:[#allocation34_spill] sm:$0xff] %v6121_v60  ;;  %v6145_v31 = vsel %vm646_vm10, %v9162_v29, %v9161_v44  ;;  %v6157_v18 = vmul.f32 %v6044_v42, %v6055_v3  ;;  %v9168_v29 = vunpack.i.h.bf16 %v9048_v21  ;;  %v9169_v12 = vunpack.i.l.bf16 %v9048_v21  ;;  %1643 = vmatpush.msra.mxu0 %v1117_v39  ;;  %1590 = vmatmul.f32.vlgmr.msra.gmra.mxu3 %v9098_v2 }
 0x1dd   :  { %9163 = vst [vmem:[#allocation50_spill] sm:$0xff] %v6149_v34  ;;  %v6165_v44 = vsel %vm441_vm2, %v9167_v38, %v9166_v41  ;;  %1679 = vmatpush.msrb.mxu3 %v1182_v59  ;;  %v9170_v55 = vunpack.i.h.bf16 %v8890_v24  ;;  %v9171_v15 = vunpack.i.l.bf16 %v8890_v24  ;;  %v6185_v38 = vmul.f32 %v9018_v53, %v8881_v14  ;;  %v9175_v59 = vld [vmem:[#allocation85_spill] sm:$0xff]  ;;  %1606 = vmatpush.msra.mxu1 %v5920_v9 }
 0x1de   :  { %9165 = vst [vmem:[#allocation216_spill] sm:$0xff] %v6157_v18  ;;  %v6173_v11 = vsel %vm400_vm4, %v9169_v12, %v9168_v29  ;;  %v9173_v21 = vunpack.i.h.bf16 %v9024_v49  ;;  %v9174_v41 = vunpack.i.l.bf16 %v9024_v49  ;;  %v3548_v39 = vunpack.i.h.bf16 %v9175_v59  ;;  %v9176_v29 = vld [vmem:[#allocation197_spill] sm:$0xff]  ;;  %1644 = vmatpush.msra.mxu0 %v1101_v5  ;;  %v9182_v5 = vld [vmem:[#allocation207_spill] sm:$0xff] }
 0x1df   :  { %v6181_v40 = vsel %vm605_vm11, %v9171_v15, %v9170_v55  ;;  %9172 = vst [vmem:[#allocation62_spill] sm:$0xff] %v6185_v38  ;;  %1722 = vmatpush.msrb.mxu2 %v9176_v29  ;;  %v1166_v24 = vmul.f32 %v6145_v31, %v6044_v42  ;;  %v9177_v15 = vunpack.i.h.bf16 %v5428_v32  ;;  %v6206_v49 = vmul.f32 %v6069_v17, %v6031_v25 }
 0x1e0   :  { %v6193_v12 = vsel %vm359_vm14, %v9174_v41, %v9173_v21  ;;  %v9179_v41 = vunpack.i.h.bf16 %v9059_v26  ;;  %v9180_v9 = vunpack.i.l.bf16 %v9059_v26  ;;  %v6220_v32 = vmul.f32 %v6165_v44, %v6149_v34  ;;  %1607 = vmatpush.msra.mxu1 %v1052_v33  ;;  %1645 = vmatpush.msra.mxu0 %v1085_v0  ;;  %v9190_v0 = vld [vmem:[#allocation202_spill] sm:$0xff] }
 0x1e1   :  { %v1026_v55 = vsel %vm1023_vm5, %v9177_v15, %v3568_v51  ;;  %9178 = vst [vmem:[#allocation213_spill] sm:$0xff] %v6206_v49  ;;  %vm81_vm9 = vcmp.ge.s32.totalorder %v5934_v23, 1  ;;  %v9181_v15 = vld [vmem:[#allocation108_spill] sm:$0xff]  ;;  %1680 = vmatpush.msrb.mxu3 %v1166_v24  ;;  %1723 = vmatpush.msrb.mxu2 %v9182_v5  ;;  %v1150_v21 = vmul.f32 %v6181_v40, %v6157_v18  ;;  %v9183_v26 = vunpack.i.l.bf16 %v9175_v59 }
 0x1e2   :  { %v6216_v29 = vsel %vm564_vm12, %v9180_v9, %v9179_v41  ;;  %v3533_v42 = vunpack.i.h.bf16 %v9181_v15  ;;  %v6233_v9 = vmul.f32 %v6121_v60, %v6055_v3  ;;  %v1036_v24 = vmul.f32 %v1026_v55, %v6185_v38  ;;  %1646 = vmatpush.msra.mxu0 %v1069_v62  ;;  %v9203_v23 = vld [vmem:[#allocation32_spill] sm:$0xff] }
 0x1e3   :  { %v985_v41 = vsel %vm982_vm15, %v9183_v26, %v3548_v39  ;;  %v6239_v5 = vmul.f32 %v6055_v3, %v5995_v4  ;;  %v9186_v18 = vunpack.i.h.bf16 %v9073_v50  ;;  %v9187_v59 = vunpack.i.l.bf16 %v9073_v50  ;;  %1681 = vmatpush.msrb.mxu3 %v1150_v21  ;;  %1724 = vmatpush.msrb.mxu2 %v9190_v0  ;;  %v9193_v21 = vld [vmem:[#allocation191_spill] sm:$0xff] }
 0x1e4   :  { %9184 = vst [vmem:[#allocation166_spill] sm:$0xff] %v6233_v9  ;;  %vm9188_vm1 = vcmp.lt.s32.totalorder %v3834_v37, 64  ;;  %v3513_v52 = vunpack.i.h.bf16 %v8959_v63  ;;  %v9189_v34 = vunpack.i.l.bf16 %v9181_v15  ;;  %v1134_v55 = vmul.f32 %v6216_v29, %v6206_v49  ;;  %1608 = vmatpush.msra.mxu1 %v1036_v24  ;;  %1647 = vmatpush.msra.mxu0 %v6130_v20 }
 0x1e5   :  { %9185 = vst [vmem:[#allocation214_spill] sm:$0xff] %v6239_v5  ;;  %v6247_v26 = vsel %vm9188_vm1, %v9187_v59, %v9186_v18  ;;  %v6259_v50 = vmul.f32 %v4718_v7, %v5219_v58  ;;  %v995_v18 = vmul.f32 %v985_v41, %v8881_v14  ;;  %v9192_v59 = vunpack.i.l.bf16 %v6151_v28  ;;  %v9195_v14 = vld [vmem:[#allocation140_spill] sm:$0xff]  ;;  %v9208_v7 = vld [vmem:[#allocation170_spill] sm:$0xff] }
 0x1e6   :  { %v942_v33 = vsel %vm941_vm7, %v9189_v34, %v3533_v42  ;;  %v1070_v34 = vmul.f32 %v6173_v11, %v6121_v60  ;;  %v3492_v0 = vunpack.i.l.bf16 %v9193_v21  ;;  %v3573_v49 = vunpack.i.h.bf16 %v6151_v28  ;;  %1682 = vmatpush.msrb.mxu3 %v1134_v55  ;;  %1725 = vmatpush.msrb.mxu2 %v9195_v14  ;;  %v9198_v55 = vld [vmem:[#allocation95_spill] sm:$0xff] }
 0x1e7   :  { %9191 = vst [vmem:[#allocation226_spill] sm:$0xff] %v6259_v50  ;;  %v1025_v15 = vsel %vm1023_vm5, %v3568_v51, %v9192_v59  ;;  %v9194_v24 = vunpack.i.l.bf16 %v8959_v63  ;;  %v1054_v41 = vmul.f32 %v6193_v12, %v6233_v9  ;;  %1609 = vmatpush.msra.mxu1 %v995_v18  ;;  %v956_v51 = vmul.f32 %v942_v33, %v6239_v5  ;;  %v9199_v33 = vld [vmem:[#allocation19_spill] sm:$0xff]  ;;  %v9200_v18 = vld [vmem:[#allocation88_spill] sm:$0xff]  ;;  %v9205_v5 = vld [vmem:[#allocation118_spill] sm:$0xff] }
 0x1e8   :  { %v1118_v59 = vmul.f32 %v6247_v26, %v6031_v25  ;;  %v9196_v60 = vunpack.i.l.bf16 %v9088_v1  ;;  %v6288_v63 = vsel %vm81_vm9, 1.0, %v9067_v57  ;;  %3203 = vmatmul.msk.f32.vlgmr.msra.gmra.mxu1 %vm1410_vm13, %v5377_v13  ;;  %v1037_v14 = vmul.f32 %v1025_v15, %v6259_v50  ;;  %v9207_v50 = vld [vmem:[#allocation129_spill] sm:$0xff]  ;;  %1726 = vmatpush.msrb.mxu2 %v9208_v7 }
 0x1e9   :  { %v901_v62 = vsel %vm900_vm6, %v9194_v24, %v3513_v52  ;;  %9197 = vst [vmem:[#allocation42_spill] sm:$0xff] %v6288_v63  ;;  %v3472_v24 = vunpack.i.l.bf16 %v9198_v55  ;;  %v6297_v9 = vmul.f32 %v9200_v18, %v9199_v33  ;;  %1654 = vmatpush.msrb.mxu1 %v956_v51  ;;  %v6310_v15 = vmul.f32 %v9205_v5, %v9199_v33  ;;  %v9210_v51 = vld [vmem:[#allocation113_spill] sm:$0xff] }
 0x1ea   :  { %v984_v2 = vsel %vm982_vm15, %v3548_v39, %v9196_v60  ;;  %v6301_v60 = vmul.f32 %v5995_v4, %v6288_v63  ;;  %v9204_v39 = vunpack.i.l.bf16 %v9203_v23  ;;  %1683 = vmatpush.msrb.mxu3 %v1118_v59  ;;  %v915_v20 = vmul.f32 %v901_v62, %v6069_v17  ;;  %1648 = vmatpush.msra.mxu0 %v1037_v14  ;;  %v9216_v14 = vld [vmem:[#allocation110_spill] sm:$0xff] }
 0x1eb   :  { %9201 = vst [vmem:[#allocation221_spill] sm:$0xff] %v6297_v9  ;;  %v3452_v38 = vunpack.i.l.bf16 %v9207_v50  ;;  %v996_v61 = vmul.f32 %v984_v2, %v5219_v58  ;;  %v9209_v23 = vunpack.i.l.bf16 %v9158_v8  ;;  %v9211_v59 = vunpack.i.h.bf16 %v9210_v51  ;;  %v9217_v51 = vld [vmem:[#allocation152_spill] sm:$0xff] }
 0x1ec   :  { %9202 = vst [vmem:[#allocation23_spill] sm:$0xff] %v6301_v60  ;;  %v949_v25 = vsel %vm941_vm7, %v3533_v42, %v9204_v39  ;;  %1655 = vmatpush.msrb.mxu1 %v915_v20  ;;  %1684 = vmatpush.msrb.mxu3 %v6134_v54  ;;  %v9212_v39 = vld [vmem:[#allocation190_spill] sm:$0xff]  ;;  %v6330_v2 = vmul.f32 %v6069_v17, %v6112_v43  ;;  %v9218_v20 = vld [vmem:[#allocation153_spill] sm:$0xff]  ;;  %vm9220_vm0 = vcmp.lt.s32.totalorder %v3834_v37, 7  ;;  %vm9226_vm3 = vcmp.lt.s32.totalorder %v3834_v37, 8 }
 0x1ed   :  { %9206 = vst [vmem:[#allocation172_spill] sm:$0xff] %v6310_v15  ;;  %v1031_v42 = vsel %vm1023_vm5, %v3573_v49, %v9209_v23  ;;  %v853_v62 = vsel %vm851_vm8, %v9211_v59, %v3492_v0  ;;  %v9213_v56 = vunpack.i.l.bf16 %v9212_v39  ;;  %v6334_v8 = vmul.f32 %v6301_v60, %v6069_v17  ;;  %1727 = vmatpush.msrb.mxu2 %v9217_v51  ;;  %v9222_v39 = vld [vmem:[#allocation7_spill] sm:$0xff] }
 0x1ee   :  { %9214 = vst [vmem:[#allocation220_spill] sm:$0xff] %v6330_v2  ;;  %v3432_v23 = vunpack.i.l.bf16 %v9216_v14  ;;  %1649 = vmatpush.msra.mxu0 %v996_v61  ;;  %v957_v54 = vmul.f32 %v949_v25, %v6297_v9  ;;  %v9219_v59 = vunpack.i.h.bf16 %v9218_v20  ;;  %1656 = vmatpush.msrb.mxu1 %v9222_v39  ;;  %v1039_v58 = vmul.f32 %v1031_v42, %v6310_v15 }
 0x1ef   :  { %v908_v7 = vsel %vm900_vm6, %v3513_v52, %v9213_v56  ;;  %9215 = vst [vmem:[#allocation208_spill] sm:$0xff] %v6334_v8  ;;  %v6345_v52 = vmul.f32 %v6069_v17, %v5995_v4  ;;  %3204 = vmatmul.msk.f32.vlgmr.msra.gmra.mxu0 %vm1410_vm13, %v5377_v13  ;;  %v866_v61 = vmul.f32 %v853_v62, %v6055_v3  ;;  %v9223_v25 = vunpack.i.l.bf16 %v6151_v28 }
 0x1f0   :  { %v812_v56 = vsel %vm9220_vm0, %v9219_v59, %v3472_v24  ;;  %1685 = vmatpush.msrb.mxu3 %v6220_v32  ;;  %1694 = vmatpush.msrb.mxu0 %v957_v54  ;;  %v916_v20 = vmul.f32 %v908_v7, %v9205_v5  ;;  %v9224_v59 = vld [vmem:[#allocation130_spill] sm:$0xff]  ;;  %v6364_v42 = vmul.f32 %v6055_v3, %v6112_v43  ;;  %v9228_v32 = vunpack.i.h.bf16 %v9193_v21  ;;  %v9229_v7 = vld [vmem:[#allocation59_spill] sm:$0xff]  ;;  %v9230_v54 = vld [vmem:[#allocation52_spill] sm:$0xff] }
 0x1f1   :  { %9221 = vst [vmem:[#allocation26_spill] sm:$0xff] %v6345_v52  ;;  %v1024_v51 = vsel %vm1023_vm5, %v9223_v25, %v3573_v49  ;;  %v9225_v9 = vunpack.i.h.bf16 %v9224_v59  ;;  %1728 = vmatpush.msrb.mxu2 %v1039_v58  ;;  %1657 = vmatpush.msrb.mxu1 %v866_v61  ;;  %v998_v28 = vmul.f32 %v5946_v22, %v9199_v33  ;;  %vm82_vm9 = vcmp.ge.s32.totalorder %v9229_v7, 1  ;;  %v9233_v61 = vld [vmem:[#allocation104_spill] sm:$0xff] }
 0x1f2   :  { %9227 = vst [vmem:[#allocation174_spill] sm:$0xff] %v6364_v42  ;;  %v825_v49 = vmul.f32 %v812_v56, %v6330_v2  ;;  %v852_v62 = vsel %vm851_vm8, %v3492_v0, %v9228_v32  ;;  %1686 = vmatpush.msrb.mxu3 %v1070_v34  ;;  %1695 = vmatpush.msrb.mxu0 %v916_v20  ;;  %v9231_v25 = vunpack.i.h.bf16 %v9230_v54  ;;  %vm9232_vm1 = vcmp.lt.s32.totalorder %v3834_v37, 9  ;;  %v9238_v59 = vld [vmem:[#allocation8_spill] sm:$0xff] }
 0x1f3   :  { %v771_v53 = vsel %vm9226_vm3, %v9225_v9, %v3452_v38  ;;  %v1038_v9 = vmul.f32 %v1024_v51, %v6345_v52  ;;  %v6381_v22 = vmul.f32 %v9205_v5, %v9233_v61  ;;  %1729 = vmatpush.msrb.mxu2 %v998_v28  ;;  %v9235_v0 = vunpack.i.h.bf16 %v9088_v1 }
 0x1f4   :  { %v730_v58 = vsel %vm9232_vm1, %v9231_v25, %v3432_v23  ;;  %1658 = vmatpush.msrb.mxu1 %v825_v49  ;;  %v784_v21 = vmul.f32 %v771_v53, %v6112_v43  ;;  %v9236_v34 = vunpack.i.l.bf16 %v9088_v1  ;;  %v9237_v51 = vunpack.i.h.bf16 %v9198_v55  ;;  %1687 = vmatpush.msrb.mxu3 %v1054_v41 }
 0x1f5   :  { %9234 = vst [vmem:[#allocation205_spill] sm:$0xff] %v6381_v22  ;;  %1696 = vmatpush.msrb.mxu0 %v9238_v59  ;;  %v867_v28 = vmul.f32 %v852_v62, %v9200_v18  ;;  %v6397_v49 = vsel %vm82_vm9, 1.0, %v9067_v57  ;;  %v743_v53 = vmul.f32 %v730_v58, %v6364_v42  ;;  %v9240_v1 = vunpack.i.h.bf16 %v9207_v50  ;;  %3206 = vmatmul.msk.f32.vlgmr.msrb.gmra.mxu2 %vm1410_vm13, %v5377_v13  ;;  %vm9244_vm9 = vmmov %vm9232_vm1 }
 0x1f6   :  { %v983_v56 = vsel %vm982_vm15, %v9236_v34, %v9235_v0  ;;  %v811_v20 = vsel %vm9220_vm0, %v3472_v24, %v9237_v51  ;;  %9239 = vst [vmem:[#allocation198_spill] sm:$0xff] %v6397_v49  ;;  %1659 = vmatpush.msrb.mxu1 %v784_v21  ;;  %v6406_v55 = vmul.f32 %v9199_v33, %v6397_v49  ;;  %v9243_v50 = vunpack.i.h.bf16 %v9216_v14 }
 0x1f7   :  { %v770_v32 = vsel %vm9226_vm3, %v3452_v38, %v9240_v1  ;;  %1688 = vmatpush.msrb.mxu3 %v1038_v9  ;;  %1697 = vmatpush.msrb.mxu0 %v867_v28  ;;  %v997_v57 = vmul.f32 %v983_v56, %v5995_v4  ;;  %v826_v41 = vmul.f32 %v811_v20, %v6381_v22  ;;  %v9246_v9 = vmov 0  }
 0x1f8   :  { %9241 = vst [vmem:[#allocation14_spill] sm:$0xff] %v6406_v55  ;;  %v6414_v24 = vmul.f32 %v9200_v18, %v9233_v61  ;;  %1660 = vmatpush.msrb.mxu1 %v743_v53  ;;  %v702_v38 = vmul.f32 %v5932_v46, %v6334_v8  ;;  %v729_v62 = vsel %vm9244_vm9, %v3432_v23, %v9243_v50  ;;  %vm9264_vm1 = vcmp.lt.s32.totalorder %v3834_v37, 64 }
 0x1f9   :  { %v6424_v7 = vmul.f32 %v6301_v60, %v6055_v3  ;;  %3576 = vset.pattern.permute.xlu1 %v9246_v9  ;;  %1689 = vmatpush.msrb.mxu3 %v997_v57  ;;  %v785_v54 = vmul.f32 %v770_v32, %v9233_v61  ;;  %v6430_v25 = vmul.f32 %v6406_v55, %v9205_v5  ;;  %vm9265_vm0 = vcmp.lt.s32.totalorder %v3834_v37, 65  ;;  %vm9269_vm9 = vmmov %vm9264_vm1 }
 0x1fa   :  { %9242 = vst [vmem:[#allocation181_spill] sm:$0xff] %v6414_v24  ;;  %1698 = vmatpush.msrb.mxu0 %v826_v41  ;;  %1661 = vmatpush.msrb.mxu1 %v702_v38  ;;  %v661_v46 = vmul.f32 %v5973_v16, %v6301_v60  ;;  %v6436_v14 = vmul.f32 %v6069_v17, %v6288_v63  ;;  %vm9266_vm3 = vmmov %vm9265_vm0 }
 0x1fb   :  { %9245 = vst [vmem:[#allocation66_spill] sm:$0xff] %v6424_v7  ;;  %3205 = vmatmul.msk.f32.vlgmr.msrb.gmra.mxu3 %vm1410_vm13, %v5377_v13  ;;  %v744_v23 = vmul.f32 %v729_v62, %v6414_v24  ;;  %v620_v58 = vmul.f32 %v6008_v27, %v6424_v7  ;;  %v703_v21 = vmul.f32 %v9160_v35, %v6430_v25 }
 0x1fc   :  { %9247 = vst [vmem:[#allocation165_spill] sm:$0xff] %v6430_v25  ;;  %1699 = vmatpush.msrb.mxu0 %v785_v54  ;;  %1662 = vmatpush.msrb.mxu1 %v661_v46  ;;  %v6447_v16 = vmul.f32 %v6406_v55, %v9200_v18  ;;  %v579_v0 = vmul.f32 %v6020_v36, %v6436_v14 }
 0x1fd   :  { %9248 = vst [vmem:[#allocation136_spill] sm:$0xff] %v6436_v14  ;;  %v6453_v13 = vmul.f32 %v6055_v3, %v6288_v63  ;;  %v6457_v34 = vmul.f32 %v6112_v43, %v6288_v63  ;;  %v662_v27 = vmul.f32 %v6145_v31, %v6406_v55  ;;  %v6463_v35 = vmul.f32 %v9205_v5, %v6397_v49 }
 0x1fe   :  { %1700 = vmatpush.msrb.mxu0 %v744_v23  ;;  %9249 = vst [vmem:[#allocation148_spill] sm:$0xff] %v6447_v16  ;;  %1663 = vmatpush.msrb.mxu1 %v620_v58  ;;  %v538_v36 = vmul.f32 %v5981_v45, %v6288_v63  ;;  %v621_v51 = vmul.f32 %v6181_v40, %v6447_v16 }
 0x1ff   :  { %9250 = vst [vmem:[#allocation85_spill] sm:$0xff] %v6453_v13  ;;  %v6469_v56 = vmul.f32 %v6457_v34, %v6069_v17  ;;  %v497_v31 = vmul.f32 %v6050_v19, %v6453_v13  ;;  %v580_v20 = vmul.f32 %v6216_v29, %v6463_v35  ;;  %v6479_v28 = vmul.f32 %v9200_v18, %v6397_v49 }
 0x200   :  { %9251 = vst [vmem:[#allocation197_spill] sm:$0xff] %v6457_v34  ;;  %1701 = vmatpush.msrb.mxu0 %v703_v21  ;;  %1664 = vmatpush.msrb.mxu1 %v579_v0  ;;  %v6483_v45 = vmul.f32 %v9233_v61, %v6397_v49  ;;  %v6489_v53 = vmul.f32 %v6457_v34, %v6055_v3 }
 0x201   :  { %9252 = vst [vmem:[#allocation108_spill] sm:$0xff] %v6463_v35  ;;  %v456_v40 = vmul.f32 %v6077_v30, %v6469_v56  ;;  %v539_v19 = vmul.f32 %v6247_v26, %v6397_v49  ;;  %v415_v1 = vmul.f32 %v6095_v47, %v6457_v34  ;;  %v498_v30 = vmul.f32 %v6101_v10, %v6479_v28  ;;  %v3577_v47 = vld [vmem:[%s7970_s1] sm:$0xff] }
 0x202   :  { %9253 = vst [vmem:[#allocation207_spill] sm:$0xff] %v6469_v56  ;;  %1702 = vmatpush.msrb.mxu0 %v662_v27  ;;  %1665 = vmatpush.msrb.mxu1 %v538_v36  ;;  %v6495_v29 = vmul.f32 %v6483_v45, %v9205_v5  ;;  %v374_v32 = vmul.f32 %v5963_v6, %v6489_v53 }
 0x203   :  { %9254 = vst [vmem:[#allocation202_spill] sm:$0xff] %v6479_v28  ;;  %v6507_v57 = vmul.f32 %v6483_v45, %v9200_v18  ;;  %v416_v10 = vmul.f32 %v6173_v11, %v6483_v45  ;;  %v6518_v62 = vpop.permute.xlu0 %1751 }
 0x204   :  { %1703 = vmatpush.msrb.mxu0 %v621_v51  ;;  %9255 = vst [vmem:[#allocation191_spill] sm:$0xff] %v6483_v45  ;;  %1666 = vmatpush.msrb.mxu1 %v497_v31  ;;  %v457_v26 = vmul.f32 %v6165_v44, %v6495_v29 }
 0x205   :  { %9256 = vst [vmem:[#allocation140_spill] sm:$0xff] %v6489_v53  ;;  %v375_v6 = vmul.f32 %v6193_v12, %v6507_v57 }
 0x206   :  { %1704 = vmatpush.msrb.mxu0 %v580_v20  ;;  %9257 = vst [vmem:[#allocation95_spill] sm:$0xff] %v6495_v29  ;;  %1667 = vmatpush.msrb.mxu1 %v456_v40 }
 0x207   :  { %9258 = vst [vmem:[#allocation32_spill] sm:$0xff] %v6507_v57 }
 0x208   :  { %1705 = vmatpush.msrb.mxu0 %v539_v19  ;;  %1668 = vmatpush.msrb.mxu1 %v415_v1 }
 0x20a   :  { %1706 = vmatpush.msrb.mxu0 %v498_v30  ;;  %1669 = vmatpush.msrb.mxu1 %v374_v32 }
 0x20b   :  { %1670 = vmatmul.f32.vlgmr.msrb.gmra.mxu1 %v3577_v47 }
 0x20c   :  { %1707 = vmatpush.msrb.mxu0 %v457_v26 }
 0x20e   :  { %1708 = vmatpush.msrb.mxu0 %v416_v10  ;;  %v1471_v36 = vpop.f32.mrf.mxu2 }
 0x210   :  { %1709 = vmatpush.msrb.mxu0 %v375_v6 }
 0x211   :  { %1710 = vmatmul.f32.vlgmr.msrb.gmra.mxu0 %v3577_v47 }
 0x219   :  { %v1491_v11 = vpop.f32.mrf.mxu3 }
 0x21a   :  { %v1492_v51 = vadd.f32 %v1491_v11, %v1471_v36 }
 0x21e   :  { %v1451_v41 = vpop.f32.mrf.mxu1 }
 0x221   :  { %v1431_v44 = vpop.f32.mrf.mxu0 }
 0x222   :  { %v1452_v38 = vadd.f32 %v1451_v41, %v1431_v44 }
 0x22c   :  { %v1571_v1 = vpop.f32.mrf.mxu2 }
 0x22f   :  { %v6516_v50 = vpop.permute.xlu2 %1737 }
 0x230   :  { %v1740_v9 = vmul.f32 %v6516_v50, %v1452_v38  ;;  %v1741_v31 = vmul.f32 %v6516_v50, %v1492_v51 }
 0x232   :  { %v1754_v54 = vadd.f32 %v6518_v62, %v1740_v9  ;;  %v1755_v20 = vadd.f32 %v6518_v62, %v1741_v31 }
 0x233   :  { %v1531_v12 = vpop.f32.mrf.mxu3 }
 0x234   :  { %v6522_v46 = vmax.f32 %v1754_v54, 0.0  ;;  %v6556_v40 = vmax.f32 %v1755_v20, 0.0 }
 0x236   :  { %1890 = vrot.lane.b32.xlu2 %v6522_v46, %s3581_s11  ;;  %1850 = vrot.lane.b32.xlu0 %v6522_v46, %s3580_s10 }
 0x237   :  { %1770 = vrot.lane.b32.xlu1 %v6522_v46, %s3578_s9 }
 0x23e   :  { %2010 = vrot.lane.b32.xlu2 %v6522_v46, %s3584_s14  ;;  %1970 = vrot.lane.b32.xlu0 %v6522_v46, %s3583_s13 }
 0x23f   :  { %1810 = vrot.lane.b32.xlu1 %v6522_v46, %s3579_s0 }
 0x246   :  { %v1511_v23 = vpop.f32.mrf.mxu1 }
 0x247   :  { %1930 = vrot.lane.b32.xlu1 %v6522_v46, %s3582_s12  ;;  %v1532_v58 = vadd.f32 %v1531_v12, %v1511_v23 }
 0x249   :  { %v1742_v21 = vmul.f32 %v6516_v50, %v1532_v58 }
 0x24b   :  { %v1756_v0 = vadd.f32 %v6518_v62, %v1742_v21 }
 0x24c   :  { %v1551_v19 = vpop.f32.mrf.mxu0 }
 0x24d   :  { %v6540_v27 = vmax.f32 %v1756_v0, 0.0  ;;  %v1572_v30 = vadd.f32 %v1571_v1, %v1551_v19 }
 0x24f   :  { %9259 = vst [vmem:[#allocation129_spill] sm:$0xff] %v6540_v27  ;;  %1854 = vrot.lane.b32.xlu2 %v6540_v27, %s3580_s10  ;;  %1814 = vrot.lane.b32.xlu0 %v6540_v27, %s3579_s0  ;;  %v1743_v32 = vmul.f32 %v6516_v50, %v1572_v30 }
 0x250   :  { %1774 = vrot.lane.b32.xlu1 %v6540_v27, %s3578_s9 }
 0x251   :  { %v1757_v26 = vadd.f32 %v6518_v62, %v1743_v32 }
 0x253   :  { %v6572_v47 = vmax.f32 %v1757_v26, 0.0 }
 0x257   :  { %1974 = vrot.lane.b32.xlu2 %v6540_v27, %s3583_s13  ;;  %1934 = vrot.lane.b32.xlu0 %v6540_v27, %s3582_s12 }
 0x258   :  { %1894 = vrot.lane.b32.xlu1 %v6540_v27, %s3581_s11  ;;  %v1631_v36 = vpop.f32.mrf.mxu2 }
 0x25f   :  { %1892 = vrot.lane.b32.xlu0 %v6556_v40, %s3581_s11  ;;  %1772 = vrot.lane.b32.xlu2 %v6556_v40, %s3578_s9  ;;  %v1591_v10 = vpop.f32.mrf.mxu3 }
 0x260   :  { %2014 = vrot.lane.b32.xlu1 %v6540_v27, %s3584_s14 }
 0x265   :  { %v1611_v6 = vpop.f32.mrf.mxu1 }
 0x266   :  { %v1612_v44 = vadd.f32 %v1611_v6, %v1591_v10 }
 0x267   :  { %2012 = vrot.lane.b32.xlu0 %v6556_v40, %s3584_s14  ;;  %1812 = vrot.lane.b32.xlu2 %v6556_v40, %s3579_s0 }
 0x268   :  { %1852 = vrot.lane.b32.xlu1 %v6556_v40, %s3580_s10  ;;  %v1744_v41 = vmul.f32 %v6516_v50, %v1612_v44 }
 0x26a   :  { %v1758_v38 = vadd.f32 %v6518_v62, %v1744_v41 }
 0x26c   :  { %v6588_v9 = vmax.f32 %v1758_v38, 0.0  ;;  %v1651_v0 = vpop.f32.mrf.mxu0 }
 0x26d   :  { %v1652_v31 = vadd.f32 %v1651_v0, %v1631_v36 }
 0x26e   :  { %9260 = vst [vmem:[#allocation170_spill] sm:$0xff] %v6588_v9 }
 0x26f   :  { %1856 = vrot.lane.b32.xlu0 %v6572_v47, %s3580_s10  ;;  %1932 = vrot.lane.b32.xlu2 %v6556_v40, %s3582_s12  ;;  %v1745_v20 = vmul.f32 %v6516_v50, %v1652_v31 }
 0x270   :  { %1972 = vrot.lane.b32.xlu1 %v6556_v40, %s3583_s13 }
 0x271   :  { %v1759_v19 = vadd.f32 %v6518_v62, %v1745_v20 }
 0x273   :  { %v6630_v30 = vmax.f32 %v1759_v19, 0.0 }
 0x275   :  { %9262 = vst [vmem:[#allocation190_spill] sm:$0xff] %v6630_v30 }
 0x277   :  { %1976 = vrot.lane.b32.xlu0 %v6572_v47, %s3583_s13  ;;  %1776 = vrot.lane.b32.xlu2 %v6572_v47, %s3578_s9 }
 0x278   :  { %1816 = vrot.lane.b32.xlu1 %v6572_v47, %s3579_s0  ;;  %v1731_v26 = vpop.f32.mrf.mxu2 }
 0x27e   :  { %v1691_v11 = vpop.f32.mrf.mxu3 }
 0x27f   :  { %1778 = vrot.lane.b32.xlu0 %v6588_v9, %s3578_s9  ;;  %1896 = vrot.lane.b32.xlu2 %v6572_v47, %s3581_s11 }
 0x280   :  { %1936 = vrot.lane.b32.xlu1 %v6572_v47, %s3582_s12 }
 0x287   :  { %1898 = vrot.lane.b32.xlu0 %v6588_v9, %s3581_s11  ;;  %2016 = vrot.lane.b32.xlu2 %v6572_v47, %s3584_s14 }
 0x288   :  { %v1671_v54 = vpop.f32.mrf.mxu1  ;;  %1858 = vrot.lane.b32.xlu1 %v6588_v9, %s3580_s10 }
 0x289   :  { %v1692_v12 = vadd.f32 %v1691_v11, %v1671_v54 }
 0x28b   :  { %v1746_v23 = vmul.f32 %v6516_v50, %v1692_v12 }
 0x28d   :  { %v1760_v58 = vadd.f32 %v6518_v62, %v1746_v23 }
 0x28e   :  { %v1711_v32 = vpop.f32.mrf.mxu0 }
 0x28f   :  { %2018 = vrot.lane.b32.xlu0 %v6588_v9, %s3584_s14  ;;  %1818 = vrot.lane.b32.xlu2 %v6588_v9, %s3579_s0  ;;  %v6610_v21 = vmax.f32 %v1760_v58, 0.0  ;;  %v1732_v6 = vadd.f32 %v1731_v26, %v1711_v32 }
 0x290   :  { %1978 = vrot.lane.b32.xlu1 %v6588_v9, %s3583_s13  ;;  %v6612_v51 = vpop.permute.xlu2 %1890 }
 0x291   :  { %9261 = vst [vmem:[#allocation113_spill] sm:$0xff] %v6610_v21  ;;  %v1747_v41 = vmul.f32 %v6516_v50, %v1732_v6 }
 0x293   :  { %v1761_v11 = vadd.f32 %v6518_v62, %v1747_v41 }
 0x295   :  { %v6652_v23 = vmax.f32 %v1761_v11, 0.0 }
 0x297   :  { %1862 = vrot.lane.b32.xlu0 %v6610_v21, %s3580_s10  ;;  %1938 = vrot.lane.b32.xlu2 %v6588_v9, %s3582_s12  ;;  %9263 = vst [vmem:[#allocation110_spill] sm:$0xff] %v6652_v23 }
 0x298   :  { %1822 = vrot.lane.b32.xlu1 %v6610_v21, %s3579_s0  ;;  %v6628_v1 = vpop.permute.xlu2 %2010 }
 0x29f   :  { %1982 = vrot.lane.b32.xlu0 %v6610_v21, %s3583_s13  ;;  %1782 = vrot.lane.b32.xlu2 %v6610_v21, %s3578_s9 }
 0x2a0   :  { %1942 = vrot.lane.b32.xlu1 %v6610_v21, %s3582_s12 }
 0x2a7   :  { %1820 = vrot.lane.b32.xlu0 %v6630_v30, %s3579_s0  ;;  %1902 = vrot.lane.b32.xlu2 %v6610_v21, %s3581_s11 }
 0x2a8   :  { %1780 = vrot.lane.b32.xlu1 %v6630_v30, %s3578_s9  ;;  %v6641_v38 = vpop.permute.xlu0 %1850 }
 0x2a9   :  { %v6636_v10 = vpop.permute.xlu1 %1770  ;;  %v1855_v44 = vpop.permute.xlu2 %1854 }
 0x2af   :  { %1940 = vrot.lane.b32.xlu0 %v6630_v30, %s3582_s12  ;;  %2022 = vrot.lane.b32.xlu2 %v6610_v21, %s3584_s14 }
 0x2b0   :  { %1900 = vrot.lane.b32.xlu1 %v6630_v30, %s3581_s11  ;;  %v6660_v50 = vpop.permute.xlu0 %1970 }
 0x2b1   :  { %v6647_v54 = vpop.permute.xlu1 %1810  ;;  %v1975_v12 = vpop.permute.xlu2 %1974 }
 0x2b7   :  { %1784 = vrot.lane.b32.xlu0 %v6652_v23, %s3578_s9  ;;  %1860 = vrot.lane.b32.xlu2 %v6630_v30, %s3580_s10 }
 0x2b8   :  { %2020 = vrot.lane.b32.xlu1 %v6630_v30, %s3584_s14 }
 0x2b9   :  { %v6662_v58 = vpop.permute.xlu2 %1772  ;;  %v6664_v0 = vpop.permute.xlu1 %1930 }
 0x2bf   :  { %1904 = vrot.lane.b32.xlu0 %v6652_v23, %s3581_s11  ;;  %1980 = vrot.lane.b32.xlu2 %v6630_v30, %s3583_s13 }
 0x2c0   :  { %1864 = vrot.lane.b32.xlu1 %v6652_v23, %s3580_s10 }
 0x2c1   :  { %v1815_v62 = vpop.permute.xlu0 %1814  ;;  %v6672_v36 = vpop.permute.xlu2 %1812 }
 0x2c2   :  { %v1775_v31 = vpop.permute.xlu1 %1774  ;;  %v6677_v20 = vsel %vm400_vm4, %v6672_v36, %v1815_v62 }
 0x2c3   :  { %v6682_v19 = vsel %vm359_vm14, %v6662_v58, %v1775_v31 }
 0x2c7   :  { %2338 = vrot.lane.b32.xlu0 %v6522_v46, %s3592_s22  ;;  %1824 = vrot.lane.b32.xlu2 %v6652_v23, %s3579_s0 }
 0x2c8   :  { %1984 = vrot.lane.b32.xlu1 %v6652_v23, %s3583_s13 }
 0x2c9   :  { %v1935_v32 = vpop.permute.xlu0 %1934  ;;  %v6690_v26 = vpop.permute.xlu2 %1932 }
 0x2ca   :  { %v1895_v6 = vpop.permute.xlu1 %1894  ;;  %v6695_v41 = vsel %vm9264_vm1, %v6690_v26, %v1935_v32 }
 0x2cf   :  { %2298 = vrot.lane.b32.xlu0 %v6522_v46, %s3591_s21  ;;  %1944 = vrot.lane.b32.xlu2 %v6652_v23, %s3582_s12 }
 0x2d0   :  { %2340 = vrot.lane.b32.xlu1 %v6556_v40, %s3592_s22 }
 0x2d1   :  { %v6703_v11 = vpop.permute.xlu0 %1892  ;;  %v1777_v59 = vpop.permute.xlu2 %1776 }
 0x2d2   :  { %v2015_v39 = vpop.permute.xlu1 %2014  ;;  %v6708_v57 = vsel %vm9265_vm0, %v6703_v11, %v1895_v6  ;;  %v6712_v45 = vsel %vm359_vm14, %v1775_v31, %v1777_v59 }
 0x2d7   :  { %2250 = vrot.lane.b32.xlu0 %v6522_v46, %s3590_s20  ;;  %2342 = vrot.lane.b32.xlu2 %v6540_v27, %s3592_s22 }
 0x2d8   :  { %2300 = vrot.lane.b32.xlu1 %v6556_v40, %s3591_s21 }
 0x2d9   :  { %v6720_v29 = vpop.permute.xlu0 %2012  ;;  %v1897_v33 = vpop.permute.xlu2 %1896 }
 0x2da   :  { %v6725_v28 = vsel %vm605_vm11, %v6720_v29, %v2015_v39  ;;  %v6727_v15 = vpop.permute.xlu1 %1852  ;;  %v6731_v31 = vsel %vm9266_vm3, %v1895_v6, %v1897_v33  ;;  %vm9283_vm3 = vmmov %vm9264_vm1 }
 0x2db   :  { %v6736_v49 = vsel %vm441_vm2, %v6727_v15, %v1855_v44 }
 0x2df   :  { %2210 = vrot.lane.b32.xlu0 %v6522_v46, %s3589_s19  ;;  %2302 = vrot.lane.b32.xlu2 %v6540_v27, %s3591_s21 }
 0x2e0   :  { %2252 = vrot.lane.b32.xlu1 %v6556_v40, %s3590_s20 }
 0x2e1   :  { %v1857_v53 = vpop.permute.xlu0 %1856  ;;  %v2017_v35 = vpop.permute.xlu2 %2016 }
 0x2e2   :  { %v6746_v6 = vsel %vm441_vm2, %v1855_v44, %v1857_v53  ;;  %v6748_v34 = vpop.permute.xlu1 %1972  ;;  %v6752_v16 = vsel %vm605_vm11, %v2015_v39, %v2017_v35 }
 0x2e3   :  { %v6757_v56 = vsel %vm564_vm12, %v6748_v34, %v1975_v12 }
 0x2e7   :  { %2170 = vrot.lane.b32.xlu0 %v6522_v46, %s3588_s18  ;;  %2264 = vrot.lane.b32.xlu2 %v6652_v23, %s3590_s20 }
 0x2e8   :  { %2212 = vrot.lane.b32.xlu1 %v6556_v40, %s3589_s19 }
 0x2e9   :  { %v1977_v44 = vpop.permute.xlu0 %1976  ;;  %v1819_v55 = vpop.permute.xlu2 %1818 }
 0x2ea   :  { %v6767_v39 = vsel %vm564_vm12, %v1975_v12, %v1977_v44  ;;  %v1817_v13 = vpop.permute.xlu1 %1816 }
 0x2eb   :  { %v6771_v25 = vsel %vm400_vm4, %v1815_v62, %v1817_v13  ;;  %v6775_v63 = vsel %vm400_vm4, %v1817_v13, %v1819_v55 }
 0x2ec   :  { %9267 = vst [vmem:[#allocation152_spill] sm:$0xff] %v6775_v63 }
 0x2ef   :  { %2130 = vrot.lane.b32.xlu0 %v6522_v46, %s3587_s17  ;;  %2224 = vrot.lane.b32.xlu2 %v6652_v23, %s3589_s19 }
 0x2f0   :  { %2172 = vrot.lane.b32.xlu1 %v6556_v40, %s3588_s18 }
 0x2f1   :  { %v1779_v12 = vpop.permute.xlu0 %1778  ;;  %v1939_v24 = vpop.permute.xlu2 %1938 }
 0x2f2   :  { %v6785_v14 = vsel %vm359_vm14, %v1777_v59, %v1779_v12  ;;  %v1937_v62 = vpop.permute.xlu1 %1936 }
 0x2f3   :  { %9268 = vst [vmem:[#allocation153_spill] sm:$0xff] %v6785_v14  ;;  %v6789_v13 = vsel %vm9269_vm9, %v1935_v32, %v1937_v62  ;;  %v6793_v4 = vsel %vm9264_vm1, %v1937_v62, %v1939_v24  ;;  %vm9285_vm9 = vmmov %vm9264_vm1 }
 0x2f4   :  { %9270 = vst [vmem:[#allocation130_spill] sm:$0xff] %v6793_v4  ;;  %vm9288_vm1 = vmmov %vm9265_vm0 }
 0x2f7   :  { %2090 = vrot.lane.b32.xlu0 %v6522_v46, %s3586_s16  ;;  %2184 = vrot.lane.b32.xlu2 %v6652_v23, %s3588_s18 }
 0x2f8   :  { %2132 = vrot.lane.b32.xlu1 %v6556_v40, %s3587_s17 }
 0x2f9   :  { %v1899_v59 = vpop.permute.xlu0 %1898  ;;  %v1783_v61 = vpop.permute.xlu2 %1782 }
 0x2fa   :  { %v6803_v7 = vsel %vm9265_vm0, %v1897_v33, %v1899_v59  ;;  %v1859_v32 = vpop.permute.xlu1 %1858 }
 0x2fb   :  { %9271 = vst [vmem:[#allocation59_spill] sm:$0xff] %v6803_v7  ;;  %v6807_v62 = vsel %vm441_vm2, %v1857_v53, %v1859_v32 }
 0x2fc   :  { %9272 = vst [vmem:[#allocation52_spill] sm:$0xff] %v6807_v62 }
 0x2ff   :  { %2344 = vrot.lane.b32.xlu0 %v6572_v47, %s3592_s22  ;;  %2144 = vrot.lane.b32.xlu2 %v6652_v23, %s3587_s17 }
 0x300   :  { %2092 = vrot.lane.b32.xlu1 %v6556_v40, %s3586_s16 }
 0x301   :  { %v2019_v52 = vpop.permute.xlu0 %2018  ;;  %v1903_v22 = vpop.permute.xlu2 %1902 }
 0x302   :  { %v6817_v33 = vsel %vm605_vm11, %v2017_v35, %v2019_v52  ;;  %v1979_v60 = vpop.permute.xlu1 %1978 }
 0x303   :  { %v6821_v53 = vsel %vm564_vm12, %v1977_v44, %v1979_v60 }
 0x304   :  { %9273 = vst [vmem:[#allocation229_spill] sm:$0xff] %v6821_v53 }
 0x307   :  { %2052 = vrot.lane.b32.xlu0 %v6556_v40, %s3585_s15  ;;  %2104 = vrot.lane.b32.xlu2 %v6652_v23, %s3586_s16 }
 0x308   :  { %2346 = vrot.lane.b32.xlu1 %v6588_v9, %s3592_s22 }
 0x309   :  { %v1863_v18 = vpop.permute.xlu0 %1862  ;;  %v6829_v8 = vpop.permute.xlu2 %2022 }
 0x30a   :  { %9274 = vst [vmem:[#allocation230_spill] sm:$0xff] %v6829_v8  ;;  %v1823_v42 = vpop.permute.xlu1 %1822 }
 0x30f   :  { %2306 = vrot.lane.b32.xlu0 %v6588_v9, %s3591_s21  ;;  %2050 = vrot.lane.b32.xlu2 %v6522_v46, %s3585_s15 }
 0x310   :  { %2064 = vrot.lane.b32.xlu1 %v6652_v23, %s3585_s15 }
 0x311   :  { %v1983_v35 = vpop.permute.xlu0 %1982  ;;  %v1861_v44 = vpop.permute.xlu2 %1860 }
 0x312   :  { %v1943_v43 = vpop.permute.xlu1 %1942  ;;  %v6839_v5 = vsel %vm441_vm2, %v1861_v44, %v1863_v18  ;;  %v6843_v2 = vsel %vm441_vm2, %v1859_v32, %v1861_v44 }
 0x313   :  { %9275 = vst [vmem:[#allocation231_spill] sm:$0xff] %v6839_v5 }
 0x314   :  { %9276 = vst [vmem:[#allocation232_spill] sm:$0xff] %v6843_v2 }
 0x317   :  { %2054 = vrot.lane.b32.xlu0 %v6540_v27, %s3585_s15  ;;  %2304 = vrot.lane.b32.xlu2 %v6572_v47, %s3591_s21 }
 0x318   :  { %2094 = vrot.lane.b32.xlu1 %v6540_v27, %s3586_s16 }
 0x319   :  { %v1821_v3 = vpop.permute.xlu0 %1820  ;;  %v1981_v17 = vpop.permute.xlu2 %1980 }
 0x31a   :  { %v6853_v8 = vsel %vm400_vm4, %v1821_v3, %v1823_v42  ;;  %v6857_v5 = vsel %vm400_vm4, %v1819_v55, %v1821_v3  ;;  %v1781_v32 = vpop.permute.xlu1 %1780  ;;  %v6861_v44 = vsel %vm564_vm12, %v1981_v17, %v1983_v35  ;;  %v6865_v2 = vsel %vm564_vm12, %v1979_v60, %v1981_v17 }
 0x31b   :  { %9277 = vst [vmem:[#allocation233_spill] sm:$0xff] %v6853_v8  ;;  %v6869_v48 = vsel %vm359_vm14, %v1781_v32, %v1783_v61  ;;  %v6873_v8 = vsel %vm359_vm14, %v1779_v12, %v1781_v32 }
 0x31c   :  { %9278 = vst [vmem:[#allocation234_spill] sm:$0xff] %v6857_v5 }
 0x31d   :  { %9279 = vst [vmem:[#allocation235_spill] sm:$0xff] %v6861_v44 }
 0x31e   :  { %9280 = vst [vmem:[#allocation236_spill] sm:$0xff] %v6865_v2 }
 0x31f   :  { %9281 = vst [vmem:[#allocation237_spill] sm:$0xff] %v6869_v48  ;;  %2214 = vrot.lane.b32.xlu0 %v6540_v27, %s3589_s19  ;;  %2024 = vrot.lane.b32.xlu2 %v6652_v23, %s3584_s14 }
 0x320   :  { %9282 = vst [vmem:[#allocation238_spill] sm:$0xff] %v6873_v8  ;;  %2254 = vrot.lane.b32.xlu1 %v6540_v27, %s3590_s20 }
 0x321   :  { %v1941_v3 = vpop.permute.xlu0 %1940  ;;  %v6881_v17 = vpop.permute.xlu2 %1824 }
 0x322   :  { %v6885_v60 = vsel %vm9283_vm3, %v1941_v3, %v1943_v43  ;;  %v6889_v55 = vsel %vm9285_vm9, %v1939_v24, %v1941_v3  ;;  %v1901_v12 = vpop.permute.xlu1 %1900  ;;  %v6894_v32 = vsel %vm400_vm4, %v1823_v42, %v6881_v17  ;;  %vm9295_vm9 = vmmov %vm9265_vm0 }
 0x323   :  { %9284 = vst [vmem:[#allocation239_spill] sm:$0xff] %v6885_v60  ;;  %v6898_v48 = vsel %vm9288_vm1, %v1901_v12, %v1903_v22  ;;  %v6902_v44 = vsel %vm9265_vm0, %v1899_v59, %v1901_v12  ;;  %vm9309_vm1 = vcmp.lt.s32.totalorder %v3834_v37, 7  ;;  %vm9314_vm0 = vcmp.lt.s32.totalorder %v3834_v37, 8 }
 0x324   :  { %9286 = vst [vmem:[#allocation240_spill] sm:$0xff] %v6889_v55 }
 0x325   :  { %9287 = vst [vmem:[#allocation241_spill] sm:$0xff] %v6894_v32 }
 0x326   :  { %9289 = vst [vmem:[#allocation242_spill] sm:$0xff] %v6898_v48 }
 0x327   :  { %9290 = vst [vmem:[#allocation243_spill] sm:$0xff] %v6902_v44  ;;  %2176 = vrot.lane.b32.xlu0 %v6572_v47, %s3588_s18  ;;  %2256 = vrot.lane.b32.xlu2 %v6572_v47, %s3590_s20  ;;  %v9303_v44 = vld [vmem:[#allocation159_spill] sm:$0xff] }
 0x328   :  { %2216 = vrot.lane.b32.xlu1 %v6572_v47, %s3589_s19 }
 0x329   :  { %v6910_v24 = vpop.permute.xlu0 %1784  ;;  %v6912_v42 = vpop.permute.xlu2 %1944 }
 0x32a   :  { %v6917_v3 = vsel %vm359_vm14, %v1783_v61, %v6910_v24  ;;  %v6919_v59 = vpop.permute.xlu1 %2020  ;;  %v6924_v12 = vsel %vm9283_vm3, %v1943_v43, %v6912_v42  ;;  %vm9317_vm3 = vmmov %vm9309_vm1 }
 0x32b   :  { %9291 = vst [vmem:[#allocation244_spill] sm:$0xff] %v6917_v3  ;;  %v6929_v32 = vsel %vm605_vm11, %v2019_v52, %v6919_v59 }
 0x32c   :  { %9292 = vst [vmem:[#allocation245_spill] sm:$0xff] %v6919_v59 }
 0x32d   :  { %9293 = vst [vmem:[#allocation246_spill] sm:$0xff] %v6924_v12 }
 0x32e   :  { %9294 = vst [vmem:[#allocation247_spill] sm:$0xff] %v6929_v32 }
 0x32f   :  { %2096 = vrot.lane.b32.xlu0 %v6572_v47, %s3586_s16  ;;  %2174 = vrot.lane.b32.xlu2 %v6540_v27, %s3588_s18 }
 0x330   :  { %2134 = vrot.lane.b32.xlu1 %v6540_v27, %s3587_s17 }
 0x331   :  { %v6937_v61 = vpop.permute.xlu0 %1904  ;;  %v6939_v3 = vpop.permute.xlu2 %2342 }
 0x332   :  { %v6944_v43 = vsel %vm9295_vm9, %v1903_v22, %v6937_v61  ;;  %v6946_v52 = vpop.permute.xlu1 %1864  ;;  %vm9320_vm9 = vcmp.lt.s32.totalorder %v3834_v37, 9 }
 0x333   :  { %9296 = vst [vmem:[#allocation248_spill] sm:$0xff] %v6944_v43  ;;  %v6951_v12 = vsel %vm441_vm2, %v1863_v18, %v6946_v52 }
 0x334   :  { %9297 = vst [vmem:[#allocation249_spill] sm:$0xff] %v6951_v12 }
 0x337   :  { %2058 = vrot.lane.b32.xlu0 %v6588_v9, %s3585_s15  ;;  %2136 = vrot.lane.b32.xlu2 %v6572_v47, %s3587_s17 }
 0x338   :  { %2098 = vrot.lane.b32.xlu1 %v6588_v9, %s3586_s16 }
 0x339   :  { %v6959_v48 = vpop.permute.xlu0 %2338  ;;  %v6961_v22 = vpop.permute.xlu2 %2302 }
 0x33a   :  { %9298 = vst [vmem:[#allocation250_spill] sm:$0xff] %v6959_v48  ;;  %v6963_v43 = vpop.permute.xlu1 %1984 }
 0x33b   :  { %v6968_v18 = vsel %vm564_vm12, %v1983_v35, %v6963_v43 }
 0x33c   :  { %9299 = vst [vmem:[#allocation251_spill] sm:$0xff] %v6968_v18  ;;  %v9302_v18 = vld [vmem:[#allocation36_spill] sm:$0xff] }
 0x33f   :  { %2308 = vrot.lane.b32.xlu0 %v6630_v30, %s3591_s21  ;;  %2056 = vrot.lane.b32.xlu2 %v6572_v47, %s3585_s15 }
 0x340   :  { %2348 = vrot.lane.b32.xlu1 %v6630_v30, %s3592_s22 }
 0x341   :  { %v6976_v12 = vpop.permute.xlu0 %2298  ;;  %v6978_v60 = vpop.permute.xlu2 %2264 }
 0x342   :  { %9300 = vst [vmem:[#allocation252_spill] sm:$0xff] %v6976_v12  ;;  %v2341_v59 = vpop.permute.xlu1 %2340 }
 0x343   :  { %9301 = vst [vmem:[#allocation253_spill] sm:$0xff] %v6978_v60  ;;  %v2359_v8 = vsel %vm941_vm7, %v2341_v59, %v6939_v3  ;;  %v2360_v35 = vsel %vm941_vm7, %v6959_v48, %v2341_v59  ;;  %v9307_v48 = vld [vmem:[#allocation45_spill] sm:$0xff] }
 0x344   :  { %v2362_v5 = vmul.f32 %v2360_v35, %v9302_v18  ;;  %v2363_v55 = vmul.f32 %v2359_v8, %v9303_v44  ;;  %v9305_v8 = vld [vmem:[#allocation33_spill] sm:$0xff] }
 0x346   :  { %2823 = vmatpush.msra.mxu3 %v2362_v5  ;;  %2863 = vmatpush.msra.mxu2 %v2363_v55  ;;  %v9306_v55 = vld [vmem:[#allocation71_spill] sm:$0xff] }
 0x347   :  { %2420 = vrot.lane.b32.xlu0 %v6556_v40, %s3595_s24  ;;  %2350 = vrot.lane.b32.xlu2 %v6610_v21, %s3592_s22 }
 0x348   :  { %2310 = vrot.lane.b32.xlu1 %v6610_v21, %s3591_s21 }
 0x349   :  { %v2251_v2 = vpop.permute.xlu0 %2250  ;;  %v6994_v32 = vpop.permute.xlu2 %2224 }
 0x34a   :  { %9304 = vst [vmem:[#allocation36_spill] sm:$0xff] %v6994_v32  ;;  %v2301_v14 = vpop.permute.xlu1 %2300  ;;  %v2273_v35 = vsel %vm851_vm8, %v6978_v60, %v2251_v2 }
 0x34b   :  { %v2319_v59 = vsel %vm900_vm6, %v2301_v14, %v6961_v22  ;;  %v2320_v5 = vsel %vm900_vm6, %v6976_v12, %v2301_v14  ;;  %v2274_v63 = vmul.f32 %v2273_v35, %v9307_v48 }
 0x34c   :  { %v2322_v44 = vmul.f32 %v2320_v5, %v9305_v8  ;;  %v2323_v18 = vmul.f32 %v2319_v59, %v9306_v55 }
 0x34e   :  { %2824 = vmatpush.msra.mxu3 %v2322_v44  ;;  %2864 = vmatpush.msra.mxu2 %v2323_v18  ;;  %v9311_v44 = vld [vmem:[#allocation58_spill] sm:$0xff] }
 0x34f   :  { %2380 = vrot.lane.b32.xlu0 %v6556_v40, %s3593_s23  ;;  %2418 = vrot.lane.b32.xlu2 %v6522_v46, %s3595_s24  ;;  %v9312_v18 = vld [vmem:[#allocation46_spill] sm:$0xff] }
 0x350   :  { %2422 = vrot.lane.b32.xlu1 %v6540_v27, %s3595_s24  ;;  %2825 = vmatpush.msra.mxu3 %v6522_v46 }
 0x351   :  { %2865 = vmatpush.msra.mxu2 %v6556_v40  ;;  %v2211_v14 = vpop.permute.xlu0 %2210  ;;  %v7016_v59 = vpop.permute.xlu2 %2184 }
 0x352   :  { %9308 = vst [vmem:[#allocation159_spill] sm:$0xff] %v7016_v59  ;;  %v2233_v5 = vsel %vm9309_vm1, %v6994_v32, %v2211_v14  ;;  %v7021_v8 = vpop.permute.xlu1 %2252  ;;  %2826 = vmatpush.msra.mxu3 %v2274_v63  ;;  %vm9322_vm1 = vmmov %vm9314_vm0 }
 0x353   :  { %9310 = vst [vmem:[#allocation33_spill] sm:$0xff] %v7021_v8  ;;  %v2234_v55 = vmul.f32 %v2233_v5, %v9311_v44  ;;  %v2272_v48 = vsel %vm851_vm8, %v2251_v2, %v7021_v8  ;;  %v9316_v44 = vld [vmem:[#allocation37_spill] sm:$0xff] }
 0x354   :  { %v2275_v35 = vmul.f32 %v2272_v48, %v9312_v18  ;;  %v9318_v18 = vld [vmem:[#allocation109_spill] sm:$0xff] }
 0x355   :  { %2827 = vmatpush.msra.mxu3 %v2234_v55  ;;  %v9338_v8 = vld [vmem:[#allocation53_spill] sm:$0xff] }
 0x356   :  { %2866 = vmatpush.msra.mxu2 %v2275_v35 }
 0x357   :  { %2260 = vrot.lane.b32.xlu0 %v6630_v30, %s3590_s20  ;;  %2378 = vrot.lane.b32.xlu2 %v6522_v46, %s3593_s23 }
 0x358   :  { %2382 = vrot.lane.b32.xlu1 %v6540_v27, %s3593_s23 }
 0x359   :  { %v2171_v63 = vpop.permute.xlu0 %2170  ;;  %v7034_v40 = vpop.permute.xlu2 %2144 }
 0x35a   :  { %9313 = vst [vmem:[#allocation71_spill] sm:$0xff] %v7034_v40  ;;  %v2193_v2 = vsel %vm9314_vm0, %v7016_v59, %v2171_v63  ;;  %v7039_v5 = vpop.permute.xlu1 %2212  ;;  %vm9324_vm0 = vcmp.lt.s32.totalorder %v3834_v37, 55 }
 0x35b   :  { %9315 = vst [vmem:[#allocation45_spill] sm:$0xff] %v7039_v5  ;;  %v2194_v55 = vmul.f32 %v2193_v2, %v9316_v44  ;;  %v2232_v48 = vsel %vm9317_vm3, %v2211_v14, %v7039_v5  ;;  %v9321_v44 = vld [vmem:[#allocation63_spill] sm:$0xff]  ;;  %vm9328_vm3 = vmmov %vm9320_vm9  ;;  %v1992_v5 = vsel %vm564_vm12, %v6660_v50, %v6748_v34 }
 0x35c   :  { %v2235_v46 = vmul.f32 %v2232_v48, %v9318_v18  ;;  %v9323_v18 = vld [vmem:[#allocation38_spill] sm:$0xff] }
 0x35d   :  { %2828 = vmatpush.msra.mxu3 %v2194_v55 }
 0x35e   :  { %2867 = vmatpush.msra.mxu2 %v2235_v46 }
 0x35f   :  { %2178 = vrot.lane.b32.xlu0 %v6588_v9, %s3588_s18  ;;  %2258 = vrot.lane.b32.xlu2 %v6588_v9, %s3590_s20 }
 0x360   :  { %2218 = vrot.lane.b32.xlu1 %v6588_v9, %s3589_s19 }
 0x361   :  { %v2131_v35 = vpop.permute.xlu0 %2130  ;;  %v7052_v59 = vpop.permute.xlu2 %2104 }
 0x362   :  { %9319 = vst [vmem:[#allocation58_spill] sm:$0xff] %v7052_v59  ;;  %v2153_v14 = vsel %vm9320_vm9, %v7034_v40, %v2131_v35  ;;  %v7057_v2 = vpop.permute.xlu1 %2172  ;;  %vm9331_vm9 = vmmov %vm9324_vm0 }
 0x363   :  { %v2154_v55 = vmul.f32 %v2153_v14, %v9321_v44  ;;  %v2192_v48 = vsel %vm9322_vm1, %v2171_v63, %v7057_v2  ;;  %v9327_v44 = vld [vmem:[#allocation222_spill] sm:$0xff]  ;;  %vm9339_vm1 = vcmp.lt.s32.totalorder %v3834_v37, 64 }
 0x364   :  { %v2195_v46 = vmul.f32 %v2192_v48, %v9323_v18  ;;  %v9329_v18 = vld [vmem:[#allocation204_spill] sm:$0xff] }
 0x365   :  { %2829 = vmatpush.msra.mxu3 %v2154_v55 }
 0x366   :  { %2868 = vmatpush.msra.mxu2 %v2195_v46 }
 0x367   :  { %2140 = vrot.lane.b32.xlu0 %v6630_v30, %s3587_s17  ;;  %2220 = vrot.lane.b32.xlu2 %v6630_v30, %s3589_s19 }
 0x368   :  { %2180 = vrot.lane.b32.xlu1 %v6630_v30, %s3588_s18 }
 0x369   :  { %v2091_v40 = vpop.permute.xlu0 %2090  ;;  %v2051_v32 = vpop.permute.xlu2 %2050 }
 0x36a   :  { %v7073_v14 = vsel %vm9324_vm0, %v7052_v59, %v2091_v40  ;;  %v7075_v63 = vpop.permute.xlu1 %2132  ;;  %vm9342_vm0 = vcmp.lt.s32.totalorder %v3834_v37, 65 }
 0x36b   :  { %9325 = vst [vmem:[#allocation46_spill] sm:$0xff] %v7073_v14  ;;  %v2114_v55 = vmul.f32 %v7073_v14, %v9327_v44  ;;  %v2152_v48 = vsel %vm9328_vm3, %v2131_v35, %v7075_v63  ;;  %v9333_v14 = vld [vmem:[#allocation35_spill] sm:$0xff]  ;;  %v1912_v34 = vsel %vm9342_vm0, %v6612_v51, %v6703_v11  ;;  %vm9362_vm3 = vmmov %vm9342_vm0  ;;  %vm9424_vm0 = vcmp.lt.s32.totalorder %v3834_v37, 9 }
 0x36c   :  { %9326 = vst [vmem:[#allocation37_spill] sm:$0xff] %v7075_v63  ;;  %v2155_v46 = vmul.f32 %v2152_v48, %v9329_v18  ;;  %v9332_v18 = vld [vmem:[#allocation27_spill] sm:$0xff] }
 0x36d   :  { %2830 = vmatpush.msra.mxu3 %v2114_v55 }
 0x36e   :  { %2869 = vmatpush.msra.mxu2 %v2155_v46 }
 0x36f   :  { %2424 = vrot.lane.b32.xlu0 %v6572_v47, %s3595_s24  ;;  %2138 = vrot.lane.b32.xlu2 %v6588_v9, %s3587_s17 }
 0x370   :  { %2100 = vrot.lane.b32.xlu1 %v6630_v30, %s3586_s16 }
 0x371   :  { %v2345_v60 = vpop.permute.xlu0 %2344  ;;  %v2305_v12 = vpop.permute.xlu2 %2304 }
 0x372   :  { %v7092_v44 = vsel %vm941_vm7, %v6939_v3, %v2345_v60  ;;  %v7094_v35 = vpop.permute.xlu1 %2092  ;;  %v7099_v55 = vsel %vm900_vm6, %v6961_v22, %v2305_v12 }
 0x373   :  { %9330 = vst [vmem:[#allocation109_spill] sm:$0xff] %v7099_v55  ;;  %v2112_v48 = vsel %vm9331_vm9, %v2091_v40, %v7094_v35  ;;  %vm9364_vm9 = vcmp.lt.s32.totalorder %v3834_v37, 8 }
 0x374   :  { %v2115_v46 = vmul.f32 %v2112_v48, %v9332_v18  ;;  %v2586_v59 = vmul.f32 %v2112_v48, %v9333_v14  ;;  %v9336_v48 = vld [vmem:[#allocation175_spill] sm:$0xff] }
 0x376   :  { %2848 = vmatpush.msra.mxu1 %v2586_v59  ;;  %2870 = vmatpush.msra.mxu2 %v2115_v46  ;;  %v2032_v59 = vsel %vm605_vm11, %v6628_v1, %v6720_v29  ;;  %v9337_v46 = vld [vmem:[#allocation30_spill] sm:$0xff]  ;;  %v1952_v29 = vsel %vm9339_vm1, %v6664_v0, %v6690_v26  ;;  %v9343_v26 = vld [vmem:[#allocation176_spill] sm:$0xff] }
 0x377   :  { %2102 = vrot.lane.b32.xlu0 %v6610_v21, %s3586_s16  ;;  %2352 = vrot.lane.b32.xlu2 %v6652_v23, %s3592_s22  ;;  %v2554_v55 = vmul.f32 %v2032_v59, %v9338_v8  ;;  %v1995_v8 = vmul.f32 %v1992_v5, %v9343_v26  ;;  %v1872_v26 = vsel %vm441_vm2, %v6641_v38, %v6727_v15 }
 0x378   :  { %2426 = vrot.lane.b32.xlu1 %v6588_v9, %s3595_s24  ;;  %v7194_v15 = vsel %vm564_vm12, %v6963_v43, %v6660_v50  ;;  %vm9356_vm12 = vmmov %vm9339_vm1  ;;  %vm9366_vm1 = vcmp.lt.s32.totalorder %v3834_v37, 55 }
 0x379   :  { %v7112_v3 = vpop.permute.xlu0 %2052  ;;  %v7114_v22 = vpop.permute.xlu2 %2024  ;;  %9352 = vst [vmem:[#allocation35_spill] sm:$0xff] %v7194_v15  ;;  %v7210_v50 = vsel %vm9356_vm12, %v6912_v42, %v6664_v0  ;;  %v9361_v42 = vld [vmem:[#allocation44_spill] sm:$0xff] }
 0x37a   :  { %9334 = vst [vmem:[#allocation63_spill] sm:$0xff] %v7114_v22  ;;  %v2072_v40 = vsel %vm646_vm10, %v2051_v32, %v7112_v3  ;;  %v7119_v14 = vpop.permute.xlu1 %2346 }
 0x37b   :  { %9335 = vst [vmem:[#allocation38_spill] sm:$0xff] %v7119_v14  ;;  %v2075_v18 = vmul.f32 %v2072_v40, %v9336_v48  ;;  %v2570_v63 = vmul.f32 %v2072_v40, %v9337_v46  ;;  %v7130_v27 = vsel %vm941_vm7, %v2345_v60, %v7119_v14  ;;  %v9340_v40 = vld [vmem:[#allocation18_spill] sm:$0xff]  ;;  %v9341_v60 = vld [vmem:[#allocation57_spill] sm:$0xff] }
 0x37c   :  { %v2035_v48 = vmul.f32 %v2032_v59, %v9340_v40  ;;  %v2538_v46 = vmul.f32 %v1992_v5, %v9341_v60  ;;  %v9348_v5 = vld [vmem:[#allocation64_spill] sm:$0xff]  ;;  %9357 = vst [vmem:[#allocation175_spill] sm:$0xff] %v7210_v50 }
 0x37d   :  { %2849 = vmatpush.msra.mxu1 %v2570_v63  ;;  %2871 = vmatpush.msra.mxu2 %v2075_v18  ;;  %v9344_v18 = vld [vmem:[#allocation29_spill] sm:$0xff] }
 0x37e   :  { %v2522_v40 = vmul.f32 %v1952_v29, %v9344_v18  ;;  %v9354_v18 = vld [vmem:[#allocation195_spill] sm:$0xff] }
 0x37f   :  { %2386 = vrot.lane.b32.xlu0 %v6588_v9, %s3593_s23  ;;  %2060 = vrot.lane.b32.xlu2 %v6630_v30, %s3585_s15  ;;  %v9346_v9 = vld [vmem:[#allocation39_spill] sm:$0xff] }
 0x380   :  { %2312 = vrot.lane.b32.xlu1 %v6652_v23, %s3591_s21  ;;  %2850 = vmatpush.msra.mxu1 %v2554_v55  ;;  %v1955_v14 = vmul.f32 %v1952_v29, %v9346_v9  ;;  %v9350_v9 = vld [vmem:[#allocation185_spill] sm:$0xff] }
 0x381   :  { %2872 = vmatpush.msra.mxu2 %v2035_v48  ;;  %v7154_v63 = vpop.permute.xlu0 %2306  ;;  %v7156_v59 = vpop.permute.xlu2 %2256  ;;  %v2506_v48 = vmul.f32 %v1912_v34, %v9348_v5 }
 0x382   :  { %v7162_v60 = vsel %vm900_vm6, %v2305_v12, %v7154_v63  ;;  %v7164_v55 = vpop.permute.xlu1 %2064  ;;  %2851 = vmatpush.msra.mxu1 %v2538_v46  ;;  %v7181_v12 = vsel %vm605_vm11, %v7114_v22, %v6628_v1  ;;  %v1792_v1 = vsel %vm359_vm14, %v6636_v10, %v6662_v58  ;;  %v9358_v58 = vld [vmem:[#allocation43_spill] sm:$0xff]  ;;  %v9405_v22 = vld [vmem:[#allocation101_spill] sm:$0xff] }
 0x383   :  { %9345 = vst [vmem:[#allocation222_spill] sm:$0xff] %v7164_v55  ;;  %v7170_v11 = vsel %vm646_vm10, %v7164_v55, %v2051_v32  ;;  %2873 = vmatpush.msra.mxu2 %v1995_v8  ;;  %v9351_v32 = vld [vmem:[#allocation135_spill] sm:$0xff]  ;;  %v1832_v8 = vsel %vm400_vm4, %v6647_v54, %v6672_v36  ;;  %v9355_v36 = vld [vmem:[#allocation120_spill] sm:$0xff] }
 0x384   :  { %9347 = vst [vmem:[#allocation204_spill] sm:$0xff] %v7170_v11  ;;  %v2074_v29 = vmul.f32 %v7170_v11, %v9350_v9  ;;  %2852 = vmatpush.msra.mxu1 %v2522_v40  ;;  %v1915_v46 = vmul.f32 %v1912_v34, %v9351_v32  ;;  %v9353_v34 = vld [vmem:[#allocation68_spill] sm:$0xff]  ;;  %v2034_v40 = vmul.f32 %v7181_v12, %v9354_v18  ;;  %v9360_v32 = vld [vmem:[#allocation47_spill] sm:$0xff] }
 0x385   :  { %9349 = vst [vmem:[#allocation27_spill] sm:$0xff] %v7181_v12  ;;  %2874 = vmatpush.msra.mxu2 %v1955_v14  ;;  %v2490_v14 = vmul.f32 %v1872_v26, %v9353_v34  ;;  %v1875_v5 = vmul.f32 %v1872_v26, %v9355_v36  ;;  %v2474_v43 = vmul.f32 %v1832_v8, %v9358_v58  ;;  %v9369_v58 = vld [vmem:[#allocation74_spill] sm:$0xff] }
 0x386   :  { %2831 = vmatpush.msra.mxu3 %v2074_v29  ;;  %2853 = vmatpush.msra.mxu1 %v2506_v48  ;;  %v9359_v48 = vld [vmem:[#allocation86_spill] sm:$0xff]  ;;  %v2458_v0 = vmul.f32 %v1792_v1, %v9360_v32  ;;  %v7229_v34 = vsel %vm9362_vm3, %v6937_v61, %v6612_v51  ;;  %v9367_v61 = vld [vmem:[#allocation48_spill] sm:$0xff]  ;;  %vm9432_vm3 = vmmov %vm9364_vm9 }
 0x387   :  { %2875 = vmatpush.msra.mxu2 %v1915_v46  ;;  %2222 = vrot.lane.b32.xlu0 %v6610_v21, %s3589_s19  ;;  %v1994_v9 = vmul.f32 %v7194_v15, %v9359_v48  ;;  %v1835_v46 = vmul.f32 %v1832_v8, %v9361_v42  ;;  %9363 = vst [vmem:[#allocation30_spill] sm:$0xff] %v7229_v34  ;;  %v9370_v48 = vld [vmem:[#allocation146_spill] sm:$0xff]  ;;  %v9396_v15 = vld [vmem:[#allocation132_spill] sm:$0xff] }
 0x388   :  { %2062 = vrot.lane.b32.xlu1 %v6610_v21, %s3585_s15  ;;  %2384 = vrot.lane.b32.xlu2 %v6572_v47, %s3593_s23  ;;  %v1914_v32 = vmul.f32 %v7229_v34, %v9370_v48  ;;  %v9397_v12 = vld [vmem:[#allocation194_spill] sm:$0xff] }
 0x389   :  { %2832 = vmatpush.msra.mxu3 %v2034_v40  ;;  %2854 = vmatpush.msra.mxu1 %v2490_v14  ;;  %v7219_v26 = vpop.permute.xlu0 %2054  ;;  %v7221_v29 = vpop.permute.xlu2 %2174  ;;  %v9365_v40 = vld [vmem:[#allocation78_spill] sm:$0xff] }
 0x38a   :  { %2876 = vmatpush.msra.mxu2 %v1875_v5  ;;  %v7231_v18 = vpop.permute.xlu1 %2094  ;;  %v7237_v14 = vsel %vm9364_vm9, %v7057_v2, %v7221_v29  ;;  %v1954_v36 = vmul.f32 %v7210_v50, %v9365_v40  ;;  %v7245_v8 = vsel %vm646_vm10, %v7112_v3, %v7219_v26  ;;  %v1795_v2 = vmul.f32 %v1792_v1, %v9367_v61  ;;  %v9372_v1 = vld [vmem:[#allocation70_spill] sm:$0xff]  ;;  %v9395_v50 = vld [vmem:[#allocation184_spill] sm:$0xff]  ;;  %vm9435_vm9 = vmmov %vm9424_vm0 }
 0x38b   :  { %v7251_v51 = vsel %vm9366_vm1, %v7094_v35, %v7231_v18  ;;  %2833 = vmatpush.msra.mxu3 %v1994_v9  ;;  %2855 = vmatpush.msra.mxu1 %v2474_v43  ;;  %v7258_v5 = vsel %vm441_vm2, %v6946_v52, %v6641_v38  ;;  %v7268_v35 = vsel %vm400_vm4, %v6881_v17, %v6647_v54  ;;  %v9373_v38 = vld [vmem:[#allocation126_spill] sm:$0xff]  ;;  %v9374_v9 = vld [vmem:[#allocation84_spill] sm:$0xff]  ;;  %vm9392_vm2 = vmmov %vm9366_vm1  ;;  %vm9417_vm4 = vcmp.lt.s32.totalorder %v3834_v37, 7 }
 0x38c   :  { %9368 = vst [vmem:[#allocation53_spill] sm:$0xff] %v7258_v5  ;;  %v2587_v3 = vmul.f32 %v7251_v51, %v9369_v58  ;;  %2877 = vmatpush.msra.mxu2 %v1835_v46  ;;  %v2571_v43 = vmul.f32 %v7245_v8, %v9372_v1  ;;  %v1874_v52 = vmul.f32 %v7258_v5, %v9373_v38  ;;  %v9376_v17 = vld [vmem:[#allocation102_spill] sm:$0xff]  ;;  %v9391_v5 = vld [vmem:[#allocation105_spill] sm:$0xff]  ;;  %vm9429_vm12 = vmmov %vm9417_vm4 }
 0x38d   :  { %2834 = vmatpush.msra.mxu3 %v1954_v36  ;;  %2856 = vmatpush.msra.mxu1 %v2458_v0  ;;  %9371 = vst [vmem:[#allocation18_spill] sm:$0xff] %v7268_v35  ;;  %v2555_v0 = vmul.f32 %v6725_v28, %v9374_v9  ;;  %v7282_v54 = vsel %vm359_vm14, %v6910_v24, %v6636_v10  ;;  %v9377_v36 = vld [vmem:[#allocation89_spill] sm:$0xff]  ;;  %v9378_v24 = vld [vmem:[#allocation115_spill] sm:$0xff]  ;;  %vm9385_vm14 = vmmov %vm9366_vm1 }
 0x38e   :  { %2878 = vmatpush.msra.mxu2 %v1795_v2  ;;  %2888 = vmatpush.msra.mxu0 %v2587_v3  ;;  %9375 = vst [vmem:[#allocation57_spill] sm:$0xff] %v7282_v54  ;;  %v1834_v42 = vmul.f32 %v7268_v35, %v9376_v17  ;;  %v2539_v61 = vmul.f32 %v6757_v56, %v9377_v36  ;;  %v9379_v3 = vld [vmem:[#allocation49_spill] sm:$0xff]  ;;  %v9383_v36 = vld [vmem:[#allocation67_spill] sm:$0xff] }
 0x38f   :  { %2835 = vmatpush.msra.mxu3 %v1914_v32  ;;  %2428 = vrot.lane.b32.xlu0 %v6630_v30, %s3595_s24  ;;  %v1794_v2 = vmul.f32 %v7282_v54, %v9378_v24  ;;  %v2523_v48 = vmul.f32 %v6695_v41, %v9379_v3  ;;  %v9380_v32 = vld [vmem:[#allocation97_spill] sm:$0xff]  ;;  %v3143_v24 = vld [vmem:[%s7973_s5] sm:$0xff] }
 0x390   :  { %2182 = vrot.lane.b32.xlu1 %v6610_v21, %s3588_s18  ;;  %2889 = vmatpush.msra.mxu0 %v2571_v43  ;;  %v2507_v1 = vmul.f32 %v6708_v57, %v9380_v32  ;;  %v9381_v43 = vld [vmem:[#allocation100_spill] sm:$0xff]  ;;  %v9623_v37 = vld [vmem:[#allocation191_spill] sm:$0xff] }
 0x391   :  { %2262 = vrot.lane.b32.xlu2 %v6610_v21, %s3590_s20  ;;  %2836 = vmatpush.msra.mxu3 %v1874_v52  ;;  %v7290_v46 = vpop.permute.xlu0 %2214  ;;  %v7292_v40 = vpop.permute.xlu2 %2136  ;;  %v2491_v38 = vmul.f32 %v6736_v49, %v9381_v43 }
 0x392   :  { %2890 = vmatpush.msra.mxu0 %v2555_v0  ;;  %v7296_v10 = vpop.permute.xlu1 %2254  ;;  %v9382_v0 = vld [vmem:[#allocation54_spill] sm:$0xff] }
 0x393   :  { %v7304_v58 = vsel %vm851_vm8, %v7296_v10, %v7156_v59  ;;  %2837 = vmatpush.msra.mxu3 %v1834_v42  ;;  %v2475_v17 = vmul.f32 %v6677_v20, %v9382_v0 }
 0x394   :  { %2891 = vmatpush.msra.mxu0 %v2539_v61  ;;  %v2459_v61 = vmul.f32 %v6682_v19, %v9383_v36 }
 0x395   :  { %2838 = vmatpush.msra.mxu3 %v1794_v2  ;;  %v7332_v2 = vld [vmem:[%s7974_s2] sm:$0xff] }
 0x396   :  { %2892 = vmatpush.msra.mxu0 %v2523_v48  ;;  %2839 = vmatmul.f32.vlgmr.msra.gmra.mxu3 %v7332_v2 }
 0x397   :  { %2390 = vrot.lane.b32.xlu0 %v6610_v21, %s3593_s23  ;;  %2879 = vmatmul.f32.vlgmr.msra.gmra.mxu2 %v7332_v2 }
 0x398   :  { %2430 = vrot.lane.b32.xlu1 %v6610_v21, %s3595_s24  ;;  %2893 = vmatpush.msra.mxu0 %v2507_v1 }
 0x399   :  { %2142 = vrot.lane.b32.xlu2 %v6610_v21, %s3587_s17  ;;  %v7318_v52 = vpop.permute.xlu0 %2176  ;;  %v2057_v9 = vpop.permute.xlu2 %2056 }
 0x39a   :  { %v7322_v42 = vpop.permute.xlu1 %2216  ;;  %2894 = vmatpush.msra.mxu0 %v2491_v38  ;;  %v7345_v32 = vsel %vm646_vm10, %v7219_v26, %v2057_v9  ;;  %v9386_v38 = vld [vmem:[#allocation24_spill] sm:$0xff] }
 0x39b   :  { %v9389_v26 = vld [vmem:[#allocation20_spill] sm:$0xff] }
 0x39c   :  { %2895 = vmatpush.msra.mxu0 %v2475_v17  ;;  %v9387_v17 = vld [vmem:[#allocation193_spill] sm:$0xff]  ;;  %v2540_v54 = vmul.f32 %v6767_v39, %v9389_v26  ;;  %v9394_v26 = vld [vmem:[#allocation150_spill] sm:$0xff] }
 0x39d   :  { %v2572_v36 = vmul.f32 %v7345_v32, %v9387_v17  ;;  %v2508_v34 = vmul.f32 %v6731_v31, %v9394_v26 }
 0x39e   :  { %2896 = vmatpush.msra.mxu0 %v2459_v61  ;;  %v9388_v61 = vld [vmem:[#allocation200_spill] sm:$0xff] }
 0x39f   :  { %3146 = vperm.xlu0 %3575, %v3143_v24   ;;  %v2556_v24 = vmul.f32 %v6752_v16, %v9388_v61  ;;  %v9393_v61 = vld [vmem:[#allocation218_spill] sm:$0xff] }
 0x3a0   :  { %2432 = vrot.lane.b32.xlu1 %v6652_v23, %s3595_s24 }
 0x3a1   :  { %2388 = vrot.lane.b32.xlu2 %v6630_v30, %s3593_s23  ;;  %v2097_v3 = vpop.permute.xlu0 %2096  ;;  %v7340_v48 = vpop.permute.xlu2 %2350 }
 0x3a2   :  { %9384 = vst [vmem:[#allocation176_spill] sm:$0xff] %v7340_v48  ;;  %v7350_v1 = vsel %vm9385_vm14, %v7231_v18, %v2097_v3  ;;  %v7352_v43 = vpop.permute.xlu1 %2134  ;;  %vm9461_vm14 = vmmov %vm9366_vm1 }
 0x3a3   :  { %v2588_v0 = vmul.f32 %v7350_v1, %v9386_v38 }
 0x3a5   :  { %2928 = vmatpush.msrb.mxu3 %v2588_v0  ;;  %v2524_v0 = vmul.f32 %v6789_v13, %v9391_v5 }
 0x3a7   :  { %2929 = vmatpush.msrb.mxu3 %v2572_v36 }
 0x3a9   :  { %2392 = vrot.lane.b32.xlu2 %v6652_v23, %s3593_s23  ;;  %v7364_v18 = vpop.permute.xlu0 %2058  ;;  %2930 = vmatpush.msrb.mxu3 %v2556_v24  ;;  %v7366_v35 = vpop.permute.xlu2 %2418 }
 0x3aa   :  { %9390 = vst [vmem:[#allocation29_spill] sm:$0xff] %v7366_v35  ;;  %v7368_v38 = vpop.permute.xlu1 %2098  ;;  %v7375_v17 = vsel %vm646_vm10, %v2057_v9, %v7364_v18  ;;  %v2492_v9 = vmul.f32 %v6746_v6, %v9396_v15  ;;  %v9401_v15 = vld [vmem:[#allocation138_spill] sm:$0xff] }
 0x3ab   :  { %v7380_v36 = vsel %vm9392_vm2, %v2097_v3, %v7368_v38  ;;  %2931 = vmatpush.msrb.mxu3 %v2540_v54  ;;  %v2573_v5 = vmul.f32 %v7375_v17, %v9395_v50  ;;  %v2557_v3 = vmul.f32 %v6817_v33, %v9397_v12  ;;  %v9398_v54 = vld [vmem:[#allocation119_spill] sm:$0xff]  ;;  %vm9468_vm2 = vmmov %vm9417_vm4 }
 0x3ac   :  { %v2589_v24 = vmul.f32 %v7380_v36, %v9393_v61  ;;  %v2476_v11 = vmul.f32 %v6771_v25, %v9398_v54  ;;  %v9403_v54 = vld [vmem:[#allocation145_spill] sm:$0xff] }
 0x3ad   :  { %2932 = vmatpush.msrb.mxu3 %v2524_v0  ;;  %v9400_v0 = vld [vmem:[#allocation180_spill] sm:$0xff] }
 0x3ae   :  { %2968 = vmatpush.msrb.mxu2 %v2589_v24  ;;  %v2541_v50 = vmul.f32 %v6821_v53, %v9400_v0  ;;  %v2509_v0 = vmul.f32 %v6803_v7, %v9403_v54  ;;  %v9407_v54 = vld [vmem:[#allocation91_spill] sm:$0xff] }
 0x3af   :  { %2933 = vmatpush.msrb.mxu3 %v2508_v34  ;;  %v2460_v34 = vmul.f32 %v6712_v45, %v9401_v15  ;;  %v9404_v15 = vld [vmem:[#allocation124_spill] sm:$0xff] }
 0x3b0   :  { %2969 = vmatpush.msrb.mxu2 %v2573_v5  ;;  %v9402_v5 = vld [vmem:[#allocation76_spill] sm:$0xff]  ;;  %v2493_v23 = vmul.f32 %v6807_v62, %v9404_v15 }
 0x3b1   :  { %v7394_v61 = vpop.permute.xlu0 %2308  ;;  %2934 = vmatpush.msrb.mxu3 %v2492_v9  ;;  %v7396_v26 = vpop.permute.xlu2 %2378  ;;  %v2525_v9 = vmul.f32 %v6793_v4, %v9402_v5  ;;  %v9406_v5 = vld [vmem:[#allocation152_spill] sm:$0xff]  ;;  %v9422_v4 = vld [vmem:[#allocation154_spill] sm:$0xff] }
 0x3b2   :  { %9399 = vst [vmem:[#allocation39_spill] sm:$0xff] %v7396_v26  ;;  %v7400_v24 = vpop.permute.xlu1 %2348  ;;  %2970 = vmatpush.msrb.mxu2 %v2557_v3  ;;  %v3157_v3 = vld [vmem:[%s7975_s6] sm:$0xff]  ;;  %v2365_v53 = vmul.f32 %v7130_v27, %v9422_v4 }
 0x3b3   :  { %v7408_v12 = vsel %vm941_vm7, %v7400_v24, %v7340_v48  ;;  %2935 = vmatpush.msrb.mxu3 %v2476_v11  ;;  %3160 = vperm.xlu1 %3576, %v3157_v3   ;;  %v9408_v3 = vld [vmem:[#allocation114_spill] sm:$0xff]  ;;  %v9409_v48 = vld [vmem:[#allocation153_spill] sm:$0xff] }
 0x3b4   :  { %2971 = vmatpush.msrb.mxu2 %v2541_v50  ;;  %v2477_v50 = vmul.f32 %v9406_v5, %v9405_v22  ;;  %v2461_v7 = vmul.f32 %v9409_v48, %v9408_v3  ;;  %v9414_v3 = vld [vmem:[#allocation109_spill] sm:$0xff] }
 0x3b5   :  { %2936 = vmatpush.msrb.mxu3 %v2460_v34 }
 0x3b6   :  { %2972 = vmatpush.msrb.mxu2 %v2525_v9 }
 0x3b8   :  { %2973 = vmatpush.msrb.mxu2 %v2509_v0 }
 0x3b9   :  { %v2421_v21 = vpop.permute.xlu0 %2420  ;;  %v7419_v11 = vpop.permute.xlu2 %2258 }
 0x3ba   :  { %v2440_v34 = vsel %vm1023_vm5, %v7366_v35, %v2421_v21  ;;  %v7426_v9 = vpop.permute.xlu1 %2310  ;;  %2974 = vmatpush.msrb.mxu2 %v2493_v23  ;;  %v9410_v35 = vld [vmem:[#allocation28_spill] sm:$0xff] }
 0x3bb   :  { %v2442_v55 = vmul.f32 %v2440_v34, %v9407_v54  ;;  %v9412_v34 = vld [vmem:[#allocation189_spill] sm:$0xff] }
 0x3bc   :  { %2975 = vmatpush.msrb.mxu2 %v2477_v50  ;;  %v2364_v54 = vmul.f32 %v7092_v44, %v9412_v34 }
 0x3bd   :  { %2857 = vmatpush.msra.mxu1 %v2442_v55  ;;  %v7445_v55 = vld [vmem:[%s7974_s2 + $0x8] sm:$0xff] }
 0x3be   :  { %2976 = vmatpush.msrb.mxu2 %v2461_v7  ;;  %v9411_v7 = vld [vmem:[#allocation51_spill] sm:$0xff] }
 0x3c1   :  { %v2381_v0 = vpop.permute.xlu0 %2380  ;;  %v7431_v15 = vpop.permute.xlu2 %2220 }
 0x3c2   :  { %v2400_v22 = vsel %vm982_vm15, %v7396_v26, %v2381_v0  ;;  %v7436_v5 = vpop.permute.xlu1 %2422 }
 0x3c3   :  { %v2402_v62 = vmul.f32 %v2400_v22, %v9410_v35  ;;  %v2439_v23 = vsel %vm1023_vm5, %v2421_v21, %v7436_v5  ;;  %v9413_v35 = vld [vmem:[#allocation121_spill] sm:$0xff] }
 0x3c4   :  { %v2443_v50 = vmul.f32 %v2439_v23, %v9411_v7  ;;  %v2324_v22 = vmul.f32 %v9414_v3, %v9413_v35  ;;  %v9415_v21 = vld [vmem:[#allocation33_spill] sm:$0xff] }
 0x3c5   :  { %2858 = vmatpush.msra.mxu1 %v2402_v62  ;;  %v2271_v26 = vsel %vm851_vm8, %v9415_v21, %v7296_v10  ;;  %v9416_v62 = vld [vmem:[#allocation45_spill] sm:$0xff] }
 0x3c6   :  { %2897 = vmatpush.msra.mxu0 %v2443_v50  ;;  %3207 = vmatmul.msk.f32.vlgmr.msra.gmra.mxu1 %vm1410_vm13, %v7445_v55  ;;  %v2231_v44 = vsel %vm9417_vm4, %v9416_v62, %v7290_v46  ;;  %v9418_v50 = vld [vmem:[#allocation106_spill] sm:$0xff]  ;;  %v9419_v35 = vld [vmem:[#allocation129_spill] sm:$0xff]  ;;  %vm9474_vm4 = vmmov %vm9432_vm3 }
 0x3c7   :  { %2903 = vmatpush.msrb.mxu1 %v2364_v54  ;;  %v2276_v34 = vmul.f32 %v2271_v26, %v9418_v50  ;;  %v9420_v10 = vld [vmem:[#allocation69_spill] sm:$0xff]  ;;  %v9425_v26 = vld [vmem:[#allocation112_spill] sm:$0xff] }
 0x3c8   :  { %v9423_v62 = vld [vmem:[#allocation37_spill] sm:$0xff]  ;;  %v2196_v50 = vmul.f32 %v7237_v14, %v9425_v26  ;;  %v9434_v26 = vld [vmem:[#allocation211_spill] sm:$0xff] }
 0x3c9   :  { %2904 = vmatpush.msrb.mxu1 %v2324_v22  ;;  %v7458_v48 = vpop.permute.xlu0 %2260  ;;  %v7460_v23 = vpop.permute.xlu2 %2138  ;;  %v9421_v22 = vld [vmem:[#allocation173_spill] sm:$0xff]  ;;  %v2151_v30 = vsel %vm9424_vm0, %v9423_v62, %v7352_v43 }
 0x3ca   :  { %v7466_v7 = vpop.permute.xlu1 %2382  ;;  %v2236_v21 = vmul.f32 %v2231_v44, %v9421_v22 }
 0x3cb   :  { %v2399_v54 = vsel %vm982_vm15, %v2381_v0, %v7466_v7  ;;  %2905 = vmatpush.msrb.mxu1 %v9419_v35  ;;  %v9426_v0 = vld [vmem:[#allocation116_spill] sm:$0xff] }
 0x3cc   :  { %v2403_v3 = vmul.f32 %v2399_v54, %v9420_v10  ;;  %v2325_v44 = vmul.f32 %v7162_v60, %v9426_v0  ;;  %v9428_v10 = vld [vmem:[#allocation228_spill] sm:$0xff]  ;;  %v9431_v60 = vld [vmem:[#allocation206_spill] sm:$0xff] }
 0x3cd   :  { %2906 = vmatpush.msrb.mxu1 %v2276_v34  ;;  %v9427_v34 = vld [vmem:[#allocation227_spill] sm:$0xff]  ;;  %v2116_v14 = vmul.f32 %v7251_v51, %v9428_v10  ;;  %v2076_v22 = vmul.f32 %v7245_v8, %v9431_v60  ;;  %v9433_v51 = vld [vmem:[#allocation201_spill] sm:$0xff] }
 0x3ce   :  { %2898 = vmatpush.msra.mxu0 %v2403_v3  ;;  %v2156_v54 = vmul.f32 %v2151_v30, %v9427_v34  ;;  %v2230_v3 = vsel %vm9429_vm12, %v7290_v46, %v7322_v42  ;;  %v2036_v46 = vmul.f32 %v6725_v28, %v9434_v26  ;;  %v9438_v34 = vld [vmem:[#allocation134_spill] sm:$0xff]  ;;  %v9439_v10 = vld [vmem:[#allocation125_spill] sm:$0xff]  ;;  %vm9490_vm12 = vmmov %vm9468_vm2 }
 0x3cf   :  { %3208 = vmatmul.msk.f32.vlgmr.msra.gmra.mxu0 %vm1410_vm13, %v7445_v55  ;;  %2907 = vmatpush.msrb.mxu1 %v2236_v21  ;;  %v2190_v21 = vsel %vm9432_vm3, %v7221_v29, %v7318_v52  ;;  %v2237_v62 = vmul.f32 %v2230_v3, %v9433_v51  ;;  %v9444_v51 = vld [vmem:[#allocation87_spill] sm:$0xff] }
 0x3d0   :  { %2943 = vmatpush.msrb.mxu0 %v2365_v53  ;;  %v9430_v53 = vld [vmem:[#allocation80_spill] sm:$0xff] }
 0x3d1   :  { %2908 = vmatpush.msrb.mxu1 %v2196_v50  ;;  %v7488_v4 = vpop.permute.xlu0 %2178  ;;  %v7490_v27 = vpop.permute.xlu2 %2352  ;;  %v2277_v30 = vmul.f32 %v7304_v58, %v9430_v53  ;;  %v9436_v58 = vld [vmem:[#allocation96_spill] sm:$0xff]  ;;  %v9437_v50 = vld [vmem:[#allocation22_spill] sm:$0xff] }
 0x3d2   :  { %2944 = vmatpush.msrb.mxu0 %v2325_v44  ;;  %v7492_v35 = vpop.permute.xlu1 %2218  ;;  %v2197_v8 = vmul.f32 %v2190_v21, %v9436_v58  ;;  %v1996_v0 = vmul.f32 %v6757_v56, %v9437_v50  ;;  %v9441_v53 = vld [vmem:[#allocation60_spill] sm:$0xff] }
 0x3d3   :  { %2909 = vmatpush.msrb.mxu1 %v2156_v54  ;;  %v1916_v56 = vmul.f32 %v6708_v57, %v9441_v53 }
 0x3d4   :  { %2945 = vmatpush.msrb.mxu0 %v6572_v47  ;;  %v2150_v47 = vsel %vm9435_vm9, %v7352_v43, %v7292_v40  ;;  %v1956_v43 = vmul.f32 %v6695_v41, %v9439_v10  ;;  %v2037_v41 = vmul.f32 %v6752_v16, %v9444_v51  ;;  %vm9502_vm9 = vmmov %vm9424_vm0 }
 0x3d5   :  { %2910 = vmatpush.msrb.mxu1 %v2116_v14  ;;  %v2157_v54 = vmul.f32 %v2150_v47, %v9438_v34  ;;  %v9440_v14 = vld [vmem:[#allocation83_spill] sm:$0xff]  ;;  %v9447_v47 = vld [vmem:[#allocation209_spill] sm:$0xff]  ;;  %v9450_v34 = vld [vmem:[#allocation12_spill] sm:$0xff] }
 0x3d6   :  { %2946 = vmatpush.msrb.mxu0 %v2277_v30  ;;  %v2117_v3 = vmul.f32 %v7350_v1, %v9440_v14  ;;  %v9442_v30 = vld [vmem:[#allocation73_spill] sm:$0xff]  ;;  %v9453_v14 = vld [vmem:[#allocation210_spill] sm:$0xff] }
 0x3d7   :  { %2911 = vmatpush.msrb.mxu1 %v2076_v22  ;;  %v2077_v60 = vmul.f32 %v7345_v32, %v9442_v30  ;;  %v9443_v22 = vld [vmem:[#allocation158_spill] sm:$0xff]  ;;  %v1997_v32 = vmul.f32 %v6767_v39, %v9447_v47  ;;  %v9456_v30 = vld [vmem:[#allocation92_spill] sm:$0xff] }
 0x3d8   :  { %2947 = vmatpush.msrb.mxu0 %v2237_v62  ;;  %v1876_v21 = vmul.f32 %v6736_v49, %v9443_v22  ;;  %v9445_v62 = vld [vmem:[#allocation142_spill] sm:$0xff]  ;;  %v9458_v22 = vld [vmem:[#allocation247_spill] sm:$0xff]  ;;  %v9463_v47 = vld [vmem:[#allocation236_spill] sm:$0xff] }
 0x3d9   :  { %2912 = vmatpush.msrb.mxu1 %v2036_v46  ;;  %v7519_v29 = vpop.permute.xlu0 %2140  ;;  %v7521_v44 = vpop.permute.xlu2 %2060  ;;  %v1836_v1 = vmul.f32 %v6677_v20, %v9445_v62  ;;  %v9446_v46 = vld [vmem:[#allocation161_spill] sm:$0xff]  ;;  %v9448_v20 = vld [vmem:[#allocation139_spill] sm:$0xff] }
 0x3da   :  { %2948 = vmatpush.msrb.mxu0 %v2197_v8  ;;  %v7524_v28 = vpop.permute.xlu1 %2180  ;;  %v1796_v57 = vmul.f32 %v6682_v19, %v9446_v46  ;;  %v7553_v16 = vsel %vm646_vm10, %v7364_v18, %v7521_v44  ;;  %v9460_v62 = vld [vmem:[#allocation117_spill] sm:$0xff] }
 0x3db   :  { %2913 = vmatpush.msrb.mxu1 %v1996_v0 }
 0x3dc   :  { %2949 = vmatpush.msrb.mxu0 %v2157_v54  ;;  %v9451_v54 = vld [vmem:[#allocation38_spill] sm:$0xff] }
 0x3dd   :  { %2914 = vmatpush.msrb.mxu1 %v1956_v43  ;;  %v2356_v10 = vsel %vm941_vm7, %v9451_v54, %v7400_v24  ;;  %v9455_v24 = vld [vmem:[#allocation167_spill] sm:$0xff] }
 0x3de   :  { %2950 = vmatpush.msrb.mxu0 %v2117_v3  ;;  %v9454_v3 = vld [vmem:[#allocation225_spill] sm:$0xff]  ;;  %v9469_v54 = vld [vmem:[#allocation199_spill] sm:$0xff] }
 0x3df   :  { %2915 = vmatpush.msrb.mxu1 %v1916_v56  ;;  %v2574_v53 = vmul.f32 %v7553_v16, %v9454_v3  ;;  %v1877_v56 = vmul.f32 %v6746_v6, %v9455_v24  ;;  %v2189_v3 = vsel %vm9474_vm4, %v7318_v52, %v7488_v4  ;;  %v9477_v24 = vld [vmem:[#allocation232_spill] sm:$0xff] }
 0x3e0   :  { %2951 = vmatpush.msrb.mxu0 %v2077_v60  ;;  %v2366_v60 = vmul.f32 %v2356_v10, %v9456_v30  ;;  %v2149_v30 = vsel %vm9424_vm0, %v7292_v40, %v7460_v23  ;;  %v2315_v40 = vsel %vm900_vm6, %v7394_v61, %v7426_v9 }
 0x3e1   :  { %2916 = vmatpush.msrb.mxu1 %v1876_v21  ;;  %v2425_v26 = vpop.permute.xlu0 %2424 }
 0x3e2   :  { %2952 = vmatpush.msrb.mxu0 %v2037_v41  ;;  %v2438_v49 = vsel %vm1023_vm5, %v7436_v5, %v2425_v26  ;;  %v2101_v58 = vpop.permute.xlu1 %2100  ;;  %v7547_v8 = vpop.permute.xlu2 %2384  ;;  %v9449_v5 = vld [vmem:[#allocation133_spill] sm:$0xff]  ;;  %v9459_v41 = vld [vmem:[#allocation143_spill] sm:$0xff] }
 0x3e3   :  { %v2444_v50 = vmul.f32 %v2438_v49, %v9448_v20  ;;  %v7559_v19 = vsel %vm9366_vm1, %v7368_v38, %v2101_v58  ;;  %v2398_v39 = vsel %vm982_vm15, %v7466_v7, %v7547_v8  ;;  %2917 = vmatpush.msrb.mxu1 %v1836_v1  ;;  %v1957_v0 = vmul.f32 %v6789_v13, %v9449_v5  ;;  %v9452_v38 = vld [vmem:[#allocation187_spill] sm:$0xff]  ;;  %v9464_v20 = vld [vmem:[#allocation164_spill] sm:$0xff] }
 0x3e4   :  { %v2590_v18 = vmul.f32 %v7559_v19, %v9450_v34  ;;  %2953 = vmatpush.msrb.mxu0 %v1997_v32  ;;  %v2404_v43 = vmul.f32 %v2398_v39, %v9452_v38  ;;  %v1917_v7 = vmul.f32 %v6731_v31, %v9453_v14  ;;  %v2316_v13 = vsel %vm900_vm6, %v7154_v63, %v7394_v61  ;;  %v9457_v31 = vld [vmem:[#allocation13_spill] sm:$0xff]  ;;  %v9465_v39 = vld [vmem:[#allocation16_spill] sm:$0xff]  ;;  %v9487_v61 = vld [vmem:[#allocation171_spill] sm:$0xff] }
 0x3e5   :  { %2918 = vmatpush.msrb.mxu1 %v1796_v57  ;;  %2937 = vmatpush.msrb.mxu3 %v2444_v50  ;;  %v2558_v21 = vmul.f32 %v9458_v22, %v9457_v31  ;;  %v1837_v63 = vmul.f32 %v6771_v25, %v9459_v41  ;;  %v2326_v1 = vmul.f32 %v2316_v13, %v9460_v62  ;;  %v9462_v57 = vld [vmem:[#allocation55_spill] sm:$0xff]  ;;  %v9467_v34 = vld [vmem:[#allocation240_spill] sm:$0xff]  ;;  %v9476_v13 = vld [vmem:[#allocation82_spill] sm:$0xff] }
 0x3e6   :  { %2954 = vmatpush.msrb.mxu0 %v1957_v0  ;;  %2919 = vmatmul.f32.vlgmr.msrb.gmra.mxu1 %v7332_v2  ;;  %v2542_v32 = vmul.f32 %v9463_v47, %v9462_v57  ;;  %v2269_v49 = vsel %vm851_vm8, %v7156_v59, %v7419_v11  ;;  %v1797_v50 = vmul.f32 %v6712_v45, %v9464_v20  ;;  %v9466_v0 = vld [vmem:[#allocation157_spill] sm:$0xff]  ;;  %v9472_v14 = vld [vmem:[#allocation72_spill] sm:$0xff]  ;;  %v9480_v62 = vld [vmem:[#allocation234_spill] sm:$0xff] }
 0x3e7   :  { %3008 = vmatpush.msra.mxu1 %v2590_v18  ;;  %2938 = vmatpush.msrb.mxu3 %v2404_v43  ;;  %v2526_v18 = vmul.f32 %v9467_v34, %v9466_v0  ;;  %v2229_v59 = vsel %vm9468_vm2, %v7322_v42, %v7492_v35  ;;  %v9470_v45 = vld [vmem:[#allocation81_spill] sm:$0xff]  ;;  %v9471_v43 = vld [vmem:[#allocation170_spill] sm:$0xff]  ;;  %v9481_v57 = vld [vmem:[#allocation179_spill] sm:$0xff] }
 0x3e8   :  { %2955 = vmatpush.msrb.mxu0 %v1917_v7  ;;  %3209 = vmatmul.msk.f32.vlgmr.msrb.gmra.mxu3 %vm1410_vm13, %v7445_v55  ;;  %v2278_v38 = vmul.f32 %v2269_v49, %v9470_v45  ;;  %v9478_v31 = vld [vmem:[#allocation93_spill] sm:$0xff]  ;;  %v9482_v49 = vld [vmem:[#allocation203_spill] sm:$0xff] }
 0x3e9   :  { %3009 = vmatpush.msra.mxu1 %v2574_v53  ;;  %v7590_v51 = vpop.permute.xlu0 %2102  ;;  %2983 = vmatpush.msra.mxu3 %v2366_v60  ;;  %v9475_v53 = vld [vmem:[#allocation149_spill] sm:$0xff]  ;;  %v2198_v52 = vmul.f32 %v2189_v3, %v9478_v31  ;;  %v2158_v20 = vmul.f32 %v2149_v30, %v9482_v49  ;;  %v2188_v31 = vsel %vm9432_vm3, %v7488_v4, %v7524_v28 }
 0x3ea   :  { %2956 = vmatpush.msrb.mxu0 %v1877_v56  ;;  %v7598_v6 = vsel %vm9461_vm14, %v2101_v58, %v7590_v51  ;;  %v7600_v46 = vpop.permute.xlu1 %2426  ;;  %v2238_v42 = vmul.f32 %v2229_v59, %v9475_v53  ;;  %v2494_v56 = vmul.f32 %v9477_v24, %v9476_v13  ;;  %v9492_v3 = vld [vmem:[#allocation245_spill] sm:$0xff]  ;;  %vm9590_vm14 = vmmov %vm9424_vm0 }
 0x3eb   :  { %3010 = vmatpush.msra.mxu1 %v2558_v21  ;;  %v7608_v25 = vpop.permute.xlu2 %2262  ;;  %v2591_v58 = vmul.f32 %v7598_v6, %v9465_v39  ;;  %v2437_v5 = vsel %vm1023_vm5, %v2425_v26, %v7600_v46  ;;  %2984 = vmatpush.msra.mxu3 %v2326_v1  ;;  %v9473_v26 = vld [vmem:[#allocation243_spill] sm:$0xff]  ;;  %v9484_v39 = vld [vmem:[#allocation238_spill] sm:$0xff]  ;;  %v9496_v30 = vld [vmem:[#allocation229_spill] sm:$0xff] }
 0x3ec   :  { %2957 = vmatpush.msrb.mxu0 %v1837_v63  ;;  %v2445_v10 = vmul.f32 %v2437_v5, %v9469_v54  ;;  %v2510_v7 = vmul.f32 %v9473_v26, %v9472_v14  ;;  %v9479_v63 = vld [vmem:[#allocation155_spill] sm:$0xff]  ;;  %v2327_v54 = vmul.f32 %v2315_v40, %v9487_v61  ;;  %v2228_v14 = vsel %vm9490_vm12, %v7492_v35, %v7431_v15  ;;  %v9501_v40 = vld [vmem:[#allocation94_spill] sm:$0xff]  ;;  %v9503_v4 = vld [vmem:[#allocation141_spill] sm:$0xff] }
 0x3ed   :  { %3011 = vmatpush.msra.mxu1 %v2542_v32  ;;  %2985 = vmatpush.msra.mxu3 %v9471_v43  ;;  %v2478_v1 = vmul.f32 %v9480_v62, %v9479_v63  ;;  %v9498_v63 = vld [vmem:[#allocation168_spill] sm:$0xff]  ;;  %v9507_v61 = vld [vmem:[#allocation235_spill] sm:$0xff] }
 0x3ee   :  { %2958 = vmatpush.msrb.mxu0 %v1797_v50  ;;  %2977 = vmatpush.msrb.mxu2 %v2445_v10  ;;  %v9483_v50 = vld [vmem:[#allocation61_spill] sm:$0xff]  ;;  %v9488_v10 = vld [vmem:[#allocation183_spill] sm:$0xff] }
 0x3ef   :  { %3012 = vmatpush.msra.mxu1 %v2526_v18  ;;  %2986 = vmatpush.msra.mxu3 %v2278_v38  ;;  %v9486_v18 = vld [vmem:[#allocation217_spill] sm:$0xff]  ;;  %v2078_v45 = vmul.f32 %v7375_v17, %v9488_v10  ;;  %v9491_v17 = vld [vmem:[#allocation230_spill] sm:$0xff]  ;;  %v9508_v10 = vld [vmem:[#allocation123_spill] sm:$0xff] }
 0x3f0   :  { %3048 = vmatpush.msra.mxu0 %v2591_v58  ;;  %v2462_v58 = vmul.f32 %v9484_v39, %v9483_v50  ;;  %v2118_v59 = vmul.f32 %v7380_v36, %v9486_v18  ;;  %v9489_v36 = vld [vmem:[#allocation192_spill] sm:$0xff]  ;;  %v7683_v53 = vsel %vm605_vm11, %v9492_v3, %v9491_v17  ;;  %v2199_v50 = vmul.f32 %v2188_v31, %v9503_v4  ;;  %v9512_v3 = vld [vmem:[#allocation239_spill] sm:$0xff]  ;;  %v9514_v31 = vld [vmem:[#allocation62_spill] sm:$0xff] }
 0x3f1   :  { %3013 = vmatpush.msra.mxu1 %v2510_v7  ;;  %v2387_v60 = vpop.permute.xlu0 %2386  ;;  %2959 = vmatmul.f32.vlgmr.msrb.gmra.mxu0 %v7332_v2  ;;  %v2038_v43 = vmul.f32 %v6817_v33, %v9489_v36  ;;  %v9494_v33 = vld [vmem:[#allocation190_spill] sm:$0xff]  ;;  %v2559_v49 = vmul.f32 %v7683_v53, %v9501_v40  ;;  %v9510_v36 = vld [vmem:[#allocation169_spill] sm:$0xff]  ;;  %v9520_v40 = vld [vmem:[#allocation224_spill] sm:$0xff] }
 0x3f2   :  { %2987 = vmatpush.msra.mxu3 %v2238_v42  ;;  %v2397_v21 = vsel %vm982_vm15, %v7547_v8, %v2387_v60  ;;  %v7644_v41 = vpop.permute.xlu1 %2312  ;;  %v9485_v8 = vld [vmem:[#allocation182_spill] sm:$0xff]  ;;  %v9522_v4 = vld [vmem:[#allocation177_spill] sm:$0xff] }
 0x3f3   :  { %v2405_v32 = vmul.f32 %v2397_v21, %v9481_v57  ;;  %3014 = vmatpush.msra.mxu1 %v2494_v56  ;;  %v2367_v5 = vmul.f32 %v7408_v12, %v9485_v8  ;;  %v7658_v0 = vpop.permute.xlu2 %2142  ;;  %v2268_v12 = vsel %vm851_vm8, %v7419_v11, %v7458_v48  ;;  %v9493_v11 = vld [vmem:[#allocation137_spill] sm:$0xff]  ;;  %v9495_v56 = vld [vmem:[#allocation178_spill] sm:$0xff]  ;;  %v9499_v57 = vld [vmem:[#allocation75_spill] sm:$0xff] }
 0x3f4   :  { %2988 = vmatpush.msra.mxu3 %v2198_v52  ;;  %v2279_v42 = vmul.f32 %v2268_v12, %v9493_v11  ;;  %v1998_v35 = vmul.f32 %v9496_v30, %v9495_v56  ;;  %v9497_v52 = vld [vmem:[#allocation17_spill] sm:$0xff]  ;;  %v9504_v8 = vld [vmem:[#allocation144_spill] sm:$0xff]  ;;  %v9513_v30 = vld [vmem:[#allocation151_spill] sm:$0xff] }
 0x3f5   :  { %3015 = vmatpush.msra.mxu1 %v2478_v1  ;;  %2978 = vmatpush.msrb.mxu2 %v2405_v32  ;;  %v2239_v1 = vmul.f32 %v2228_v14, %v9498_v63  ;;  %v9511_v14 = vld [vmem:[#allocation160_spill] sm:$0xff] }
 0x3f6   :  { %2989 = vmatpush.msra.mxu3 %v2158_v20  ;;  %3210 = vmatmul.msk.f32.vlgmr.msrb.gmra.mxu2 %vm1410_vm13, %v7445_v55  ;;  %v2148_v20 = vsel %vm9502_vm9, %v7460_v23, %v7519_v29  ;;  %v2527_v11 = vmul.f32 %v9512_v3, %v9511_v14  ;;  %v9516_v63 = vld [vmem:[#allocation152_spill] sm:$0xff] }
 0x3f7   :  { %3016 = vmatpush.msra.mxu1 %v2462_v58  ;;  %3023 = vmatpush.msra.mxu2 %v2367_v5  ;;  %v9505_v5 = vld [vmem:[#allocation59_spill] sm:$0xff] }
 0x3f8   :  { %2990 = vmatpush.msra.mxu3 %v2118_v59  ;;  %v1918_v18 = vmul.f32 %v9505_v5, %v9504_v8  ;;  %v9506_v59 = vld [vmem:[#allocation56_spill] sm:$0xff]  ;;  %v9523_v8 = vld [vmem:[#allocation107_spill] sm:$0xff]  ;;  %v9524_v5 = vld [vmem:[#allocation153_spill] sm:$0xff] }
 0x3f9   :  { %3024 = vmatpush.msra.mxu2 %v2327_v54  ;;  %v7671_v38 = vpop.permute.xlu0 %2222  ;;  %v2543_v54 = vmul.f32 %v9507_v61, %v9506_v59  ;;  %v9525_v59 = vld [vmem:[#allocation65_spill] sm:$0xff] }
 0x3fa   :  { %2991 = vmatpush.msra.mxu3 %v2078_v45  ;;  %v2063_v7 = vpop.permute.xlu1 %2062  ;;  %v9509_v45 = vld [vmem:[#allocation52_spill] sm:$0xff] }
 0x3fb   :  { %v7689_v13 = vsel %vm646_vm10, %v7521_v44, %v2063_v7  ;;  %3025 = vmatpush.msra.mxu2 %v9494_v33  ;;  %v9500_v44 = vld [vmem:[#allocation130_spill] sm:$0xff]  ;;  %v2389_v58 = vpop.permute.xlu2 %2388  ;;  %v1878_v12 = vmul.f32 %v9509_v45, %v9508_v10  ;;  %v9527_v45 = vld [vmem:[#allocation77_spill] sm:$0xff] }
 0x3fc   :  { %v2575_v21 = vmul.f32 %v7689_v13, %v9497_v52  ;;  %2992 = vmatpush.msra.mxu3 %v2038_v43  ;;  %v1958_v32 = vmul.f32 %v9500_v44, %v9499_v57  ;;  %v2159_v43 = vmul.f32 %v2148_v20, %v9510_v36  ;;  %v9517_v57 = vld [vmem:[#allocation98_spill] sm:$0xff] }
 0x3fd   :  { %3026 = vmatpush.msra.mxu2 %v2279_v42  ;;  %v2396_v42 = vsel %vm982_vm15, %v2387_v60, %v2389_v58  ;;  %v9518_v44 = vld [vmem:[#allocation242_spill] sm:$0xff] }
 0x3fe   :  { %2993 = vmatpush.msra.mxu3 %v1998_v35  ;;  %3049 = vmatpush.msra.mxu0 %v2575_v21  ;;  %v2119_v35 = vmul.f32 %v7559_v19, %v9513_v30  ;;  %v9515_v21 = vld [vmem:[#allocation99_spill] sm:$0xff]  ;;  %v2511_v60 = vmul.f32 %v9518_v44, %v9517_v57  ;;  %v9521_v19 = vld [vmem:[#allocation58_spill] sm:$0xff]  ;;  %v9533_v30 = vld [vmem:[#allocation233_spill] sm:$0xff] }
 0x3ff   :  { %3027 = vmatpush.msra.mxu2 %v2239_v1  ;;  %v1838_v1 = vmul.f32 %v9516_v63, %v9515_v21  ;;  %v7743_v20 = vsel %vm9366_vm1, %v7590_v51, %v9521_v19  ;;  %v2314_v51 = vsel %vm900_vm6, %v7426_v9, %v7644_v41  ;;  %v9532_v9 = vld [vmem:[#allocation31_spill] sm:$0xff]  ;;  %v9536_v21 = vld [vmem:[#allocation237_spill] sm:$0xff] }
 0x400   :  { %2994 = vmatpush.msra.mxu3 %v1958_v32  ;;  %3050 = vmatpush.msra.mxu0 %v2559_v49  ;;  %v9519_v32 = vld [vmem:[#allocation176_spill] sm:$0xff]  ;;  %v2079_v49 = vmul.f32 %v7553_v16, %v9520_v40  ;;  %v2039_v16 = vmul.f32 %v9458_v22, %v9527_v45 }
 0x401   :  { %3028 = vmatpush.msra.mxu2 %v2199_v50  ;;  %v2429_v23 = vpop.permute.xlu0 %2428  ;;  %v2406_v50 = vmul.f32 %v2396_v42, %v9522_v4  ;;  %v9531_v42 = vld [vmem:[#allocation131_spill] sm:$0xff]  ;;  %v9539_v40 = vld [vmem:[#allocation156_spill] sm:$0xff] }
 0x402   :  { %2995 = vmatpush.msra.mxu3 %v1918_v18  ;;  %v2436_v33 = vsel %vm1023_vm5, %v7600_v46, %v2429_v23  ;;  %v7724_v56 = vpop.permute.xlu1 %2182  ;;  %3051 = vmatpush.msra.mxu0 %v2543_v54  ;;  %v2354_v46 = vsel %vm941_vm7, %v9519_v32, %v7490_v27  ;;  %v1798_v18 = vmul.f32 %v9524_v5, %v9523_v8  ;;  %v9526_v54 = vld [vmem:[#allocation231_spill] sm:$0xff]  ;;  %v9541_v5 = vld [vmem:[#allocation226_spill] sm:$0xff] }
 0x403   :  { %v2446_v52 = vmul.f32 %v2436_v33, %v9514_v31  ;;  %3029 = vmatpush.msra.mxu2 %v2159_v43  ;;  %v2495_v10 = vmul.f32 %v9526_v54, %v9525_v59  ;;  %v9529_v43 = vld [vmem:[#allocation63_spill] sm:$0xff]  ;;  %v2592_v33 = vmul.f32 %v7743_v20, %v9531_v42 }
 0x404   :  { %2996 = vmatpush.msra.mxu3 %v1878_v12  ;;  %3052 = vmatpush.msra.mxu0 %v2527_v11  ;;  %v9528_v12 = vld [vmem:[#allocation222_spill] sm:$0xff]  ;;  %v7765_v14 = vsel %vm605_vm11, %v9491_v17, %v9529_v43  ;;  %v9535_v17 = vld [vmem:[#allocation15_spill] sm:$0xff]  ;;  %v9549_v43 = vld [vmem:[#allocation40_spill] sm:$0xff] }
 0x405   :  { %3030 = vmatpush.msra.mxu2 %v2119_v35  ;;  %3017 = vmatpush.msra.mxu1 %v2446_v52  ;;  %v7759_v36 = vsel %vm646_vm10, %v2063_v7, %v9528_v12  ;;  %v9530_v11 = vld [vmem:[#allocation214_spill] sm:$0xff]  ;;  %v2479_v35 = vmul.f32 %v9533_v30, %v9532_v9  ;;  %v9534_v7 = vld [vmem:[#allocation41_spill] sm:$0xff]  ;;  %v2463_v63 = vmul.f32 %v9536_v21, %v9535_v17  ;;  %vm9546_vm10 = vmmov %vm9468_vm2 }
 0x406   :  { %2997 = vmatpush.msra.mxu3 %v1838_v1  ;;  %3053 = vmatpush.msra.mxu0 %v2511_v60  ;;  %v2368_v22 = vmul.f32 %v2354_v46, %v9530_v11  ;;  %v1999_v31 = vmul.f32 %v9463_v47, %v9534_v7  ;;  %v9537_v1 = vld [vmem:[#allocation103_spill] sm:$0xff]  ;;  %v9538_v60 = vld [vmem:[#allocation25_spill] sm:$0xff]  ;;  %v9540_v47 = vld [vmem:[#allocation216_spill] sm:$0xff] }
 0x407   :  { %3031 = vmatpush.msra.mxu2 %v2079_v49  ;;  %3018 = vmatpush.msra.mxu1 %v2406_v50  ;;  %v2328_v57 = vmul.f32 %v2314_v51, %v9537_v1  ;;  %v2576_v32 = vmul.f32 %v7759_v36, %v9538_v60  ;;  %v1959_v49 = vmul.f32 %v9467_v34, %v9539_v40  ;;  %v9542_v34 = vld [vmem:[#allocation215_spill] sm:$0xff]  ;;  %v9547_v51 = vld [vmem:[#allocation113_spill] sm:$0xff]  ;;  %vm9554_vm11 = vmmov %vm9432_vm3 }
 0x408   :  { %2998 = vmatpush.msra.mxu3 %v1798_v18  ;;  %3054 = vmatpush.msra.mxu0 %v2495_v10  ;;  %v2560_v19 = vmul.f32 %v7765_v14, %v9540_v47  ;;  %v2267_v50 = vsel %vm851_vm8, %v7458_v48, %v7608_v25  ;;  %v1919_v59 = vmul.f32 %v9473_v26, %v9542_v34  ;;  %v9544_v10 = vld [vmem:[#allocation251_spill] sm:$0xff]  ;;  %v9555_v7 = vld [vmem:[#allocation221_spill] sm:$0xff]  ;;  %v9556_v17 = vld [vmem:[#allocation220_spill] sm:$0xff] }
 0x409   :  { %2999 = vmatmul.f32.vlgmr.msra.gmra.mxu3 %v7332_v2  ;;  %3032 = vmatpush.msra.mxu2 %v2039_v16  ;;  %v7775_v52 = vpop.permute.xlu0 %2390  ;;  %v9545_v16 = vld [vmem:[#allocation250_spill] sm:$0xff]  ;;  %v9548_v12 = vld [vmem:[#allocation219_spill] sm:$0xff]  ;;  %v2280_v11 = vmul.f32 %v2267_v50, %v9549_v43  ;;  %v9558_v60 = vld [vmem:[#allocation212_spill] sm:$0xff] }
 0x40a   :  { %3088 = vmatpush.msrb.mxu3 %v2592_v33  ;;  %3063 = vmatpush.msrb.mxu1 %v2368_v22  ;;  %v2431_v46 = vpop.permute.xlu1 %2430  ;;  %v2395_v8 = vsel %vm982_vm15, %v2389_v58, %v7775_v52  ;;  %v2361_v48 = vsel %vm941_vm7, %v7490_v27, %v9545_v16  ;;  %v2227_v58 = vsel %vm9546_vm10, %v7431_v15, %v7671_v38  ;;  %v9550_v22 = vld [vmem:[#allocation90_spill] sm:$0xff]  ;;  %v9551_v27 = vld [vmem:[#allocation21_spill] sm:$0xff]  ;;  %v9557_v1 = vld [vmem:[#allocation163_spill] sm:$0xff] }
 0x40b   :  { %v2435_v4 = vsel %vm1023_vm5, %v2429_v23, %v2431_v46  ;;  %3055 = vmatpush.msra.mxu0 %v2479_v35  ;;  %3033 = vmatpush.msra.mxu2 %v1999_v31  ;;  %v9543_v23 = vld [vmem:[#allocation213_spill] sm:$0xff]  ;;  %v1879_v26 = vmul.f32 %v9477_v24, %v9548_v12  ;;  %v2407_v42 = vmul.f32 %v2395_v8, %v9550_v22  ;;  %v9552_v33 = vld [vmem:[#allocation246_spill] sm:$0xff]  ;;  %v9553_v35 = vld [vmem:[#allocation252_spill] sm:$0xff] }
 0x40c   :  { %v2447_v18 = vmul.f32 %v2435_v4, %v9541_v5  ;;  %3089 = vmatpush.msrb.mxu3 %v2576_v32  ;;  %3064 = vmatpush.msrb.mxu1 %v2328_v57  ;;  %v2544_v45 = vmul.f32 %v9544_v10, %v9543_v23  ;;  %v2528_v9 = vmul.f32 %v9552_v33, %v9551_v27  ;;  %v9559_v32 = vld [vmem:[#allocation248_spill] sm:$0xff]  ;;  %vm9560_vm7 = vmmov %vm9424_vm0  ;;  %v9562_v47 = vld [vmem:[#allocation162_spill] sm:$0xff] }
 0x40d   :  { %3056 = vmatpush.msra.mxu0 %v2463_v63  ;;  %3034 = vmatpush.msra.mxu2 %v1959_v49  ;;  %v2321_v15 = vsel %vm900_vm6, %v7644_v41, %v9553_v35  ;;  %v2187_v24 = vsel %vm9554_vm11, %v7524_v28, %v7724_v56  ;;  %v2369_v31 = vmul.f32 %v2361_v48, %v9555_v7  ;;  %v9561_v28 = vld [vmem:[#allocation118_spill] sm:$0xff]  ;;  %v9563_v4 = vld [vmem:[#allocation11_spill] sm:$0xff]  ;;  %v9565_v8 = vld [vmem:[#allocation249_spill] sm:$0xff] }
 0x40e   :  { %3090 = vmatpush.msrb.mxu3 %v2560_v19  ;;  %3065 = vmatpush.msrb.mxu1 %v9547_v51  ;;  %v2240_v63 = vmul.f32 %v2227_v58, %v9556_v17  ;;  %v1839_v57 = vmul.f32 %v9480_v62, %v9557_v1  ;;  %v2512_v40 = vmul.f32 %v9559_v32, %v9558_v60  ;;  %v9564_v62 = vld [vmem:[#allocation50_spill] sm:$0xff]  ;;  %v9566_v34 = vld [vmem:[#allocation253_spill] sm:$0xff]  ;;  %v9572_v12 = vld [vmem:[#allocation208_spill] sm:$0xff] }
 0x40f   :  { %3211 = vmatmul.msk.f32.vlgmr.msra.gmra.mxu1 %vm1410_vm13, %v7445_v55  ;;  %3057 = vmatpush.msra.mxu0 %v2447_v18  ;;  %v2147_v41 = vsel %vm9560_vm7, %v7519_v29, %v7658_v0  ;;  %v2329_v49 = vmul.f32 %v2321_v15, %v9561_v28  ;;  %v2200_v19 = vmul.f32 %v2187_v24, %v9562_v47  ;;  %v9569_v16 = vld [vmem:[#allocation241_spill] sm:$0xff]  ;;  %v9571_v58 = vld [vmem:[#allocation46_spill] sm:$0xff]  ;;  %v9573_v43 = vld [vmem:[#allocation36_spill] sm:$0xff] }
 0x410   :  { %3091 = vmatpush.msrb.mxu3 %v2544_v45  ;;  %3035 = vmatpush.msra.mxu2 %v1919_v59  ;;  %v1799_v50 = vmul.f32 %v9484_v39, %v9563_v4  ;;  %v2496_v5 = vmul.f32 %v9565_v8, %v9564_v62  ;;  %v2266_v29 = vsel %vm851_vm8, %v7608_v25, %v9566_v34  ;;  %v9567_v59 = vld [vmem:[#allocation174_spill] sm:$0xff]  ;;  %v9570_v39 = vld [vmem:[#allocation223_spill] sm:$0xff]  ;;  %vm9574_vm6 = vmmov %vm9468_vm2 }
 0x411   :  { %3066 = vmatpush.msrb.mxu1 %v2280_v11  ;;  %3058 = vmatpush.msra.mxu0 %v2407_v42  ;;  %v2160_v23 = vmul.f32 %v2147_v41, %v9567_v59  ;;  %v9568_v45 = vld [vmem:[#allocation34_spill] sm:$0xff]  ;;  %v2593_v51 = vmul.f32 %v9571_v58, %v9570_v39  ;;  %v2226_v25 = vsel %vm9574_vm6, %v7671_v38, %v9573_v43  ;;  %v9577_v27 = vld [vmem:[#allocation244_spill] sm:$0xff]  ;;  %v9581_v38 = vld [vmem:[#allocation23_spill] sm:$0xff] }
 0x412   :  { %3092 = vmatpush.msrb.mxu3 %v2528_v9  ;;  %3036 = vmatpush.msra.mxu2 %v1879_v26  ;;  %v7841_v18 = vpop.permute.xlu1 %2432  ;;  %v2480_v48 = vmul.f32 %v9569_v16, %v9568_v45  ;;  %v2120_v26 = vmul.f32 %v7598_v6, %v9572_v12  ;;  %v9575_v22 = vld [vmem:[#allocation110_spill] sm:$0xff]  ;;  %v9579_v15 = vld [vmem:[#allocation204_spill] sm:$0xff]  ;;  %v2080_v17 = vmul.f32 %v7689_v13, %v9581_v38  ;;  %vm9583_vm8 = vmmov %vm9432_vm3 }
 0x413   :  { %3067 = vmatpush.msrb.mxu1 %v2240_v63  ;;  %3103 = vmatpush.msrb.mxu0 %v2369_v31  ;;  %v2434_v11 = vsel %vm1023_vm5, %v2431_v46, %v7841_v18  ;;  %v9576_v42 = vld [vmem:[#allocation166_spill] sm:$0xff]  ;;  %v9580_v7 = vld [vmem:[#allocation88_spill] sm:$0xff]  ;;  %v2393_v31 = vpop.permute.xlu2 %2392  ;;  %v9582_v63 = vld [vmem:[#allocation159_spill] sm:$0xff] }
 0x414   :  { %3093 = vmatpush.msrb.mxu3 %v2512_v40  ;;  %3037 = vmatpush.msra.mxu2 %v1839_v57  ;;  %v2464_v9 = vmul.f32 %v9577_v27, %v9576_v42  ;;  %v9578_v35 = vld [vmem:[#allocation186_spill] sm:$0xff]  ;;  %v2281_v6 = vmul.f32 %v2266_v29, %v9580_v7  ;;  %v2186_v46 = vsel %vm9583_vm8, %v7724_v56, %v9582_v63  ;;  %v9584_v57 = vld [vmem:[#allocation205_spill] sm:$0xff]  ;;  %v9588_v47 = vld [vmem:[#allocation27_spill] sm:$0xff] }
 0x415   :  { %3068 = vmatpush.msrb.mxu1 %v2200_v19  ;;  %3104 = vmatpush.msrb.mxu0 %v2329_v49  ;;  %v2577_v24 = vmul.f32 %v9579_v15, %v9578_v35  ;;  %v2394_v1 = vsel %vm982_vm15, %v7775_v52, %v2393_v31  ;;  %v2241_v60 = vmul.f32 %v2226_v25, %v9584_v57  ;;  %v9585_v40 = vld [vmem:[#allocation26_spill] sm:$0xff]  ;;  %v9587_v49 = vld [vmem:[#allocation196_spill] sm:$0xff]  ;;  %v9589_v4 = vld [vmem:[#allocation71_spill] sm:$0xff] }
 0x416   :  { %3094 = vmatpush.msrb.mxu3 %v2496_v5  ;;  %3038 = vmatpush.msra.mxu2 %v1799_v50  ;;  %v2448_v41 = vmul.f32 %v2434_v11, %v9585_v40  ;;  %v9586_v28 = vld [vmem:[#allocation66_spill] sm:$0xff]  ;;  %v2561_v19 = vmul.f32 %v9588_v47, %v9587_v49  ;;  %v2146_v56 = vsel %vm9590_vm14, %v7658_v0, %v9589_v4  ;;  %v9591_v52 = vld [vmem:[#allocation104_spill] sm:$0xff]  ;;  %v9594_v29 = vld [vmem:[#allocation35_spill] sm:$0xff] }
 0x417   :  { %3069 = vmatpush.msrb.mxu1 %v2160_v23  ;;  %3105 = vmatpush.msrb.mxu0 %v9575_v22  ;;  %v2040_v13 = vmul.f32 %v7683_v53, %v9586_v28  ;;  %v2201_v50 = vmul.f32 %v2186_v46, %v9591_v52  ;;  %v9592_v62 = vld [vmem:[#allocation128_spill] sm:$0xff]  ;;  %v9596_v45 = vld [vmem:[#allocation181_spill] sm:$0xff]  ;;  %v9597_v0 = vld [vmem:[#allocation79_spill] sm:$0xff] }
 0x418   :  { %3039 = vmatmul.f32.vlgmr.msra.gmra.mxu2 %v7332_v2  ;;  %3095 = vmatpush.msrb.mxu3 %v2480_v48  ;;  %v2408_v5 = vmul.f32 %v2394_v1, %v9592_v62  ;;  %v9593_v34 = vld [vmem:[#allocation188_spill] sm:$0xff]  ;;  %v2161_v48 = vmul.f32 %v2146_v56, %v9596_v45  ;;  %v9598_v39 = vld [vmem:[#allocation175_spill] sm:$0xff]  ;;  %v9602_v25 = vld [vmem:[#allocation30_spill] sm:$0xff] }
 0x419   :  { %3128 = vmatpush.msrb.mxu2 %v2593_v51  ;;  %3070 = vmatpush.msrb.mxu1 %v2120_v26  ;;  %v2545_v59 = vmul.f32 %v9594_v29, %v9593_v34  ;;  %v9595_v53 = vld [vmem:[#allocation136_spill] sm:$0xff]  ;;  %v2529_v58 = vmul.f32 %v9598_v39, %v9597_v0  ;;  %v9599_v51 = vld [vmem:[#allocation42_spill] sm:$0xff]  ;;  %v9600_v26 = vld [vmem:[#allocation165_spill] sm:$0xff] }
 0x41a   :  { %3106 = vmatpush.msrb.mxu0 %v2281_v6  ;;  %3096 = vmatpush.msrb.mxu3 %v2464_v9  ;;  %v2000_v23 = vmul.f32 %v9507_v61, %v9595_v53  ;;  %v1960_v12 = vmul.f32 %v9512_v3, %v9599_v51  ;;  %v2121_v43 = vmul.f32 %v7743_v20, %v9600_v26  ;;  %v9601_v61 = vld [vmem:[#allocation147_spill] sm:$0xff]  ;;  %v9603_v22 = vld [vmem:[#allocation85_spill] sm:$0xff]  ;;  %v9604_v9 = vld [vmem:[#allocation14_spill] sm:$0xff] }
 0x41b   :  { %3129 = vmatpush.msrb.mxu2 %v2577_v24  ;;  %3071 = vmatpush.msrb.mxu1 %v2080_v17  ;;  %v2513_v11 = vmul.f32 %v9602_v25, %v9601_v61  ;;  %v1920_v42 = vmul.f32 %v9518_v44, %v9603_v22  ;;  %v2081_v35 = vmul.f32 %v7759_v36, %v9604_v9  ;;  %v9605_v3 = vld [vmem:[#allocation127_spill] sm:$0xff]  ;;  %v9606_v15 = vld [vmem:[#allocation53_spill] sm:$0xff]  ;;  %v9608_v6 = vld [vmem:[#allocation148_spill] sm:$0xff] }
 0x41c   :  { %3107 = vmatpush.msrb.mxu0 %v2241_v60  ;;  %3097 = vmatpush.msrb.mxu3 %v2448_v41  ;;  %v2497_v20 = vmul.f32 %v9606_v15, %v9605_v3  ;;  %v9607_v24 = vld [vmem:[#allocation207_spill] sm:$0xff]  ;;  %v2041_v38 = vmul.f32 %v7765_v14, %v9608_v6  ;;  %v9610_v63 = vld [vmem:[#allocation18_spill] sm:$0xff]  ;;  %v9611_v46 = vld [vmem:[#allocation197_spill] sm:$0xff] }
 0x41d   :  { %3130 = vmatpush.msrb.mxu2 %v2561_v19  ;;  %3072 = vmatpush.msrb.mxu1 %v2040_v13  ;;  %v1880_v7 = vmul.f32 %v9526_v54, %v9607_v24  ;;  %v9609_v17 = vld [vmem:[#allocation111_spill] sm:$0xff]  ;;  %v1840_v36 = vmul.f32 %v9533_v30, %v9611_v46  ;;  %v9612_v1 = vld [vmem:[#allocation108_spill] sm:$0xff]  ;;  %v9613_v60 = vld [vmem:[#allocation29_spill] sm:$0xff] }
 0x41e   :  { %3108 = vmatpush.msrb.mxu0 %v2201_v50  ;;  %3098 = vmatpush.msrb.mxu3 %v2408_v5  ;;  %v2481_v44 = vmul.f32 %v9610_v63, %v9609_v17  ;;  %v2001_v57 = vmul.f32 %v9544_v10, %v9612_v1  ;;  %v2441_v54 = vsel %vm1023_vm5, %v7841_v18, %v9613_v60  ;;  %v9614_v14 = vld [vmem:[#allocation122_spill] sm:$0xff]  ;;  %v9615_v40 = vld [vmem:[#allocation57_spill] sm:$0xff]  ;;  %v9616_v28 = vld [vmem:[#allocation140_spill] sm:$0xff]  ;;  %v2840_v5 = vpop.f32.mrf.mxu3 }
 0x41f   :  { %3212 = vmatmul.msk.f32.vlgmr.msra.gmra.mxu0 %vm1410_vm13, %v7445_v55  ;;  %3131 = vmatpush.msrb.mxu2 %v2545_v59  ;;  %v2465_v41 = vmul.f32 %v9615_v40, %v9614_v14  ;;  %v1800_v13 = vmul.f32 %v9536_v21, %v9616_v28  ;;  %v9617_v49 = vld [vmem:[#allocation198_spill] sm:$0xff]  ;;  %v9618_v47 = vld [vmem:[#allocation39_spill] sm:$0xff]  ;;  %v9619_v19 = vld [vmem:[#allocation172_spill] sm:$0xff] }
 0x420   :  { %3073 = vmatpush.msrb.mxu1 %v2000_v23  ;;  %3109 = vmatpush.msrb.mxu0 %v2161_v48  ;;  %v1961_v30 = vmul.f32 %v9552_v33, %v9617_v49  ;;  %v2401_v10 = vsel %vm982_vm15, %v2393_v31, %v9618_v47  ;;  %v2449_v18 = vmul.f32 %v2441_v54, %v9619_v19  ;;  %v9620_v4 = vld [vmem:[#allocation202_spill] sm:$0xff]  ;;  %v9621_v52 = vld [vmem:[#allocation19_spill] sm:$0xff]  ;;  %v2880_v23 = vpop.f32.mrf.mxu2  ;;  %v9627_v15 = vld [vmem:[#allocation9_spill] sm:$0xff] }
 0x421   :  { %3132 = vmatpush.msrb.mxu2 %v2529_v58  ;;  %3213 = vmatmul.msk.f32.vlgmr.msrb.gmra.mxu3 %vm1410_vm13, %v7445_v55  ;;  %v1921_v56 = vmul.f32 %v9559_v32, %v9620_v4  ;;  %v2409_v50 = vmul.f32 %v2401_v10, %v9621_v52  ;;  %v9622_v21 = vld [vmem:[#allocation95_spill] sm:$0xff]  ;;  %v1841_v31 = vmul.f32 %v9569_v16, %v9623_v37  ;;  %v9624_v32 = vld [vmem:[#allocation32_spill] sm:$0xff]  ;;  %v9626_v51 = vld [vmem:[#allocation6_spill] sm:$0xff] }
 0x422   :  { %3074 = vmatpush.msrb.mxu1 %v1960_v12  ;;  %3110 = vmatpush.msrb.mxu0 %v2121_v43  ;;  %v1881_v33 = vmul.f32 %v9565_v8, %v9622_v21  ;;  %v1801_v62 = vmul.f32 %v9577_v27, %v9624_v32  ;;  %v3147_v8 = vpop.permute.xlu0 %3146  ;;  %v9630_v49 = vld [vmem:[#allocation4_spill] sm:$0xff]  ;;  %v9631_v32 = vld [vmem:[#allocation7_spill] sm:$0xff] }
 0x423   :  { %3133 = vmatpush.msrb.mxu2 %v2513_v11 }
 0x424   :  { %3075 = vmatpush.msrb.mxu1 %v1920_v42  ;;  %3111 = vmatpush.msrb.mxu0 %v2081_v35 }
 0x425   :  { %3134 = vmatpush.msrb.mxu2 %v2497_v20  ;;  %v3161_v53 = vpop.permute.xlu1 %3160 }
 0x426   :  { %3076 = vmatpush.msrb.mxu1 %v1880_v7  ;;  %3112 = vmatpush.msrb.mxu0 %v2041_v38  ;;  %v9628_v7 = vld [vmem:[#allocation10_spill] sm:$0xff] }
 0x427   :  { %3135 = vmatpush.msrb.mxu2 %v2481_v44 }
 0x428   :  { %3077 = vmatpush.msrb.mxu1 %v1840_v36  ;;  %3113 = vmatpush.msrb.mxu0 %v2001_v57 }
 0x429   :  { %3136 = vmatpush.msrb.mxu2 %v2465_v41  ;;  %v9629_v41 = vld [vmem:[#allocation3_spill] sm:$0xff] }
 0x42a   :  { %3078 = vmatpush.msrb.mxu1 %v1800_v13  ;;  %3114 = vmatpush.msrb.mxu0 %v1961_v30 }
 0x42b   :  { %3079 = vmatmul.f32.vlgmr.msrb.gmra.mxu1 %v7332_v2  ;;  %3137 = vmatpush.msrb.mxu2 %v2449_v18 }
 0x42c   :  { %3115 = vmatpush.msrb.mxu0 %v1921_v56 }
 0x42d   :  { %3138 = vmatpush.msrb.mxu2 %v2409_v50 }
 0x42e   :  { %3116 = vmatpush.msrb.mxu0 %v1881_v33  ;;  %3214 = vmatmul.msk.f32.vlgmr.msrb.gmra.mxu2 %vm1410_vm13, %v7445_v55  ;;  %v9625_v55 = vld [vmem:[#allocation5_spill] sm:$0xff] }
 0x430   :  { %3117 = vmatpush.msrb.mxu0 %v1841_v31 }
 0x432   :  { %3118 = vmatpush.msrb.mxu0 %v1801_v62 }
 0x433   :  { %3119 = vmatmul.f32.vlgmr.msrb.gmra.mxu0 %v7332_v2 }
 0x443   :  { %v2860_v34 = vpop.f32.mrf.mxu1 }
 0x444   :  { %v2861_v29 = vadd.f32 %v2860_v34, %v2840_v5  ;;  %v9632_v34 = vld [vmem:[#allocation8_spill] sm:$0xff] }
 0x446   :  { %v3149_v59 = vmul.f32 %v3147_v8, %v2861_v29 }
 0x448   :  { %v3163_v48 = vadd.f32 %v3161_v53, %v3149_v59 }
 0x44a   :  { %v3171_v58 = vadd.f32 %v3163_v48, %v9625_v55 }
 0x44c   :  { %v2900_v45 = vpop.f32.mrf.mxu0  ;;  %v3179_v12 = vmax.f32 %v3171_v58, 0.0 }
 0x44d   :  { %v2901_v16 = vadd.f32 %v2900_v45, %v2880_v23 }
 0x44f   :  { %v3150_v0 = vmul.f32 %v3147_v8, %v2901_v16 }
 0x451   :  { %v3164_v39 = vadd.f32 %v3161_v53, %v3150_v0 }
 0x453   :  { %v3172_v27 = vadd.f32 %v3164_v39, %v9626_v51 }
 0x455   :  { %v3180_v26 = vmax.f32 %v3172_v27, 0.0 }
 0x457   :  { %v3187_v43 = vpack.c.bf16 %v3180_v26, %v3179_v12 }
 0x459   :  { %3191 = vst [vmem:[%s7976_s7] sm:$0xff] %v3187_v43 }
 0x463   :  { %v2920_v2 = vpop.f32.mrf.mxu1 }
 0x46b   :  { %v2940_v61 = vpop.f32.mrf.mxu3 }
 0x46c   :  { %v2941_v25 = vadd.f32 %v2940_v61, %v2920_v2 }
 0x46e   :  { %v3151_v11 = vmul.f32 %v3147_v8, %v2941_v25  ;;  %v2960_v22 = vpop.f32.mrf.mxu0 }
 0x470   :  { %v3165_v9 = vadd.f32 %v3161_v53, %v3151_v11 }
 0x472   :  { %v3173_v20 = vadd.f32 %v3165_v9, %v9627_v15 }
 0x474   :  { %v3181_v38 = vmax.f32 %v3173_v20, 0.0 }
 0x479   :  { %v2980_v42 = vpop.f32.mrf.mxu2 }
 0x47a   :  { %v2981_v35 = vadd.f32 %v2980_v42, %v2960_v22 }
 0x47c   :  { %v3152_v3 = vmul.f32 %v3147_v8, %v2981_v35 }
 0x47e   :  { %v3166_v24 = vadd.f32 %v3161_v53, %v3152_v3 }
 0x480   :  { %v3174_v6 = vadd.f32 %v3166_v24, %v9628_v7 }
 0x482   :  { %v3182_v17 = vmax.f32 %v3174_v6, 0.0 }
 0x484   :  { %v3188_v63 = vpack.c.bf16 %v3182_v17, %v3181_v38 }
 0x486   :  { %3192 = vst [vmem:[%s7976_s7 + $0x8] sm:$0xff] %v3188_v63 }
 0x48c   :  { %v3000_v44 = vpop.f32.mrf.mxu3  ;;  %v3020_v46 = vpop.f32.mrf.mxu1 }
 0x48d   :  { %v3021_v36 = vadd.f32 %v3020_v46, %v3000_v44 }
 0x48f   :  { %v3153_v1 = vmul.f32 %v3147_v8, %v3021_v36 }
 0x491   :  { %v3167_v54 = vadd.f32 %v3161_v53, %v3153_v1 }
 0x493   :  { %v3175_v28 = vadd.f32 %v3167_v54, %v9629_v41 }
 0x495   :  { %v3183_v47 = vmax.f32 %v3175_v28, 0.0 }
 0x49b   :  { %v3040_v57 = vpop.f32.mrf.mxu2 }
 0x49c   :  { %v3060_v60 = vpop.f32.mrf.mxu0 }
 0x49d   :  { %v3061_v14 = vadd.f32 %v3060_v60, %v3040_v57 }
 0x49f   :  { %v3154_v40 = vmul.f32 %v3147_v8, %v3061_v14 }
 0x4a1   :  { %v3168_v13 = vadd.f32 %v3161_v53, %v3154_v40 }
 0x4a3   :  { %v3176_v30 = vadd.f32 %v3168_v13, %v9630_v49 }
 0x4a4   :  { %v3100_v18 = vpop.f32.mrf.mxu3 }
 0x4a5   :  { %v3184_v10 = vmax.f32 %v3176_v30, 0.0 }
 0x4a7   :  { %v3189_v19 = vpack.c.bf16 %v3184_v10, %v3183_v47 }
 0x4a8   :  { %v3080_v4 = vpop.f32.mrf.mxu1 }
 0x4a9   :  { %3193 = vst [vmem:[%s7976_s7 + $0x10] sm:$0xff] %v3189_v19  ;;  %v3101_v56 = vadd.f32 %v3100_v18, %v3080_v4 }
 0x4ab   :  { %v3155_v52 = vmul.f32 %v3147_v8, %v3101_v56 }
 0x4ad   :  { %v3169_v33 = vadd.f32 %v3161_v53, %v3155_v52 }
 0x4af   :  { %v3177_v62 = vadd.f32 %v3169_v33, %v9631_v32 }
 0x4b0   :  { %v3120_v50 = vpop.f32.mrf.mxu0 }
 0x4b1   :  { %v3140_v21 = vpop.f32.mrf.mxu2  ;;  %v3185_v59 = vmax.f32 %v3177_v62, 0.0 }
 0x4b2   :  { %v3141_v37 = vadd.f32 %v3140_v21, %v3120_v50 }
 0x4b4   :  { %v3156_v31 = vmul.f32 %v3147_v8, %v3141_v37 }
 0x4b6   :  { %v3170_v5 = vadd.f32 %v3161_v53, %v3156_v31 }
 0x4b8   :  { %v3178_v29 = vadd.f32 %v3170_v5, %v9632_v34 }
 0x4ba   :  { %v3186_v23 = vmax.f32 %v3178_v29, 0.0 }
 0x4bc   :  { %v3190_v45 = vpack.c.bf16 %v3186_v23, %v3185_v59 }
 0x4be   :  { %3194 = vst [vmem:[%s7976_s7 + $0x18] sm:$0xff] %v3190_v45 }

</bundles_post_ra>
